<compile_context>
chip_gen: v5e
topology: v5e:2x2
jax: 0.10.0
libtpu: 0.0.40
codegen_flags: <defaults>
</compile_context>

<pallas_src>
import functools

import jax
import jax.numpy as jnp
from jax import lax
from jax.experimental import pallas as pl
from jax.experimental.pallas import tpu as pltpu


# ----------------------------------------------------------------------------
# VMEM budget: per-generation (v7x 64 MiB, v5e/v6e 128 MiB) with 25% headroom.
# ----------------------------------------------------------------------------
def _vmem_limit():
    try:
        cap = int(pltpu.get_tpu_info().vmem_capacity_bytes)
    except Exception:
        cap = 64 * 1024 * 1024                      # v7x-safe fallback
    return max(32 * 1024 * 1024, (cap * 3) // 4)


# ----------------------------------------------------------------------------
# Pallas kernels
# ----------------------------------------------------------------------------
def _layers_kernel(x_ref, wo_ref, bo_ref, g1_ref, be1_ref,
                   w1_ref, b1_ref, w2_ref, b2_ref, g2_ref, be2_ref,
                   out_ref, *, NB, S, E, H, D):
    """One transformer block for NB batch elements; grid = (batch_group, layer).

    x_ref    : (NB, S, E)  f32   initial activation (token+pos embeddings)
    wo_ref   : (1, E, E)   bf16  attention output projection (in, out)
    w1_ref   : (1, E, FF)  bf16 ; w2_ref: (1, FF, E) bf16   FFN linears
    b*/g*/be*: (1, 1, *)   f32   biases / LayerNorm gamma / beta
    out_ref  : (NB, S, E)  f32   carried activation (VMEM-resident over layers)
    """
    layer = pl.program_id(1)

    @pl.when(layer == 0)
    def _():
        out_ref[...] = x_ref[...]

    x = out_ref[...]                                  # (NB, S, E) f32, resident
    xb = x.astype(jnp.bfloat16)
    scale = 1.0 / (float(E) ** 0.5)                   # divide by embed_size**0.5

    # ---- multi-head self-attention: all (batch, head) pairs in ONE batched
    #      dot_general pair (q = k = v = x, per the reference forward) --------
    heads = [xb[n, :, h * D:(h + 1) * D]              # (S, D) bf16
             for n in range(NB) for h in range(H)]
    xh = jnp.stack(heads, axis=0)                     # (B, S, D), B = NB*H

    energy = jnp.einsum('bqd,bkd->bqk', xh, xh,
                        preferred_element_type=jnp.float32) * scale   # (B,S,S)
    m = jnp.max(energy, axis=-1, keepdims=True)
    e = jnp.exp(energy - m)
    p = e * pl.reciprocal(jnp.sum(e, axis=-1, keepdims=True), approx=True)
    ctx = jnp.einsum('bqk,bkd->bqd', p.astype(jnp.bfloat16), xh,
                     preferred_element_type=jnp.float32)              # (B,S,D)

    # reassemble (NB*S, E): lane-concat heads, sublane-concat batch elements
    rows = [jnp.concatenate([ctx[n * H + h] for h in range(H)], axis=-1)
            for n in range(NB)]                       # NB x (S, E)
    ctx2 = jnp.concatenate(rows, axis=0)              # (NB*S, E) f32

    x2 = x.reshape(NB * S, E)                         # batch merged into M axis

    # fused output projection: one (NB*S, E) @ (E, E) MXU matmul
    attn_out = jnp.dot(ctx2.astype(jnp.bfloat16), wo_ref[0],
                       preferred_element_type=jnp.float32) + bo_ref[0]

    # --- residual + LayerNorm 1 (f32) ---
    res1 = attn_out + x2
    mu1 = jnp.mean(res1, axis=-1, keepdims=True)
    var1 = jnp.mean((res1 - mu1) ** 2, axis=-1, keepdims=True)
    h1 = (res1 - mu1) * lax.rsqrt(var1 + 1e-5) * g1_ref[0] + be1_ref[0]

    # --- FFN: Linear -> ReLU -> Linear (bf16 matmuls, f32 accumulation) ---
    ff = jnp.dot(h1.astype(jnp.bfloat16), w1_ref[0],
                 preferred_element_type=jnp.float32) + b1_ref[0]
    ff = jnp.maximum(ff, 0.0)
    ff = jnp.dot(ff.astype(jnp.bfloat16), w2_ref[0],
                 preferred_element_type=jnp.float32) + b2_ref[0]

    # --- residual + LayerNorm 2 (f32) ---
    res2 = ff + h1
    mu2 = jnp.mean(res2, axis=-1, keepdims=True)
    var2 = jnp.mean((res2 - mu2) ** 2, axis=-1, keepdims=True)
    y = (res2 - mu2) * lax.rsqrt(var2 + 1e-5) * g2_ref[0] + be2_ref[0]
    out_ref[...] = y.reshape(NB, S, E)


def _final_kernel(x_ref, w_ref, b_ref, out_ref, *, NB, S, E):
    """Vocab-projection tile: (NB*S, E) @ (E, TV) + (1, TV)."""
    x2 = x_ref[...].reshape(NB * S, E).astype(jnp.bfloat16)
    y = jnp.dot(x2, w_ref[...], preferred_element_type=jnp.float32) + b_ref[...]
    out_ref[...] = y.reshape(NB, S, -1)


# ----------------------------------------------------------------------------
# Wrappers (pallas_call plumbing)
# ----------------------------------------------------------------------------
def _lspec(block_shape):
    """Per-layer stacked parameter: block = one layer slice, indexed by l."""
    return pl.BlockSpec(block_shape, lambda g, l: (l, 0, 0))


def gpt2_layers(x, stacked, *, heads, batch_groups=2):
    """Run every transformer block in a single fused pallas_call."""
    N, S, E = x.shape
    L, _, FF = stacked["w1"].shape
    G = batch_groups if (batch_groups > 0 and N % batch_groups == 0) else 1
    NB = N // G
    D = E // heads
    kern = functools.partial(_layers_kernel, NB=NB, S=S, E=E, H=heads, D=D)

    flops = G * L * (4 * NB * heads * S * S * D       # energies + contexts
                     + 2 * NB * S * E * E             # Wo projection
                     + 4 * NB * S * E * FF)           # two FFN linears
    transcendentals = G * L * NB * heads * S * S      # softmax exp
    weight_bytes = 2 * (E * E + 2 * E * FF) + 4 * (5 * E + FF)
    bytes_accessed = G * L * weight_bytes + 2 * N * S * E * 4

    # NOTE: on v5e/v6e (128 MiB VMEM) w1/w2 BlockSpecs can additionally use
    # pipeline_mode=pl.Buffered(3) to deepen weight prefetch at real GPT2 sizes.
    return pl.pallas_call(
        kern,
        out_shape=jax.ShapeDtypeStruct((N, S, E), jnp.float32),
        grid=(G, L),
        in_specs=[
            pl.BlockSpec((NB, S, E), lambda g, l: (g, 0, 0)),   # x (layer 0 only)
            _lspec((1, E, E)),  _lspec((1, 1, E)),              # wo, bo
            _lspec((1, 1, E)),  _lspec((1, 1, E)),              # g1, be1
            _lspec((1, E, FF)), _lspec((1, 1, FF)),             # w1, b1
            _lspec((1, FF, E)), _lspec((1, 1, E)),              # w2, b2
            _lspec((1, 1, E)),  _lspec((1, 1, E)),              # g2, be2
        ],
        out_specs=pl.BlockSpec((NB, S, E), lambda g, l: (g, 0, 0)),  # resident over l
        compiler_params=pltpu.CompilerParams(
            dimension_semantics=("parallel", "arbitrary"),
            vmem_limit_bytes=_vmem_limit()),
        cost_estimate=pl.CostEstimate(flops=int(flops),
                                      transcendentals=int(transcendentals),
                                      bytes_accessed=int(bytes_accessed)),
    )(x, stacked["wo"], stacked["bo"], stacked["g1"], stacked["be1"],
      stacked["w1"], stacked["b1"], stacked["w2"], stacked["b2"],
      stacked["g2"], stacked["be2"])


def final_linear(x, w, b, *, batch_groups=2):
    """Vocab projection, padded to a multiple of 128 and tiled over vocab."""
    N, S, E = x.shape
    V = w.shape[1]
    Vp = ((V + 127) // 128) * 128
    if Vp != V:
        w = jnp.pad(w, ((0, 0), (0, Vp - V)))
        b = jnp.pad(b, ((0, 0), (0, Vp - V)))
    TV = 512 if Vp % 512 == 0 else (256 if Vp % 256 == 0 else 128)
    G = batch_groups if (batch_groups > 0 and N % batch_groups == 0) else 1
    NB = N // G

    out = pl.pallas_call(
        functools.partial(_final_kernel, NB=NB, S=S, E=E),
        out_shape=jax.ShapeDtypeStruct((N, S, Vp), jnp.float32),
        grid=(Vp // TV, G),                      # weight constant over inner axis
        in_specs=[pl.BlockSpec((NB, S, E), lambda j, g: (g, 0, 0)),
                  pl.BlockSpec((E, TV),    lambda j, g: (0, j)),
                  pl.BlockSpec((1, TV),    lambda j, g: (0, j))],
        out_specs=pl.BlockSpec((NB, S, TV), lambda j, g: (g, 0, j)),
        compiler_params=pltpu.CompilerParams(
            dimension_semantics=("parallel", "parallel"),
            vmem_limit_bytes=_vmem_limit()),
        cost_estimate=pl.CostEstimate(
            flops=2 * N * S * E * Vp, transcendentals=0,
            bytes_accessed=N * S * E * 4 + E * Vp * 2 + N * S * Vp * 4),
    )(x, w.astype(jnp.bfloat16), b)
    return out[..., :V] if Vp != V else out


def gpt2_forward(token_ids, params, *, heads, batch_groups=2):
    N, S = token_ids.shape
    tok = jnp.take(params["tok_emb"], token_ids, axis=0)        # (N, S, E)
    pos = params["pos_emb"][:S][None, :, :]                     # (1, S, E)
    x = tok + pos                                               # dropout == id

    layers = params["layers"]
    bf16 = jnp.bfloat16
    stacked = {
        "wo":  jnp.stack([lp["wo"] for lp in layers]).astype(bf16),
        "bo":  jnp.stack([lp["bo"] for lp in layers]),
        "g1":  jnp.stack([lp["g1"] for lp in layers]),
        "be1": jnp.stack([lp["be1"] for lp in layers]),
        "w1":  jnp.stack([lp["w1"] for lp in layers]).astype(bf16),
        "b1":  jnp.stack([lp["b1"] for lp in layers]),
        "w2":  jnp.stack([lp["w2"] for lp in layers]).astype(bf16),
        "b2":  jnp.stack([lp["b2"] for lp in layers]),
        "g2":  jnp.stack([lp["g2"] for lp in layers]),
        "be2": jnp.stack([lp["be2"] for lp in layers]),
    }
    x = gpt2_layers(x, stacked, heads=heads, batch_groups=batch_groups)
    return final_linear(x, params["w_out"], params["b_out"],
                        batch_groups=batch_groups)


# ----------------------------------------------------------------------------
# Deterministic parameter init
# ----------------------------------------------------------------------------
def init_params(key, *, vocab, E, layers, FE, max_length):
    def nrm(k, shape, s=0.02):
        return (s * jax.random.normal(k, shape)).astype(jnp.float32)

    keys = jax.random.split(key, 4 + layers)
    p = {
        "tok_emb": nrm(keys[0], (vocab, E)),
        "pos_emb": nrm(keys[1], (max_length, E)),
        "w_out":   nrm(keys[2], (E, vocab)),
        "b_out":   nrm(keys[3], (1, vocab)),
        "layers":  [],
    }
    for i in range(layers):
        ks = jax.random.split(keys[4 + i], 6)
        p["layers"].append({
            "wo": nrm(ks[0], (E, E)),       "bo": nrm(ks[1], (1, E)),
            "g1": jnp.ones((1, E), jnp.float32),
            "be1": jnp.zeros((1, E), jnp.float32),
            "w1": nrm(ks[2], (E, FE * E)),  "b1": nrm(ks[3], (1, FE * E)),
            "w2": nrm(ks[4], (FE * E, E)),  "b2": nrm(ks[5], (1, E)),
            "g2": jnp.ones((1, E), jnp.float32),
            "be2": jnp.zeros((1, E), jnp.float32),
        })
    return p


# ----------------------------------------------------------------------------
# Pure-JAX f32 reference (mirrors the PyTorch forward) for correctness check
# ----------------------------------------------------------------------------
def reference_forward(token_ids, params, *, heads):
    N, S = token_ids.shape
    E = params["tok_emb"].shape[1]
    D = E // heads
    x = jnp.take(params["tok_emb"], token_ids, axis=0) + params["pos_emb"][:S][None]

    def ln(z, g, b):
        mu = z.mean(-1, keepdims=True)
        var = ((z - mu) ** 2).mean(-1, keepdims=True)
        return (z - mu) / jnp.sqrt(var + 1e-5) * g + b

    for lp in params["layers"]:
        xh = x.reshape(N, S, heads, D)
        energy = jnp.einsum("nqhd,nkhd->nhqk", xh, xh)
        attn = jax.nn.softmax(energy / (E ** 0.5), axis=3)
        ctx = jnp.einsum("nhqk,nkhd->nqhd", attn, xh).reshape(N, S, E)
        attn_out = ctx @ lp["wo"] + lp["bo"]
        h1 = ln(attn_out + x, lp["g1"], lp["be1"])
        ff = jnp.maximum(h1 @ lp["w1"] + lp["b1"], 0.0) @ lp["w2"] + lp["b2"]
        x = ln(ff + h1, lp["g2"], lp["be2"])
    return x @ params["w_out"] + params["b_out"]


# ----------------------------------------------------------------------------
if __name__ == "__main__":
    # Small config consistent with the module (embed divisible by heads).
    # E = V = 128 keeps every output block lane-dense; N = 4 demonstrates both
    # batch-in-block weight reuse (N_blk = 2) and a 2-wide parallel axis (v7x).
    VOCAB, E, LAYERS, HEADS, FE, MAX_LEN = 128, 128, 2, 4, 4, 512
    N, S = 4, 32

    key = jax.random.PRNGKey(0)
    pkey, dkey = jax.random.split(key)
    params = init_params(pkey, vocab=VOCAB, E=E, layers=LAYERS, FE=FE,
                         max_length=MAX_LEN)
    token_ids = jax.random.randint(dkey, (N, S), 0, VOCAB, dtype=jnp.int32)

    logits = gpt2_forward(token_ids, params, heads=HEADS, batch_groups=2)
    logits = jax.block_until_ready(logits)

    ref = reference_forward(token_ids, params, heads=HEADS)
    assert logits.shape == (N, S, VOCAB)
    # bf16 MXU operands + approx reciprocal vs f32 reference -> loosened tol
    assert jnp.allclose(logits, ref, atol=2e-2, rtol=2e-2), "mismatch vs reference"

    print("KERNEL_OK")
</pallas_src>

<mosaic_0001>
module attributes {stable_mosaic.version = 11 : i64} {
  func.func @_layers_kernel(%arg0: i32, %arg1: i32, %arg2: memref<2x32x128xf32, #tpu.memory_space<vmem>>, %arg3: memref<1x128x128xbf16, #tpu.memory_space<vmem>>, %arg4: memref<1x1x128xf32, #tpu.memory_space<vmem>>, %arg5: memref<1x1x128xf32, #tpu.memory_space<vmem>>, %arg6: memref<1x1x128xf32, #tpu.memory_space<vmem>>, %arg7: memref<1x128x512xbf16, #tpu.memory_space<vmem>>, %arg8: memref<1x1x512xf32, #tpu.memory_space<vmem>>, %arg9: memref<1x512x128xbf16, #tpu.memory_space<vmem>>, %arg10: memref<1x1x128xf32, #tpu.memory_space<vmem>>, %arg11: memref<1x1x128xf32, #tpu.memory_space<vmem>>, %arg12: memref<1x1x128xf32, #tpu.memory_space<vmem>>, %arg13: memref<2x32x128xf32, #tpu.memory_space<vmem>>) attributes {dimension_semantics = [#tpu.dimension_semantics<parallel>, #tpu.dimension_semantics<arbitrary>], iteration_bounds = array<i64: 2, 2>, scalar_prefetch = 0 : i64, scratch_operands = 0 : i64, tpu.core_type = #tpu.core_type<tc>, window_params = [{transform_indices = @transform_0, window_bounds = array<i64: 2, 32, 128>}, {transform_indices = @transform_1, window_bounds = array<i64: 1, 128, 128>}, {transform_indices = @transform_2, window_bounds = array<i64: 1, 1, 128>}, {transform_indices = @transform_3, window_bounds = array<i64: 1, 1, 128>}, {transform_indices = @transform_4, window_bounds = array<i64: 1, 1, 128>}, {transform_indices = @transform_5, window_bounds = array<i64: 1, 128, 512>}, {transform_indices = @transform_6, window_bounds = array<i64: 1, 1, 512>}, {transform_indices = @transform_7, window_bounds = array<i64: 1, 512, 128>}, {transform_indices = @transform_8, window_bounds = array<i64: 1, 1, 128>}, {transform_indices = @transform_9, window_bounds = array<i64: 1, 1, 128>}, {transform_indices = @transform_10, window_bounds = array<i64: 1, 1, 128>}, {transform_indices = @transform_11, window_bounds = array<i64: 2, 32, 128>}]} {
    %c0_i32 = arith.constant 0 : i32
    %0 = arith.cmpi eq, %arg1, %c0_i32 : i32
    %1 = arith.extui %0 : i1 to i32
    %c0_i32_0 = arith.constant 0 : i32
    %2 = arith.cmpi ne, %1, %c0_i32_0 : i32
    scf.if %2 {
      %c0_54 = arith.constant 0 : index
      %c0_55 = arith.constant 0 : index
      %c0_56 = arith.constant 0 : index
      %147 = vector.load %arg2[%c0_54, %c0_55, %c0_56] : memref<2x32x128xf32, #tpu.memory_space<vmem>>, vector<2x32x128xf32>
      %c0_57 = arith.constant 0 : index
      %c0_58 = arith.constant 0 : index
      %c0_59 = arith.constant 0 : index
      %148 = vector.load %arg13[%c0_57, %c0_58, %c0_59] : memref<2x32x128xf32, #tpu.memory_space<vmem>>, vector<2x32x128xf32>
      tpu.vector_store %arg13[%c0_57, %c0_58, %c0_59], %147 {strides = array<i32>} : memref<2x32x128xf32, #tpu.memory_space<vmem>>, vector<2x32x128xf32>,
    } else {
    }
    %c0 = arith.constant 0 : index
    %c0_1 = arith.constant 0 : index
    %c0_2 = arith.constant 0 : index
    %3 = vector.load %arg13[%c0, %c0_1, %c0_2] : memref<2x32x128xf32, #tpu.memory_space<vmem>>, vector<2x32x128xf32>
    %4 = arith.truncf %3 : vector<2x32x128xf32> to vector<2x32x128xbf16>
    %5 = vector.extract_strided_slice %4 {offsets = [0, 0, 0], sizes = [1, 32, 32], strides = [1, 1, 1]} : vector<2x32x128xbf16> to vector<1x32x32xbf16>
    %6 = vector.shape_cast %5 : vector<1x32x32xbf16> to vector<32x32xbf16>
    %7 = vector.extract_strided_slice %4 {offsets = [0, 0, 32], sizes = [1, 32, 32], strides = [1, 1, 1]} : vector<2x32x128xbf16> to vector<1x32x32xbf16>
    %8 = vector.shape_cast %7 : vector<1x32x32xbf16> to vector<32x32xbf16>
    %9 = vector.extract_strided_slice %4 {offsets = [0, 0, 64], sizes = [1, 32, 32], strides = [1, 1, 1]} : vector<2x32x128xbf16> to vector<1x32x32xbf16>
    %10 = vector.shape_cast %9 : vector<1x32x32xbf16> to vector<32x32xbf16>
    %11 = vector.extract_strided_slice %4 {offsets = [0, 0, 96], sizes = [1, 32, 32], strides = [1, 1, 1]} : vector<2x32x128xbf16> to vector<1x32x32xbf16>
    %12 = vector.shape_cast %11 : vector<1x32x32xbf16> to vector<32x32xbf16>
    %13 = vector.extract_strided_slice %4 {offsets = [1, 0, 0], sizes = [1, 32, 32], strides = [1, 1, 1]} : vector<2x32x128xbf16> to vector<1x32x32xbf16>
    %14 = vector.shape_cast %13 : vector<1x32x32xbf16> to vector<32x32xbf16>
    %15 = vector.extract_strided_slice %4 {offsets = [1, 0, 32], sizes = [1, 32, 32], strides = [1, 1, 1]} : vector<2x32x128xbf16> to vector<1x32x32xbf16>
    %16 = vector.shape_cast %15 : vector<1x32x32xbf16> to vector<32x32xbf16>
    %17 = vector.extract_strided_slice %4 {offsets = [1, 0, 64], sizes = [1, 32, 32], strides = [1, 1, 1]} : vector<2x32x128xbf16> to vector<1x32x32xbf16>
    %18 = vector.shape_cast %17 : vector<1x32x32xbf16> to vector<32x32xbf16>
    %19 = vector.extract_strided_slice %4 {offsets = [1, 0, 96], sizes = [1, 32, 32], strides = [1, 1, 1]} : vector<2x32x128xbf16> to vector<1x32x32xbf16>
    %20 = vector.shape_cast %19 : vector<1x32x32xbf16> to vector<32x32xbf16>
    %21 = vector.shape_cast %6 : vector<32x32xbf16> to vector<1x32x32xbf16>
    %22 = vector.shape_cast %8 : vector<32x32xbf16> to vector<1x32x32xbf16>
    %23 = vector.shape_cast %10 : vector<32x32xbf16> to vector<1x32x32xbf16>
    %24 = vector.shape_cast %12 : vector<32x32xbf16> to vector<1x32x32xbf16>
    %25 = vector.shape_cast %14 : vector<32x32xbf16> to vector<1x32x32xbf16>
    %26 = vector.shape_cast %16 : vector<32x32xbf16> to vector<1x32x32xbf16>
    %27 = vector.shape_cast %18 : vector<32x32xbf16> to vector<1x32x32xbf16>
    %28 = vector.shape_cast %20 : vector<32x32xbf16> to vector<1x32x32xbf16>
    %29 = tpu.concatenate %21, %22, %23, %24, %25, %26, %27, %28 in 0 : vector<1x32x32xbf16>, vector<1x32x32xbf16>, vector<1x32x32xbf16>, vector<1x32x32xbf16>, vector<1x32x32xbf16>, vector<1x32x32xbf16>, vector<1x32x32xbf16>, vector<1x32x32xbf16> -> vector<8x32x32xbf16>
    "tpu.trace_start"() <{level = 10 : i32, message = "bqd,bkd->bqk"}> : () -> ()
    %cst = arith.constant dense<0.000000e+00> : vector<8x32x32xf32>
    %30 = tpu.matmul %29, %29, %cst {dimension_numbers = #tpu.dot_dimension_numbers<[2], [2], [1], [1], [0, 0, 0, 1, 1, 1], [0], [0]>} : vector<8x32x32xbf16>, vector<8x32x32xbf16>, vector<8x32x32xf32> -> vector<8x32x32xf32>
    "tpu.trace_stop"() : () -> ()
    %cst_3 = arith.constant 0.0883883461 : f32
    %31 = vector.broadcast %cst_3 : f32 to vector<8x32x32xf32>
    %32 = arith.mulf %30, %31 : vector<8x32x32xf32>
    %cst_4 = arith.constant dense<0xFF800000> : vector<8x32xf32>
    %33 = vector.multi_reduction <maximumf>, %32, %cst_4 [2] : vector<8x32x32xf32> to vector<8x32xf32>
    %34 = vector.shape_cast %33 : vector<8x32xf32> to vector<8x32x1xf32>
    %35 = vector.broadcast %34 : vector<8x32x1xf32> to vector<8x32x32xf32>
    %36 = arith.subf %32, %35 : vector<8x32x32xf32>
    %37 = math.exp %36 : vector<8x32x32xf32>
    %cst_5 = arith.constant dense<0.000000e+00> : vector<8x32xf32>
    %38 = vector.multi_reduction <add>, %37, %cst_5 [2] : vector<8x32x32xf32> to vector<8x32xf32>
    %39 = vector.shape_cast %38 : vector<8x32xf32> to vector<8x32x1xf32>
    %40 = tpu.reciprocal %39 {approx = true} : vector<8x32x1xf32> -> vector<8x32x1xf32>
    %41 = vector.broadcast %40 : vector<8x32x1xf32> to vector<8x32x32xf32>
    %42 = arith.mulf %37, %41 : vector<8x32x32xf32>
    %43 = arith.truncf %42 : vector<8x32x32xf32> to vector<8x32x32xbf16>
    "tpu.trace_start"() <{level = 10 : i32, message = "bqk,bkd->bqd"}> : () -> ()
    %cst_6 = arith.constant dense<0.000000e+00> : vector<8x32x32xf32>
    %44 = tpu.matmul %43, %29, %cst_6 {dimension_numbers = #tpu.dot_dimension_numbers<[2], [1], [1], [2], [0, 0, 0, 1, 1, 2], [0], [0]>} : vector<8x32x32xbf16>, vector<8x32x32xbf16>, vector<8x32x32xf32> -> vector<8x32x32xf32>
    "tpu.trace_stop"() : () -> ()
    %45 = vector.extract_strided_slice %44 {offsets = [0, 0, 0], sizes = [1, 32, 32], strides = [1, 1, 1]} : vector<8x32x32xf32> to vector<1x32x32xf32>
    %46 = vector.shape_cast %45 : vector<1x32x32xf32> to vector<32x32xf32>
    %47 = vector.extract_strided_slice %44 {offsets = [1, 0, 0], sizes = [1, 32, 32], strides = [1, 1, 1]} : vector<8x32x32xf32> to vector<1x32x32xf32>
    %48 = vector.shape_cast %47 : vector<1x32x32xf32> to vector<32x32xf32>
    %49 = vector.extract_strided_slice %44 {offsets = [2, 0, 0], sizes = [1, 32, 32], strides = [1, 1, 1]} : vector<8x32x32xf32> to vector<1x32x32xf32>
    %50 = vector.shape_cast %49 : vector<1x32x32xf32> to vector<32x32xf32>
    %51 = vector.extract_strided_slice %44 {offsets = [3, 0, 0], sizes = [1, 32, 32], strides = [1, 1, 1]} : vector<8x32x32xf32> to vector<1x32x32xf32>
    %52 = vector.shape_cast %51 : vector<1x32x32xf32> to vector<32x32xf32>
    %53 = tpu.concatenate %46, %48, %50, %52 in 1 : vector<32x32xf32>, vector<32x32xf32>, vector<32x32xf32>, vector<32x32xf32> -> vector<32x128xf32>
    %54 = vector.extract_strided_slice %44 {offsets = [4, 0, 0], sizes = [1, 32, 32], strides = [1, 1, 1]} : vector<8x32x32xf32> to vector<1x32x32xf32>
    %55 = vector.shape_cast %54 : vector<1x32x32xf32> to vector<32x32xf32>
    %56 = vector.extract_strided_slice %44 {offsets = [5, 0, 0], sizes = [1, 32, 32], strides = [1, 1, 1]} : vector<8x32x32xf32> to vector<1x32x32xf32>
    %57 = vector.shape_cast %56 : vector<1x32x32xf32> to vector<32x32xf32>
    %58 = vector.extract_strided_slice %44 {offsets = [6, 0, 0], sizes = [1, 32, 32], strides = [1, 1, 1]} : vector<8x32x32xf32> to vector<1x32x32xf32>
    %59 = vector.shape_cast %58 : vector<1x32x32xf32> to vector<32x32xf32>
    %60 = vector.extract_strided_slice %44 {offsets = [7, 0, 0], sizes = [1, 32, 32], strides = [1, 1, 1]} : vector<8x32x32xf32> to vector<1x32x32xf32>
    %61 = vector.shape_cast %60 : vector<1x32x32xf32> to vector<32x32xf32>
    %62 = tpu.concatenate %55, %57, %59, %61 in 1 : vector<32x32xf32>, vector<32x32xf32>, vector<32x32xf32>, vector<32x32xf32> -> vector<32x128xf32>
    %63 = tpu.concatenate %53, %62 in 0 : vector<32x128xf32>, vector<32x128xf32> -> vector<64x128xf32>
    %64 = vector.shape_cast %3 : vector<2x32x128xf32> to vector<64x128xf32>
    %65 = arith.truncf %63 : vector<64x128xf32> to vector<64x128xbf16>
    %c0_7 = arith.constant 0 : index
    %c0_8 = arith.constant 0 : index
    %c0_9 = arith.constant 0 : index
    %66 = vector.load %arg3[%c0_7, %c0_8, %c0_9] : memref<1x128x128xbf16, #tpu.memory_space<vmem>>, vector<1x128x128xbf16>
    %67 = vector.shape_cast %66 : vector<1x128x128xbf16> to vector<128x128xbf16>
    %cst_10 = arith.constant dense<0.000000e+00> : vector<64x128xf32>
    %68 = tpu.matmul %65, %67, %cst_10 {dimension_numbers = #tpu.dot_dimension_numbers<[1], [0], [0], [1], [0, 0, 1, 1], [], []>} : vector<64x128xbf16>, vector<128x128xbf16>, vector<64x128xf32> -> vector<64x128xf32>
    %c0_11 = arith.constant 0 : index
    %c0_12 = arith.constant 0 : index
    %c0_13 = arith.constant 0 : index
    %69 = vector.load %arg4[%c0_11, %c0_12, %c0_13] : memref<1x1x128xf32, #tpu.memory_space<vmem>>, vector<1x1x128xf32>
    %70 = vector.shape_cast %69 : vector<1x1x128xf32> to vector<1x128xf32>
    %71 = vector.broadcast %70 : vector<1x128xf32> to vector<64x128xf32>
    %72 = arith.addf %68, %71 : vector<64x128xf32>
    %73 = arith.addf %72, %64 : vector<64x128xf32>
    %cst_14 = arith.constant dense<0.000000e+00> : vector<64xf32>
    %74 = vector.multi_reduction <add>, %73, %cst_14 [1] : vector<64x128xf32> to vector<64xf32>
    %75 = vector.shape_cast %74 : vector<64xf32> to vector<64x1xf32>
    %cst_15 = arith.constant 1.280000e+02 : f32
    %76 = vector.broadcast %cst_15 : f32 to vector<64x1xf32>
    %77 = arith.divf %75, %76 : vector<64x1xf32>
    %78 = vector.broadcast %77 : vector<64x1xf32> to vector<64x128xf32>
    %79 = arith.subf %73, %78 : vector<64x128xf32>
    %80 = arith.mulf %79, %79 : vector<64x128xf32>
    %cst_16 = arith.constant dense<0.000000e+00> : vector<64xf32>
    %81 = vector.multi_reduction <add>, %80, %cst_16 [1] : vector<64x128xf32> to vector<64xf32>
    %82 = vector.shape_cast %81 : vector<64xf32> to vector<64x1xf32>
    %cst_17 = arith.constant 1.280000e+02 : f32
    %83 = vector.broadcast %cst_17 : f32 to vector<64x1xf32>
    %84 = arith.divf %82, %83 : vector<64x1xf32>
    %85 = vector.broadcast %77 : vector<64x1xf32> to vector<64x128xf32>
    %86 = arith.subf %73, %85 : vector<64x128xf32>
    %cst_18 = arith.constant 9.99999974E-6 : f32
    %87 = vector.broadcast %cst_18 : f32 to vector<64x1xf32>
    %88 = arith.addf %84, %87 : vector<64x1xf32>
    %89 = math.rsqrt %88 : vector<64x1xf32>
    %90 = vector.broadcast %89 : vector<64x1xf32> to vector<64x128xf32>
    %91 = arith.mulf %86, %90 : vector<64x128xf32>
    %c0_19 = arith.constant 0 : index
    %c0_20 = arith.constant 0 : index
    %c0_21 = arith.constant 0 : index
    %92 = vector.load %arg5[%c0_19, %c0_20, %c0_21] : memref<1x1x128xf32, #tpu.memory_space<vmem>>, vector<1x1x128xf32>
    %93 = vector.shape_cast %92 : vector<1x1x128xf32> to vector<1x128xf32>
    %94 = vector.broadcast %93 : vector<1x128xf32> to vector<64x128xf32>
    %95 = arith.mulf %91, %94 : vector<64x128xf32>
    %c0_22 = arith.constant 0 : index
    %c0_23 = arith.constant 0 : index
    %c0_24 = arith.constant 0 : index
    %96 = vector.load %arg6[%c0_22, %c0_23, %c0_24] : memref<1x1x128xf32, #tpu.memory_space<vmem>>, vector<1x1x128xf32>
    %97 = vector.shape_cast %96 : vector<1x1x128xf32> to vector<1x128xf32>
    %98 = vector.broadcast %97 : vector<1x128xf32> to vector<64x128xf32>
    %99 = arith.addf %95, %98 : vector<64x128xf32>
    %100 = arith.truncf %99 : vector<64x128xf32> to vector<64x128xbf16>
    %c0_25 = arith.constant 0 : index
    %c0_26 = arith.constant 0 : index
    %c0_27 = arith.constant 0 : index
    %101 = vector.load %arg7[%c0_25, %c0_26, %c0_27] : memref<1x128x512xbf16, #tpu.memory_space<vmem>>, vector<1x128x512xbf16>
    %102 = vector.shape_cast %101 : vector<1x128x512xbf16> to vector<128x512xbf16>
    %cst_28 = arith.constant dense<0.000000e+00> : vector<64x512xf32>
    %103 = tpu.matmul %100, %102, %cst_28 {dimension_numbers = #tpu.dot_dimension_numbers<[1], [0], [0], [1], [0, 0, 1, 1], [], []>} : vector<64x128xbf16>, vector<128x512xbf16>, vector<64x512xf32> -> vector<64x512xf32>
    %c0_29 = arith.constant 0 : index
    %c0_30 = arith.constant 0 : index
    %c0_31 = arith.constant 0 : index
    %104 = vector.load %arg8[%c0_29, %c0_30, %c0_31] : memref<1x1x512xf32, #tpu.memory_space<vmem>>, vector<1x1x512xf32>
    %105 = vector.shape_cast %104 : vector<1x1x512xf32> to vector<1x512xf32>
    %106 = vector.broadcast %105 : vector<1x512xf32> to vector<64x512xf32>
    %107 = arith.addf %103, %106 : vector<64x512xf32>
    %cst_32 = arith.constant 0.000000e+00 : f32
    %108 = vector.broadcast %cst_32 : f32 to vector<64x512xf32>
    %109 = arith.maximumf %107, %108 : vector<64x512xf32>
    %110 = arith.truncf %109 : vector<64x512xf32> to vector<64x512xbf16>
    %c0_33 = arith.constant 0 : index
    %c0_34 = arith.constant 0 : index
    %c0_35 = arith.constant 0 : index
    %111 = vector.load %arg9[%c0_33, %c0_34, %c0_35] : memref<1x512x128xbf16, #tpu.memory_space<vmem>>, vector<1x512x128xbf16>
    %112 = vector.shape_cast %111 : vector<1x512x128xbf16> to vector<512x128xbf16>
    %cst_36 = arith.constant dense<0.000000e+00> : vector<64x128xf32>
    %113 = tpu.matmul %110, %112, %cst_36 {dimension_numbers = #tpu.dot_dimension_numbers<[1], [0], [0], [1], [0, 0, 1, 1], [], []>} : vector<64x512xbf16>, vector<512x128xbf16>, vector<64x128xf32> -> vector<64x128xf32>
    %c0_37 = arith.constant 0 : index
    %c0_38 = arith.constant 0 : index
    %c0_39 = arith.constant 0 : index
    %114 = vector.load %arg10[%c0_37, %c0_38, %c0_39] : memref<1x1x128xf32, #tpu.memory_space<vmem>>, vector<1x1x128xf32>
    %115 = vector.shape_cast %114 : vector<1x1x128xf32> to vector<1x128xf32>
    %116 = vector.broadcast %115 : vector<1x128xf32> to vector<64x128xf32>
    %117 = arith.addf %113, %116 : vector<64x128xf32>
    %118 = arith.addf %117, %99 : vector<64x128xf32>
    %cst_40 = arith.constant dense<0.000000e+00> : vector<64xf32>
    %119 = vector.multi_reduction <add>, %118, %cst_40 [1] : vector<64x128xf32> to vector<64xf32>
    %120 = vector.shape_cast %119 : vector<64xf32> to vector<64x1xf32>
    %cst_41 = arith.constant 1.280000e+02 : f32
    %121 = vector.broadcast %cst_41 : f32 to vector<64x1xf32>
    %122 = arith.divf %120, %121 : vector<64x1xf32>
    %123 = vector.broadcast %122 : vector<64x1xf32> to vector<64x128xf32>
    %124 = arith.subf %118, %123 : vector<64x128xf32>
    %125 = arith.mulf %124, %124 : vector<64x128xf32>
    %cst_42 = arith.constant dense<0.000000e+00> : vector<64xf32>
    %126 = vector.multi_reduction <add>, %125, %cst_42 [1] : vector<64x128xf32> to vector<64xf32>
    %127 = vector.shape_cast %126 : vector<64xf32> to vector<64x1xf32>
    %cst_43 = arith.constant 1.280000e+02 : f32
    %128 = vector.broadcast %cst_43 : f32 to vector<64x1xf32>
    %129 = arith.divf %127, %128 : vector<64x1xf32>
    %130 = vector.broadcast %122 : vector<64x1xf32> to vector<64x128xf32>
    %131 = arith.subf %118, %130 : vector<64x128xf32>
    %cst_44 = arith.constant 9.99999974E-6 : f32
    %132 = vector.broadcast %cst_44 : f32 to vector<64x1xf32>
    %133 = arith.addf %129, %132 : vector<64x1xf32>
    %134 = math.rsqrt %133 : vector<64x1xf32>
    %135 = vector.broadcast %134 : vector<64x1xf32> to vector<64x128xf32>
    %136 = arith.mulf %131, %135 : vector<64x128xf32>
    %c0_45 = arith.constant 0 : index
    %c0_46 = arith.constant 0 : index
    %c0_47 = arith.constant 0 : index
    %137 = vector.load %arg11[%c0_45, %c0_46, %c0_47] : memref<1x1x128xf32, #tpu.memory_space<vmem>>, vector<1x1x128xf32>
    %138 = vector.shape_cast %137 : vector<1x1x128xf32> to vector<1x128xf32>
    %139 = vector.broadcast %138 : vector<1x128xf32> to vector<64x128xf32>
    %140 = arith.mulf %136, %139 : vector<64x128xf32>
    %c0_48 = arith.constant 0 : index
    %c0_49 = arith.constant 0 : index
    %c0_50 = arith.constant 0 : index
    %141 = vector.load %arg12[%c0_48, %c0_49, %c0_50] : memref<1x1x128xf32, #tpu.memory_space<vmem>>, vector<1x1x128xf32>
    %142 = vector.shape_cast %141 : vector<1x1x128xf32> to vector<1x128xf32>
    %143 = vector.broadcast %142 : vector<1x128xf32> to vector<64x128xf32>
    %144 = arith.addf %140, %143 : vector<64x128xf32>
    %145 = vector.shape_cast %144 : vector<64x128xf32> to vector<2x32x128xf32>
    %c0_51 = arith.constant 0 : index
    %c0_52 = arith.constant 0 : index
    %c0_53 = arith.constant 0 : index
    %146 = vector.load %arg13[%c0_51, %c0_52, %c0_53] : memref<2x32x128xf32, #tpu.memory_space<vmem>>, vector<2x32x128xf32>
    tpu.vector_store %arg13[%c0_51, %c0_52, %c0_53], %145 {strides = array<i32>} : memref<2x32x128xf32, #tpu.memory_space<vmem>>, vector<2x32x128xf32>,
    return
  }
  func.func @transform_0(%arg0: i32, %arg1: i32) -> (i32, i32, i32) {
    %c0_i32 = arith.constant 0 : i32
    %c0_i32_0 = arith.constant 0 : i32
    %c0_i32_1 = arith.constant 0 : i32
    return %arg0, %c0_i32, %c0_i32_0 : i32, i32, i32
  }
  func.func @transform_1(%arg0: i32, %arg1: i32) -> (i32, i32, i32) {
    %c0_i32 = arith.constant 0 : i32
    %c0_i32_0 = arith.constant 0 : i32
    %c0_i32_1 = arith.constant 0 : i32
    return %arg1, %c0_i32, %c0_i32_0 : i32, i32, i32
  }
  func.func @transform_2(%arg0: i32, %arg1: i32) -> (i32, i32, i32) {
    %c0_i32 = arith.constant 0 : i32
    %c0_i32_0 = arith.constant 0 : i32
    %c0_i32_1 = arith.constant 0 : i32
    return %arg1, %c0_i32, %c0_i32_0 : i32, i32, i32
  }
  func.func @transform_3(%arg0: i32, %arg1: i32) -> (i32, i32, i32) {
    %c0_i32 = arith.constant 0 : i32
    %c0_i32_0 = arith.constant 0 : i32
    %c0_i32_1 = arith.constant 0 : i32
    return %arg1, %c0_i32, %c0_i32_0 : i32, i32, i32
  }
  func.func @transform_4(%arg0: i32, %arg1: i32) -> (i32, i32, i32) {
    %c0_i32 = arith.constant 0 : i32
    %c0_i32_0 = arith.constant 0 : i32
    %c0_i32_1 = arith.constant 0 : i32
    return %arg1, %c0_i32, %c0_i32_0 : i32, i32, i32
  }
  func.func @transform_5(%arg0: i32, %arg1: i32) -> (i32, i32, i32) {
    %c0_i32 = arith.constant 0 : i32
    %c0_i32_0 = arith.constant 0 : i32
    %c0_i32_1 = arith.constant 0 : i32
    return %arg1, %c0_i32, %c0_i32_0 : i32, i32, i32
  }
  func.func @transform_6(%arg0: i32, %arg1: i32) -> (i32, i32, i32) {
    %c0_i32 = arith.constant 0 : i32
    %c0_i32_0 = arith.constant 0 : i32
    %c0_i32_1 = arith.constant 0 : i32
    return %arg1, %c0_i32, %c0_i32_0 : i32, i32, i32
  }
  func.func @transform_7(%arg0: i32, %arg1: i32) -> (i32, i32, i32) {
    %c0_i32 = arith.constant 0 : i32
    %c0_i32_0 = arith.constant 0 : i32
    %c0_i32_1 = arith.constant 0 : i32
    return %arg1, %c0_i32, %c0_i32_0 : i32, i32, i32
  }
  func.func @transform_8(%arg0: i32, %arg1: i32) -> (i32, i32, i32) {
    %c0_i32 = arith.constant 0 : i32
    %c0_i32_0 = arith.constant 0 : i32
    %c0_i32_1 = arith.constant 0 : i32
    return %arg1, %c0_i32, %c0_i32_0 : i32, i32, i32
  }
  func.func @transform_9(%arg0: i32, %arg1: i32) -> (i32, i32, i32) {
    %c0_i32 = arith.constant 0 : i32
    %c0_i32_0 = arith.constant 0 : i32
    %c0_i32_1 = arith.constant 0 : i32
    return %arg1, %c0_i32, %c0_i32_0 : i32, i32, i32
  }
  func.func @transform_10(%arg0: i32, %arg1: i32) -> (i32, i32, i32) {
    %c0_i32 = arith.constant 0 : i32
    %c0_i32_0 = arith.constant 0 : i32
    %c0_i32_1 = arith.constant 0 : i32
    return %arg1, %c0_i32, %c0_i32_0 : i32, i32, i32
  }
  func.func @transform_11(%arg0: i32, %arg1: i32) -> (i32, i32, i32) {
    %c0_i32 = arith.constant 0 : i32
    %c0_i32_0 = arith.constant 0 : i32
    %c0_i32_1 = arith.constant 0 : i32
    return %arg0, %c0_i32, %c0_i32_0 : i32, i32, i32
  }
}

</mosaic_0001>

<bundles_post_ra>
// kernel: tpu_custom_call.1
= control target key start
LH: loop header
LB: loop body
LE: loop exit
PB: predicated region body
PF: predicated region fallthrough
CT: control target
= control target key end

     0   :  { %s5884_s0 = inlined_call_operand.hbm [shape: f32[4,32,128], index: 0, kind: input, shape index: {}]   ;;  %s5885_s1 = inlined_call_operand.hbm [shape: bf16[2,128,128], index: 1, kind: input, shape index: {}]   ;;  %s5886_s2 = inlined_call_operand.hbm [shape: f32[2,1,128], index: 2, kind: input, shape index: {}]   ;;  %s5887_s3 = inlined_call_operand.vmem [shape: f32[2,1,128], index: 3, kind: input, shape index: {}]   ;;  %s5888_s4 = inlined_call_operand.hbm [shape: f32[2,1,128], index: 4, kind: input, shape index: {}]   ;;  %s5889_s5 = inlined_call_operand.hbm [shape: bf16[2,128,512], index: 5, kind: input, shape index: {}]   ;;  %s5890_s6 = inlined_call_operand.hbm [shape: f32[2,1,512], index: 6, kind: input, shape index: {}]   ;;  %s5891_s7 = inlined_call_operand.hbm [shape: bf16[2,512,128], index: 7, kind: input, shape index: {}]   ;;  %s5892_s8 = inlined_call_operand.vmem [shape: f32[2,1,128], index: 8, kind: input, shape index: {}]   ;;  %s5893_s9 = inlined_call_operand.vmem [shape: f32[2,1,128], index: 9, kind: input, shape index: {}]   ;;  %s5894_s10 = inlined_call_operand.vmem [shape: f32[2,1,128], index: 10, kind: input, shape index: {}]   ;;  %s5895_s11 = inlined_call_operand.hbm [shape: f32[4,32,128], index: 11, kind: output, shape index: {}]  }
   0x1   :  { %5916 = sst [smem:[#allocation33_spill]] %s5884_s0 }
   0x2   :  { %5917 = sst [smem:[#allocation34_spill]] %s5885_s1 }
   0x3   :  { %5918 = sst [smem:[#allocation35_spill]] %s5886_s2 }
   0x4   :  { %5919 = sst [smem:[#allocation36_spill]] %s5887_s3 }
   0x5   :  { %5920 = sst [smem:[#allocation37_spill]] %s5888_s4 }
   0x6   :  { %5921 = sst [smem:[#allocation38_spill]] %s5889_s5 }
   0x7   :  { %5922 = sst [smem:[#allocation39_spill]] %s5890_s6 }
   0x8   :  { %5923 = sst [smem:[#allocation40_spill]] %s5891_s7 }
   0x9   :  { %5924 = sst [smem:[#allocation41_spill]] %s5892_s8 }
   0xa   :  { %5925 = sst [smem:[#allocation42_spill]] %s5893_s9 }
   0xb   :  { %5926 = sst [smem:[#allocation43_spill]] %s5894_s10 }
   0xc   :  { %5927 = sst [smem:[#allocation44_spill]] %s5895_s11 }
   0xd   :  { %16 = vsyncpa [#allocation3], 0 }
   0xe   :  { %18 = vsyncpa [#allocation3 + $0x1], 0 }
   0xf   :  { %19 = vsyncpa [#allocation6], 0 }
  0x10   :  { %21 = vsyncpa [#allocation6 + $0x1], 0 }
  0x11   :  { %22 = vsyncpa [#allocation9], 0 }
  0x12   :  { %24 = vsyncpa [#allocation9 + $0x1], 0 }
  0x13   :  { %25 = vsyncpa [#allocation12], 0 }
  0x14   :  { %27 = vsyncpa [#allocation12 + $0x1], 0 }
  0x15   :  { %28 = vsyncpa [#allocation4], 0 }
  0x16   :  { %30 = vsyncpa [#allocation4 + $0x1], 0  ;;  %s4618_s17 = smov 0   ;;  %s4620_s18 = smov 0  }
  0x17   :  { %s4622_s19 = smov 0   ;;  %s4624_s20 = smov 0  }
  0x18   :  { %s4626_s21 = smov 0   ;;  %s4628_s22 = smov 0  }
  0x19   :  { %s4630_s23 = smov 0   ;;  %s4632_s24 = smov 0  }
  0x1a   :  { %s4634_s25 = smov 0   ;;  %s4636_s26 = smov 0  }
  0x1b   :  { %s4638_s27 = smov 0  }
  0x1c LB: > { %5928 = sst [smem:[#allocation20_spill]] %s4508_s18  ;;  %p63_p0 = scmp.eq.s32.totalorder %s4544_s27, 0  ;;  %s4544_s27 = sphi %s4638_s27, %s36_s27   ;;  %s4540_s26 = sphi %s4636_s26, %s5988_s26   ;;  %s4536_s25 = sphi %s4634_s25, %s5987_s25   ;;  %s4532_s24 = sphi %s4632_s24, %s5986_s24   ;;  %s4528_s23 = sphi %s4630_s23, %s5985_s23   ;;  %s4524_s22 = sphi %s4628_s22, %s5984_s22   ;;  %s4520_s21 = sphi %s4626_s21, %s5983_s21   ;;  %s4516_s20 = sphi %s4624_s20, %s5982_s20   ;;  %s4512_s19 = sphi %s4622_s19, %s5990_s19   ;;  %s4508_s18 = sphi %s4620_s18, %s5989_s18   ;;  %s4504_s17 = sphi %s4618_s17, %s5980_s17  }
  0x1d   : > { %5929 = sst [smem:[#allocation21_spill]] %s4520_s21  ;;  %p88_p1 = scmp.ne.s32.totalorder %s4512_s19, %s4508_s18 }
  0x1e   : > { %5930 = sst [smem:[#allocation22_spill]] %s4524_s22  ;;  %p94_p2 = scmp.ne.s32.totalorder %s4508_s18, %s4504_s17 }
  0x1f   : > { %5931 = sst [smem:[#allocation23_spill]] %s4528_s23  ;;  %p5901_p3 = scmp.lt.s32.totalorder %s4544_s27, 4 }
  0x20   : > { %5932 = sst [smem:[#allocation24_spill]] %s4532_s24  ;;  %p90_p4 = por %p88_p1, %p63_p0 }
  0x21   : > { %5933 = sst [smem:[#allocation25_spill]] %s4536_s25  ;;  %s4683_s29 = sand.u32 1, %s4544_s27  }
  0x22   : > { %5934 = sst [smem:[#allocation26_spill]] %s4540_s26  ;;  %s4686_s30 = sand.u32 1, %s4512_s19  }
  0x23   : > { %s3392_s12 = sshll.u32 %s4686_s30, 6  ;;  %s3739_s13 = sshll.u32 %s4536_s25, 6 }
  0x24   : > { %s5935_s1 = sld [smem:[#allocation34_spill]]  ;;  %s405_s11 = scalar_lea.vmem [#allocation5], %s3392_s12 }
  0x25   : > { %s413_s24 = sshll.u32 %s405_s11, 4  ;;  %p4695_p5 = pnand %p5901_p3, %p90_p4  ;;  %s414_s24 = int_to_ptr.vmem [resolvable:$true] %s413_s24 }
  0x26   : > { %p3403_p6 = scmp.ge.s32.totalorder %s4544_s27, 1  ;;  %p542_p7 = scmp.lt.s32.totalorder %s4544_s27, 5 }
  0x27   : > { %s5897_s14 = smov 64   ;;  %s5898_s15 = smov 4  }
  0x28   : > { %p4709_p8 = pnand %p3403_p6, %p542_p7  ;;  %s5938_s4 = sld [smem:[#allocation37_spill]] }
  0x29   : > { %s449_s8 = scalar_lea.vmem [#allocation8], %s4686_s30  ;;  %s3399_s12 = sshll.u32 %s4536_s25, 2 }
  0x2a   : > { %s410_s16 = scalar_lea.hbm %s5935_s1, %s3739_s13  ;;  %s5899_s13 = scalar_lea.sflag [#allocation6], %s4683_s29 }
  0x2b   : > { %s411_s28 = sshll.u32 %s410_s16, 4  ;;  %s456_s3 = sshll.u32 %s449_s8, 4  ;;  %s412_s28 = int_to_ptr.hbm [resolvable:$true] %s411_s28  ;;  %s457_s3 = int_to_ptr.vmem [resolvable:$true] %s456_s3 }
  0x2c   : > { %3842 = dma.hbm_to_vmem [thread:$0]  (!%p4695_p5), %s412_s28, 1024, %s414_s24, %s5899_s13, %s5897_s14, %s5897_s14, %s5898_s15  }
  0x2d   : > { %s5902_s24 = scalar_lea.sflag [#allocation9], %s4683_s29  ;;  %s3398_s28 = sshll.u32 %s4686_s30, 2 }
  0x2e   : > { %s452_s1 = scalar_lea.hbm %s5938_s4, %s4536_s25  ;;  %s5939_s6 = sld [smem:[#allocation39_spill]] }
  0x2f   : > { %s454_s9 = sshll.u32 %s452_s1, 4  ;;  %s489_s8 = scalar_lea.vmem [#allocation11], %s3398_s28  ;;  %s455_s9 = int_to_ptr.hbm [resolvable:$true] %s454_s9 }
  0x30   : > { %3848 = dma.hbm_to_vmem [thread:$0]  (!%p4695_p5), %s455_s9, 16, %s457_s3, %s5902_s24  }
  0x31   : > { %s497_s15 = sshll.u32 %s489_s8, 4  ;;  %s5900_s3 = scalar_lea.sflag [#allocation12], %s4683_s29  ;;  %s498_s15 = int_to_ptr.vmem [resolvable:$true] %s497_s15 }
  0x32   : > { %s4734_s9 = sadd.s32 4294967295, %s4544_s27   ;;  %s3385_s28 = sadd.s32 4294967294, %s4544_s27  }
  0x33   : > { %s55_s1 = sadd.s32 1, %s4524_s22  ;;  %p62_p10 = scmp.ne.s32.totalorder %s4524_s22, %s4520_s21 }
  0x34   : > { %s493_s14 = scalar_lea.hbm %s5939_s6, %s3399_s12  ;;  %s45_s12 = sadd.s32 1, %s4536_s25 }
  0x35   : > { %s495_s13 = sshll.u32 %s493_s14, 4  ;;  %p46_p9 = scmp.ge.s32.totalorder %s45_s12, 2  ;;  %s496_s13 = int_to_ptr.hbm [resolvable:$true] %s495_s13 }
  0x36   : > { %3854 = dma.hbm_to_vmem [thread:$0]  (!%p4695_p5), %s496_s13, 64, %s498_s15, %s5900_s3  }
  0x37   : > { %s48_s14 = sadd.s32 1, %s4540_s26  ;;  %s5992_s12 = smov (%p46_p9, %s45_s12), 0 }
  0x38   : > { %5940 = sst [smem:[#allocation27_spill]] %s5992_s12  ;;  %s5994_s14 = smov (!%p46_p9, %s48_s14), %s4540_s26 }
  0x39   : > { %p4750_p11 = por %p63_p0, %p62_p10  ;;  %p68_p12 = scmp.ne.s32.totalorder %s4520_s21, %s4516_s20 }
  0x3a   : > { %p50_p13 = scmp.ge.s32.totalorder %s5994_s14, 2  ;;  %p69_p1 = scmp.eq.s32.totalorder %s4734_s9, 0 }
  0x3b   : > { %s78_s15 = ssub.s32 %s4536_s25, %s5992_s12  ;;  %p352_p4 = scmp.eq.s32.totalorder %s4734_s9, 3 }
  0x3c   : > { %s5996_s14 = smov (%p50_p13, %s5994_s14), 0  ;;  %p4765_p6 = por %p69_p1, %p68_p12 }
  0x3d   : > { %5942 = sst [smem:[#allocation28_spill]] %s5996_s14  ;;  %p79_p0 = scmp.eq.s32.totalorder %s78_s15, 0 }
  0x3e   : > { %s52_s8 = ssub.s32 %s4540_s26, %s5996_s14  ;;  %p4774_p7 = por %p94_p2, %p69_p1 }
  0x3f   : > { %p53_p9 = scmp.eq.s32.totalorder %s52_s8, 0  ;;  %p4781_p3 = por %p352_p4, %p62_p10 }
  0x40   : > { %s5944_s3 = scalar_select %p4774_p7, 1, 0 }
  0x41   : > { %s5946_s24 = scalar_select %p4781_p3, 1, 0 }
  0x42   : > { %5945 = sst [smem:[#allocation29_spill]] %s5944_s3  ;;  %s5948_s4 = sadd.s32 1, %s4512_s19 }
  0x43   : > { %5947 = sst [smem:[#allocation30_spill]] %s5946_s24  ;;  %p358_p13 = scmp.eq.s32.totalorder %s3385_s28, 3 }
  0x44   : > { %s4788_s6 = scalar_select %p79_p0, %s4512_s19, %s5948_s4  }
  0x45   : > { %s4791_s12 = scalar_select %p53_p9, %s4524_s22, %s55_s1  }
  0x46   : > { %5949 = sst [smem:[#allocation31_spill]] %s4788_s6  ;;  %s378_s17 = sand.u32 1, %s4524_s22  }
  0x47   : > { %5950 = sst [smem:[#allocation32_spill]] %s4791_s12  ;;  %s3388_s15 = sshll.u32 %s378_s17, 6 }
  0x48   : > { %p4797_p2 = por %p358_p13, %p68_p12  ;;  %s3738_s8 = sshll.u32 %s4540_s26, 6 }
  0x49   : > { %s382_s23 = scalar_lea.vmem [#allocation2], %s3388_s15  ;;  %s5952_s0 = sld [smem:[#allocation33_spill]] }
  0x4a   : > { %s391_s3 = sshll.u32 %s382_s23, 4  ;;  %p5953_p10 = scmp.lt.s32.totalorder %s4544_s27, 4  ;;  %s392_s3 = int_to_ptr.vmem [resolvable:$true] %s391_s3 }
  0x4b   : > { %s379_s1 = scalar_lea.sflag [#allocation3], %s378_s17  ;;  %s4548_s12 = smov 128  }
  0x4c   : > { %p3837_p1 = pnand %p5953_p10, %p4750_p11  ;;  %s4549_s22 = smov 8  }
  0x4d   : > { %s5954_s2 = sld [smem:[#allocation35_spill]]  ;;  %s426_s24 = scalar_lea.vmem [#allocation7], %s4686_s30 }
  0x4e   : > { %s5955_s13 = scalar_lea.sflag [#allocation6], %s4683_s29  ;;  %s5956_s5 = sld [smem:[#allocation38_spill]] }
  0x4f   : > { %s388_s4 = scalar_lea.hbm %s5952_s0, %s3738_s8  ;;  %s433_s8 = sshll.u32 %s426_s24, 4  ;;  %s434_s8 = int_to_ptr.vmem [resolvable:$true] %s433_s8 }
  0x50   : > { %s389_s28 = sshll.u32 %s388_s4, 4  ;;  %s3395_s4 = sshll.u32 %s4686_s30, 8  ;;  %s390_s28 = int_to_ptr.hbm [resolvable:$true] %s389_s28 }
  0x51   : > { %3839 = dma.hbm_to_vmem [thread:$0]  (!%p3837_p1), %s390_s28, 1024, %s392_s3, %s379_s1, %s4548_s12, %s4548_s12, %s4549_s22  }
  0x52   : > { %s3740_s0 = sshll.u32 %s4536_s25, 8  ;;  %s467_s12 = scalar_lea.vmem [#allocation10], %s3395_s4 }
  0x53   : > { %s429_s26 = scalar_lea.hbm %s5954_s2, %s4536_s25  ;;  %s4550_s28 = smov 256  }
  0x54   : > { %s431_s18 = sshll.u32 %s429_s26, 4  ;;  %s472_s22 = scalar_lea.hbm %s5956_s5, %s3740_s0  ;;  %s432_s18 = int_to_ptr.hbm [resolvable:$true] %s431_s18 }
  0x55   : > { %3845 = dma.hbm_to_vmem [thread:$0]  (!%p4695_p5), %s432_s18, 16, %s434_s8, %s5955_s13  }
  0x56   : > { %s473_s3 = sshll.u32 %s472_s22, 4  ;;  %s475_s26 = sshll.u32 %s467_s12, 4  ;;  %s474_s3 = int_to_ptr.hbm [resolvable:$true] %s473_s3  ;;  %s476_s26 = int_to_ptr.vmem [resolvable:$true] %s475_s26 }
  0x57   : > { %s4551_s1 = smov 16   ;;  %s5957_s15 = scalar_lea.sflag [#allocation9], %s4683_s29 }
  0x58   : > { %3851 = dma.hbm_to_vmem [thread:$0]  (!%p4695_p5), %s474_s3, 4096, %s476_s26, %s5957_s15, %s4550_s28, %s4550_s28, %s4551_s1  }
  0x59   : > { %s5958_s7 = sld [smem:[#allocation40_spill]]  ;;  %s508_s8 = scalar_lea.vmem [#allocation13], %s3395_s4 }
  0x5a   : > { %s516_s6 = sshll.u32 %s508_s8, 4  ;;  %s5959_s13 = smov 4   ;;  %s517_s6 = int_to_ptr.vmem [resolvable:$true] %s516_s6 }
  0x5b   : > { %s5960_s17 = smov 64   ;;  %s5961_s22 = scalar_lea.sflag [#allocation12], %s4683_s29 }
  0x5c   : > { %s4840_s3 = sand.u32 (!%p4709_p8), 1, %s4520_s21  }
  0x5d   : > { %546 = sbr.rel (%p4709_p8) target bundleno = 2061 (0x80d), region = 64  ;;  %s549_s4 = scalar_lea.sflag (!%p4709_p8), [#allocation3], %s4840_s3 }
  0x5f   : > { %s513_s30 = scalar_lea.hbm %s5958_s7, %s3740_s0  ;;  %s5913_s0 = sshll.u32 (!%p4709_p8), %s4840_s3, 6 }
  0x60   : > { %s514_s24 = sshll.u32 %s513_s30, 4  ;;  %s4846_s12 = scalar_lea.vmem (!%p4709_p8), [#allocation2], %s5913_s0  ;;  %s515_s24 = int_to_ptr.hbm [resolvable:$true] %s514_s24 }
  0x61   : > { %3857 = dma.hbm_to_vmem [thread:$0]  (!%p4695_p5), %s515_s24, 4096, %s517_s6, %s5961_s22, %s5960_s17, %s5960_s17, %s5959_s13  }
  0x62   : > { %4483 = dma.done.wait (%p4765_p6), %s549_s4, 1024  }
  0x63   : > { %4485 = vsyncadd (%p4765_p6), %s549_s4, 4294966272  ;;  %s5962_s10 = sld [smem:[#allocation20_spill]]  ;;  %s558_s11 = sand.u32 1, %s4734_s9  }
  0x64   : > { %s559_s1 = scalar_lea.sflag [#allocation6], %s558_s11 }
  0x69   : > { %s4854_s26 = sand.u32 1, %s5962_s10  }
  0x6a   : > { %s3405_s28 = sshll.u32 %s4854_s26, 6 }
  0x6b   : > { %s4857_s15 = scalar_lea.vmem [#allocation5], %s3405_s28 }
  0x6c   : > { %4487 = dma.done.wait (%p4774_p7), %s559_s1, 1040  }
  0x6d   : > { %4489 = vsyncadd (%p4774_p7), %s559_s1, 4294966256  ;;  %s578_s23 = scalar_lea.sflag [#allocation9], %s558_s11 }
  0x6e   : > { %4491 = dma.done.wait (%p4774_p7), %s578_s23, 4112  }
  0x6f   : > { %4493 = vsyncadd (%p4774_p7), %s578_s23, 4294963184  ;;  %s3406_s9 = sshll.u32 %s4854_s26, 8  ;;  %s3407_s30 = sshll.u32 %s4854_s26, 2 }
  0x70   : > { %s4871_s24 = scalar_lea.vmem [#allocation10], %s3406_s9  ;;  %s597_s8 = scalar_lea.sflag [#allocation12], %s558_s11 }
  0x71   : > { %s4873_s6 = scalar_lea.vmem [#allocation11], %s3407_s30 }
  0x72   : > { %4495 = dma.done.wait (%p4774_p7), %s597_s8, 4160  }
  0x73   : > { %4497 = vsyncadd (%p4774_p7), %s597_s8, 4294963136  ;;  %s5964_s13 = sld [smem:[#allocation23_spill]]  ;;  %s4899_s25 = scalar_lea.vmem [#allocation13], %s3406_s9 }
  0x74   : > { %s5965_s10 = sld [smem:[#allocation36_spill]]  ;;  %s5969_s21 = sshll.u32 %s4840_s3, 6 }
  0x75   : > { %s5966_s23 = sld [smem:[#allocation41_spill]]  ;;  %s4903_s22 = scalar_lea.vmem [#allocation14], %s5969_s21 }
  0x76   : > { %s5967_s18 = sld [smem:[#allocation42_spill]] }
  0x77   : > { %s5968_s5 = sld [smem:[#allocation43_spill]] }
  0x79   : > { %p691_p5 = scmp.lt.s32.totalorder %s5964_s13, 1  ;;  %p3410_p8 = scmp.ne.s32.totalorder %s5964_s13, 0 }
  0x7b   : > { %s4881_s17 = scalar_select %p691_p5, %s5964_s13, 1 }
  0x7c   : > { %708 = sbr.rel (%p3410_p8) target bundleno = 138 (0x8a), region = 96 }
  0x7d   : > { %s693_s11 = scalar_lea.vmem %s5965_s10, %s4881_s17  ;;  %s696_s30 = scalar_lea.vmem %s5966_s23, %s4881_s17 }
  0x7e   : > { %s699_s16 = scalar_lea.vmem %s5967_s18, %s4881_s17  ;;  %s702_s7 = scalar_lea.vmem %s5968_s5, %s4881_s17 }
  0x81   : > { %v709_v0 = vld [vmem:[%s4846_s12] sm:$0xff]  ;;  %v710_v1 = vld [vmem:[%s4846_s12 + $0x8] sm:$0xff]  ;;  %v711_v2 = vld [vmem:[%s4846_s12 + $0x10] sm:$0xff] }
  0x82   : > { %717 = vst [vmem:[%s4903_s22] sm:$0xff] %v709_v0  ;;  %v712_v3 = vld [vmem:[%s4846_s12 + $0x18] sm:$0xff]  ;;  %v713_v4 = vld [vmem:[%s4846_s12 + $0x20] sm:$0xff]  ;;  %v714_v5 = vld [vmem:[%s4846_s12 + $0x28] sm:$0xff] }
  0x83   : > { %718 = vst [vmem:[%s4903_s22 + $0x8] sm:$0xff] %v710_v1  ;;  %v715_v6 = vld [vmem:[%s4846_s12 + $0x30] sm:$0xff]  ;;  %v716_v7 = vld [vmem:[%s4846_s12 + $0x38] sm:$0xff] }
  0x84   : > { %719 = vst [vmem:[%s4903_s22 + $0x10] sm:$0xff] %v711_v2 }
  0x85   : > { %720 = vst [vmem:[%s4903_s22 + $0x18] sm:$0xff] %v712_v3 }
  0x86   : > { %721 = vst [vmem:[%s4903_s22 + $0x20] sm:$0xff] %v713_v4 }
  0x87   : > { %722 = vst [vmem:[%s4903_s22 + $0x28] sm:$0xff] %v714_v5 }
  0x88   : > { %723 = vst [vmem:[%s4903_s22 + $0x30] sm:$0xff] %v715_v6 }
  0x89   : > { %724 = vst [vmem:[%s4903_s22 + $0x38] sm:$0xff] %v716_v7 }
  0x8a PF: > { %v725_v9 = vld [vmem:[%s4903_s22] sm:$0xff]  ;;  %v726_v16 = vld [vmem:[%s4903_s22 + $0x8] sm:$0xff]  ;;  %s4552_s2 = smov 64   ;;  %vm803_vm0 = vcmask 261120   ;;  %s4553_s5 = smov 32   ;;  %vm1810_vm1 = vcmask 523264  }
  0x8b   : > { %v727_v8 = vld [vmem:[%s4903_s22 + $0x10] sm:$0xff]  ;;  %v733_v12 = vpack.c.bf16 %v725_v9, %v725_v9  ;;  %v734_v19 = vpack.c.bf16 %v726_v16, %v726_v16  ;;  %s4554_s21 = smov 96   ;;  %vm1815_vm2 = vcmask 785408   ;;  %s5970_s0 = scalar_lea.vmem [#allocation7], %s4854_s26 }
  0x8c   : > { %v728_v10 = vld [vmem:[%s4903_s22 + $0x18] sm:$0xff]  ;;  %v735_v11 = vpack.c.bf16 %v727_v8, %v727_v8  ;;  %s5972_s9 = scalar_lea.vmem [#allocation8], %s4854_s26  ;;  %s5977_s23 = sld [smem:[#allocation44_spill]] }
  0x8d   : > { %v736_v13 = vpack.c.bf16 %v728_v10, %v728_v10  ;;  %v729_v20 = vld [vmem:[%s4903_s22 + $0x20] sm:$0xff]  ;;  %753 = vrot.lane.b32.xlu1 %v733_v12, %s4552_s2  ;;  %v797_v29 = vunpack.c.l.b16 %v733_v12  ;;  %v798_v30 = vunpack.c.l.b16 %v734_v19 }
  0x8e   : > { %v730_v21 = vld [vmem:[%s4903_s22 + $0x28] sm:$0xff]  ;;  %757 = vrot.lane.b32.xlu0 %v735_v11, %s4552_s2  ;;  %v799_v22 = vunpack.c.l.b16 %v735_v11  ;;  %v737_v24 = vpack.c.bf16 %v729_v20, %v729_v20  ;;  %765 = vrot.lane.b32.xlu2 %v735_v11, %s4553_s5 }
  0x8f   : > { %v731_v14 = vld [vmem:[%s4903_s22 + $0x30] sm:$0xff]  ;;  %v800_v23 = vunpack.c.l.b16 %v736_v13  ;;  %v738_v27 = vpack.c.bf16 %v730_v21, %v730_v21  ;;  %v801_v36 = vpack.c.b16 %v798_v30, %v797_v29 }
  0x90   : > { %v732_v15 = vld [vmem:[%s4903_s22 + $0x38] sm:$0xff]  ;;  %v739_v17 = vpack.c.bf16 %v731_v14, %v731_v14  ;;  %v922_v32 = vunpack.c.l.b16 %v737_v24 }
  0x91   : > { %v740_v18 = vpack.c.bf16 %v732_v15, %v732_v15  ;;  %v802_v28 = vpack.c.b16 %v800_v23, %v799_v22  ;;  %v923_v33 = vunpack.c.l.b16 %v738_v27  ;;  %v805_v38 = vsel %vm803_vm0, %v801_v36, 0 }
  0x92   : > { %v924_v25 = vunpack.c.l.b16 %v739_v17 }
  0x93   : > { %v925_v26 = vunpack.c.l.b16 %v740_v18  ;;  %v808_v34 = vsel %vm803_vm0, %v802_v28, 0  ;;  %v926_v37 = vpack.c.b16 %v923_v33, %v922_v32 }
  0x94   : > { %816 = vmatpush.bf16.xpose.msra.mxu1 %v808_v34  ;;  %3816 = vmatpush.bf16.xpose.msra.mxu3 %v808_v34 }
  0x95   : > { %v4933_v31 = vpack.c.b16 %v925_v26, %v924_v25  ;;  %755 = vrot.lane.b32.xlu1 %v734_v19, %s4552_s2  ;;  %v4946_v39 = vsel %vm803_vm0, %v926_v37, 0 }
  0x96   : > { %759 = vrot.lane.b32.xlu0 %v736_v13, %s4552_s2  ;;  %767 = vrot.lane.b32.xlu2 %v736_v13, %s4553_s5 }
  0x97   : > { %v4938_v35 = vsel %vm803_vm0, %v4933_v31, 0 }
  0x98   : > { %940 = vmatpush.bf16.xpose.msra.mxu0 %v4938_v35 }
  0x9c   : > { %817 = vmatpush.bf16.xpose.msra.mxu1 %v805_v38  ;;  %3817 = vmatpush.bf16.xpose.msra.mxu3 %v805_v38 }
  0x9d   : > { %763 = vrot.lane.b32.xlu1 %v734_v19, %s4553_s5 }
  0x9e   : > { %761 = vrot.lane.b32.xlu0 %v733_v12, %s4553_s5  ;;  %749 = vrot.lane.b32.xlu2 %v735_v11, %s4554_s21 }
  0xa0   : > { %941 = vmatpush.bf16.xpose.msra.mxu0 %v4946_v39 }
  0xa3   : > { %3411 = vmatmul.msk.bf16.vlgmr.msra.gmra.mxu1 %vm803_vm0, %v801_v36  ;;  %3412 = vmatmul.msk.bf16.vlgmr.msra.gmra.mxu3 %vm803_vm0, %v802_v28 }
  0xa5   : > { %745 = vrot.lane.b32.xlu1 %v733_v12, %s4554_s21 }
  0xa6   : > { %751 = vrot.lane.b32.xlu0 %v736_v13, %s4554_s21  ;;  %747 = vrot.lane.b32.xlu2 %v734_v19, %s4554_s21 }
  0xa7   : > { %3419 = vmatmul.msk.bf16.vlgmr.msra.gmra.mxu0 %vm803_vm0, %v926_v37 }
  0xa8   : > { %1486 = vmatpush.bf16.msrb.mxu0 %v802_v28 }
  0xac   : > { %1487 = vmatpush.bf16.msrb.mxu0 %v801_v36 }
  0xad   : > { %787 = vrot.lane.b32.xlu1 %v740_v18, %s4552_s2 }
  0xae   : > { %785 = vrot.lane.b32.xlu0 %v739_v17, %s4552_s2  ;;  %793 = vrot.lane.b32.xlu2 %v739_v17, %s4553_s5 }
  0xb0   : > { %1634 = vmatpush.bf16.msra.mxu0 %v4933_v31 }
  0xb4   : > { %1635 = vmatpush.bf16.msra.mxu0 %v926_v37 }
  0xb5   : > { %781 = vrot.lane.b32.xlu1 %v737_v24, %s4552_s2 }
  0xb6   : > { %795 = vrot.lane.b32.xlu0 %v740_v18, %s4553_s5  ;;  %783 = vrot.lane.b32.xlu2 %v738_v27, %s4552_s2 }
  0xbd   : > { %791 = vrot.lane.b32.xlu1 %v738_v27, %s4553_s5 }
  0xbe   : > { %789 = vrot.lane.b32.xlu0 %v737_v24, %s4553_s5  ;;  %777 = vrot.lane.b32.xlu2 %v739_v17, %s4554_s21 }
  0xc5   : > { %773 = vrot.lane.b32.xlu1 %v737_v24, %s4554_s21 }
  0xc6   : > { %779 = vrot.lane.b32.xlu0 %v740_v18, %s4554_s21  ;;  %775 = vrot.lane.b32.xlu2 %v738_v27, %s4554_s21 }
  0xe8   : > { %v766_v40 = vpop.permute.xlu2 %765 }
  0xe9   : > { %v893_v41 = vunpack.c.l.b16 %v766_v40 }
  0xf0   : > { %v768_v42 = vpop.permute.xlu2 %767 }
  0xf1   : > { %v894_v43 = vunpack.c.l.b16 %v768_v42 }
  0xf3   : > { %v4971_v44 = vpack.c.b16 %v894_v43, %v893_v41 }
  0xf5   : > { %v901_v45 = vsel %vm803_vm0, %v4971_v44, 0 }
  0xf6   : > { %909 = vmatpush.bf16.xpose.msrb.mxu3 %v901_v45 }
  0xf8   : > { %v750_v48 = vpop.permute.xlu2 %749 }
  0xf9   : > { %v831_v2 = vunpack.c.l.b16 %v750_v48 }
  0xff   : > { %v754_v47 = vpop.permute.xlu1 %753 }
 0x100   : > { %v758_v46 = vpop.permute.xlu0 %757  ;;  %v860_v54 = vunpack.c.l.b16 %v754_v47  ;;  %v748_v62 = vpop.permute.xlu2 %747 }
 0x101   : > { %v862_v51 = vunpack.c.l.b16 %v758_v46  ;;  %v830_v8 = vunpack.c.l.b16 %v748_v62 }
 0x107   : > { %v756_v50 = vpop.permute.xlu1 %755 }
 0x108   : > { %v760_v49 = vpop.permute.xlu0 %759  ;;  %v861_v55 = vunpack.c.l.b16 %v756_v50  ;;  %v794_v9 = vpop.permute.xlu2 %793 }
 0x109   : > { %v863_v52 = vunpack.c.l.b16 %v760_v49  ;;  %v1017_v29 = vunpack.c.l.b16 %v794_v9 }
 0x10a   : > { %v4979_v59 = vpack.c.b16 %v861_v55, %v860_v54 }
 0x10b   : > { %v4975_v53 = vpack.c.b16 %v863_v52, %v862_v51 }
 0x10c   : > { %v867_v0 = vsel %vm803_vm0, %v4979_v59, 0 }
 0x10d   : > { %v870_v56 = vsel %vm803_vm0, %v4975_v53, 0 }
 0x10e   : > { %878 = vmatpush.bf16.xpose.msra.mxu2 %v870_v56 }
 0x10f   : > { %v764_v58 = vpop.permute.xlu1 %763 }
 0x110   : > { %v762_v57 = vpop.permute.xlu0 %761  ;;  %v892_v61 = vunpack.c.l.b16 %v764_v58  ;;  %v784_v25 = vpop.permute.xlu2 %783 }
 0x111   : > { %v891_v60 = vunpack.c.l.b16 %v762_v57 }
 0x113   : > { %v4981_v63 = vpack.c.b16 %v892_v61, %v891_v60 }
 0x115   : > { %v898_v1 = vsel %vm803_vm0, %v4981_v63, 0 }
 0x116   : > { %879 = vmatpush.bf16.xpose.msra.mxu2 %v867_v0  ;;  %910 = vmatpush.bf16.xpose.msrb.mxu3 %v898_v1 }
 0x117   : > { %v746_v4 = vpop.permute.xlu1 %745 }
 0x118   : > { %v752_v3 = vpop.permute.xlu0 %751  ;;  %v829_v7 = vunpack.c.l.b16 %v746_v4  ;;  %v778_v49 = vpop.permute.xlu2 %777 }
 0x119   : > { %v832_v5 = vunpack.c.l.b16 %v752_v3  ;;  %v955_v58 = vunpack.c.l.b16 %v778_v49 }
 0x11a   : > { %v4996_v12 = vpack.c.b16 %v830_v8, %v829_v7 }
 0x11b   : > { %v4988_v6 = vpack.c.b16 %v832_v5, %v831_v2 }
 0x11c   : > { %v836_v22 = vsel %vm803_vm0, %v4996_v12, 0 }
 0x11d   : > { %3415 = vmatmul.msk.bf16.vlgmr.msra.gmra.mxu2 %vm803_vm0, %v4979_v59  ;;  %3417 = vmatmul.msk.bf16.vlgmr.msrb.gmra.mxu3 %vm803_vm0, %v4981_v63  ;;  %v839_v10 = vsel %vm803_vm0, %v4988_v6, 0 }
 0x11e   : > { %3818 = vmatpush.bf16.xpose.msrb.mxu2 %v4938_v35  ;;  %847 = vmatpush.bf16.xpose.msrb.mxu1 %v839_v10  ;;  %v985_v35 = vunpack.c.l.b16 %v784_v25 }
 0x11f   : > { %v788_v18 = vpop.permute.xlu1 %787 }
 0x120   : > { %v819_v11 = vpop.f32.mrf.mxu1  ;;  %v786_v15 = vpop.permute.xlu0 %785  ;;  %v987_v19 = vunpack.c.l.b16 %v788_v18 }
 0x121   : > { %v4999_v13 = vmul.f32 0.088388346, %v819_v11  ;;  %v986_v17 = vunpack.c.l.b16 %v786_v15  ;;  %v776_v62 = vpop.permute.xlu2 %775 }
 0x122   : > { %v954_v2 = vunpack.c.l.b16 %v776_v62 }
 0x123   : > { %v1078_v20 = vsel %vm803_vm0, %v4999_v13, -inf  ;;  %v5009_v23 = vpack.c.b16 %v987_v19, %v986_v17 }
 0x124   : > { %v943_v14 = vpop.f32.mrf.mxu0  ;;  %1079 = vmax.xlane.f32.xlu2 %v1078_v20 }
 0x125   : > { %v5001_v16 = vmul.f32 0.088388346, %v943_v14  ;;  %v994_v27 = vsel %vm803_vm0, %v5009_v23, 0 }
 0x126   : > { %3819 = vmatpush.bf16.xpose.msrb.mxu2 %v4946_v39  ;;  %v824_v24 = vpop.f32.mrf.mxu3  ;;  %848 = vmatpush.bf16.xpose.msrb.mxu1 %v836_v22 }
 0x127   : > { %v1126_v21 = vsel %vm803_vm0, %v5001_v16, -inf  ;;  %v5011_v26 = vmul.f32 0.088388346, %v824_v24  ;;  %v782_v37 = vpop.permute.xlu1 %781 }
 0x128   : > { %1127 = vmax.xlane.f32.xlu0 %v1126_v21  ;;  %v821_v28 = vpop.f32.mrf.mxu1  ;;  %v796_v32 = vpop.permute.xlu0 %795  ;;  %v984_v38 = vunpack.c.l.b16 %v782_v37 }
 0x129   : > { %v5015_v30 = vmul.f32 0.088388346, %v821_v28  ;;  %v1084_v33 = vsel %vm803_vm0, %v5011_v26, -inf  ;;  %v1018_v36 = vunpack.c.l.b16 %v796_v32 }
 0x12a   : > { %1085 = vmax.xlane.f32.xlu1 %v1084_v33  ;;  %v988_v42 = vpack.c.b16 %v985_v35, %v984_v38 }
 0x12b   : > { %v1081_v39 = vsel %vm803_vm0, %v5015_v30, -inf  ;;  %v1020_v41 = vpack.c.b16 %v1018_v36, %v1017_v29 }
 0x12c   : > { %v945_v34 = vpop.f32.mrf.mxu0  ;;  %v991_v48 = vsel %vm803_vm0, %v988_v42, 0 }
 0x12d   : > { %v5021_v40 = vmul.f32 0.088388346, %v945_v34  ;;  %3413 = vmatmul.msk.bf16.vlgmr.msrb.gmra.mxu1 %vm803_vm0, %v4996_v12  ;;  %3416 = vmatmul.msk.bf16.gmra.mxu2 %vm803_vm0, %v4975_v53  ;;  %v1025_v45 = vsel %vm803_vm0, %v1020_v41, 0 }
 0x12e   : > { %1002 = vmatpush.bf16.xpose.msra.mxu2 %v994_v27  ;;  %v826_v43 = vpop.f32.mrf.mxu3  ;;  %3418 = vmatmul.msk.bf16.gmra.mxu3 %vm803_vm0, %v4971_v44 }
 0x12f   : > { %v5028_v46 = vmul.f32 0.088388346, %v826_v43  ;;  %v1129_v47 = vsel %vm803_vm0, %v5021_v40, -inf  ;;  %1033 = vmatpush.bf16.xpose.msra.mxu3 %v1025_v45  ;;  %v792_v54 = vpop.permute.xlu1 %791 }
 0x130   : > { %1082 = vmax.xlane.f32.xlu0 %v1081_v39  ;;  %v790_v50 = vpop.permute.xlu0 %789  ;;  %v1016_v55 = vunpack.c.l.b16 %v792_v54 }
 0x131   : > { %v1087_v51 = vsel %vm803_vm0, %v5028_v46, -inf  ;;  %v1015_v52 = vunpack.c.l.b16 %v790_v50 }
 0x132   : > { %1088 = vmax.xlane.f32.xlu2 %v1087_v51  ;;  %1130 = vmax.xlane.f32.xlu1 %v1129_v47 }
 0x133   : > { %v1019_v56 = vpack.c.b16 %v1016_v55, %v1015_v52 }
 0x135   : > { %v1022_v57 = vsel %vm803_vm0, %v1019_v56, 0 }
 0x136   : > { %1003 = vmatpush.bf16.xpose.msra.mxu2 %v991_v48 }
 0x137   : > { %1034 = vmatpush.bf16.xpose.msra.mxu3 %v1022_v57  ;;  %v774_v0 = vpop.permute.xlu1 %773 }
 0x138   : > { %v780_v60 = vpop.permute.xlu0 %779  ;;  %v953_v3 = vunpack.c.l.b16 %v774_v0 }
 0x139   : > { %v956_v61 = vunpack.c.l.b16 %v780_v60 }
 0x13b   : > { %v958_v1 = vpack.c.b16 %v956_v61, %v955_v58 }
 0x13d   : > { %3414 = vmatmul.msk.bf16.gmra.mxu1 %vm803_vm0, %v4988_v6  ;;  %3420 = vmatmul.msk.bf16.vlgmr.msrb.gmra.mxu2 %vm803_vm0, %v4933_v31  ;;  %v963_v4 = vsel %vm803_vm0, %v958_v1, 0 }
 0x13e   : > { %3425 = vmatmul.msk.bf16.vlgmr.msra.gmra.mxu3 %vm803_vm0, %v1019_v56  ;;  %1560 = vmatpush.bf16.msrb.mxu2 %v4975_v53 }
 0x13f   : > { %1597 = vmatpush.bf16.msrb.mxu3 %v4971_v44  ;;  %971 = vmatpush.bf16.xpose.msra.mxu1 %v963_v4  ;;  %v957_v44 = vpack.c.b16 %v954_v2, %v953_v3 }
 0x142   : > { %1561 = vmatpush.bf16.msrb.mxu2 %v4979_v59 }
 0x143   : > { %1598 = vmatpush.bf16.msrb.mxu3 %v4981_v63  ;;  %v960_v63 = vsel %vm803_vm0, %v957_v44, 0 }
 0x147   : > { %1745 = vmatpush.bf16.msra.mxu3 %v1020_v41  ;;  %972 = vmatpush.bf16.xpose.msra.mxu1 %v960_v63 }
 0x14b   : > { %1746 = vmatpush.bf16.msra.mxu3 %v1019_v56 }
 0x14d   : > { %3423 = vmatmul.msk.bf16.vlgmr.msra.gmra.mxu2 %vm803_vm0, %v988_v42 }
 0x14e   : > { %3421 = vmatmul.msk.bf16.vlgmr.msra.gmra.mxu1 %vm803_vm0, %v957_v44  ;;  %3426 = vmatmul.msk.bf16.gmra.mxu3 %vm803_vm0, %v1020_v41 }
 0x14f   : > { %1523 = vmatpush.bf16.msrb.mxu1 %v4988_v6  ;;  %1708 = vmatpush.bf16.msra.mxu2 %v5009_v23 }
 0x153   : > { %1524 = vmatpush.bf16.msrb.mxu1 %v4996_v12  ;;  %1709 = vmatpush.bf16.msra.mxu2 %v988_v42 }
 0x157   : > { %1671 = vmatpush.bf16.msra.mxu1 %v958_v1 }
 0x15b   : > { %1672 = vmatpush.bf16.msra.mxu1 %v957_v44 }
 0x15d   : > { %3424 = vmatmul.msk.bf16.gmra.mxu2 %vm803_vm0, %v5009_v23 }
 0x15e   : > { %3422 = vmatmul.msk.bf16.gmra.mxu1 %vm803_vm0, %v958_v1 }
 0x1a0   : > { %v881_v31 = vpop.f32.mrf.mxu2  ;;  %v912_v53 = vpop.f32.mrf.mxu3 }
 0x1a1   : > { %v5058_v59 = vmul.f32 0.088388346, %v912_v53  ;;  %v5070_v15 = vmul.f32 0.088388346, %v881_v31 }
 0x1a3   : > { %v1114_v5 = vsel %vm803_vm0, %v5058_v59, -inf  ;;  %v1102_v22 = vsel %vm803_vm0, %v5070_v15, -inf }
 0x1a4   : > { %1115 = vmax.xlane.f32.xlu2 %v1114_v5 }
 0x1a8   : > { %v883_v6 = vpop.f32.mrf.mxu2  ;;  %v914_v7 = vpop.f32.mrf.mxu3 }
 0x1a9   : > { %v5062_v8 = vmul.f32 0.088388346, %v914_v7  ;;  %v5082_v25 = vmul.f32 0.088388346, %v883_v6 }
 0x1aa   : > { %v850_v9 = vpop.f32.mrf.mxu1 }
 0x1ab   : > { %v5064_v10 = vmul.f32 0.088388346, %v850_v9  ;;  %v1117_v11 = vsel %vm803_vm0, %v5062_v8, -inf  ;;  %v1105_v34 = vsel %vm803_vm0, %v5082_v25, -inf }
 0x1ac   : > { %1118 = vmax.xlane.f32.xlu2 %v1117_v11 }
 0x1ad   : > { %v1090_v12 = vsel %vm803_vm0, %v5064_v10, -inf }
 0x1ae   : > { %1091 = vmax.xlane.f32.xlu0 %v1090_v12 }
 0x1b0   : > { %v886_v14 = vpop.f32.mrf.mxu2 }
 0x1b1   : > { %v5072_v17 = vmul.f32 0.088388346, %v886_v14  ;;  %v917_v18 = vpop.f32.mrf.mxu3 }
 0x1b2   : > { %v852_v19 = vpop.f32.mrf.mxu1  ;;  %v5094_v37 = vmul.f32 0.088388346, %v917_v18 }
 0x1b3   : > { %v5074_v20 = vmul.f32 0.088388346, %v852_v19  ;;  %v1108_v21 = vsel %vm803_vm0, %v5072_v17, -inf }
 0x1b4   : > { %1109 = vmax.xlane.f32.xlu2 %v1108_v21  ;;  %v1120_v45 = vsel %vm803_vm0, %v5094_v37, -inf }
 0x1b5   : > { %v1093_v23 = vsel %vm803_vm0, %v5074_v20, -inf }
 0x1b6   : > { %1103 = vmax.xlane.f32.xlu0 %v1102_v22  ;;  %1094 = vmax.xlane.f32.xlu1 %v1093_v23 }
 0x1b8   : > { %v888_v24 = vpop.f32.mrf.mxu2 }
 0x1b9   : > { %v919_v27 = vpop.f32.mrf.mxu3  ;;  %v5096_v38 = vmul.f32 0.088388346, %v888_v24 }
 0x1ba   : > { %v5084_v28 = vmul.f32 0.088388346, %v919_v27  ;;  %v855_v29 = vpop.f32.mrf.mxu1 }
 0x1bb   : > { %v5086_v32 = vmul.f32 0.088388346, %v855_v29  ;;  %v1111_v47 = vsel %vm803_vm0, %v5096_v38, -inf }
 0x1bc   : > { %v1123_v33 = vsel %vm803_vm0, %v5084_v28, -inf }
 0x1bd   : > { %1124 = vmax.xlane.f32.xlu2 %v1123_v33  ;;  %v1096_v35 = vsel %vm803_vm0, %v5086_v32, -inf }
 0x1be   : > { %1106 = vmax.xlane.f32.xlu1 %v1105_v34  ;;  %1097 = vmax.xlane.f32.xlu0 %v1096_v35  ;;  %v5160_v34 = vpop.xlane.xlu2 %1079  ;;  %v5162_v35 = vpop.xlane.xlu0 %1127 }
 0x1c0   : > { %v948_v36 = vpop.f32.mrf.mxu2 }
 0x1c1   : > { %v5098_v39 = vmul.f32 0.088388346, %v948_v36  ;;  %v1036_v41 = vpop.f32.mrf.mxu3 }
 0x1c2   : > { %v857_v42 = vpop.f32.mrf.mxu1  ;;  %v5120_v58 = vmul.f32 0.088388346, %v1036_v41  ;;  %v5166_v41 = vpop.xlane.xlu1 %1085 }
 0x1c3   : > { %v1132_v43 = vsel %vm803_vm0, %v5098_v39, -inf  ;;  %v5108_v49 = vmul.f32 0.088388346, %v857_v42 }
 0x1c4   : > { %v1162_v3 = vsel %vm803_vm0, %v5120_v58, -inf }
 0x1c5   : > { %1133 = vmax.xlane.f32.xlu2 %v1132_v43  ;;  %v1099_v56 = vsel %vm803_vm0, %v5108_v49, -inf }
 0x1c6   : > { %1121 = vmax.xlane.f32.xlu1 %v1120_v45  ;;  %1112 = vmax.xlane.f32.xlu0 %v1111_v47  ;;  %v5164_v36 = vpop.xlane.xlu2 %1088  ;;  %v5169_v45 = vpop.xlane.xlu0 %1082 }
 0x1c8   : > { %v5106_v48 = vpop.f32.mrf.mxu2 }
 0x1c9   : > { %v1038_v50 = vpop.f32.mrf.mxu3 }
 0x1ca   : > { %v5110_v51 = vmul.f32 0.088388346, %v1038_v50 }
 0x1cb   : > { %v974_v52 = vpop.f32.mrf.mxu1 }
 0x1cc   : > { %v5112_v54 = vmul.f32 0.088388346, %v974_v52  ;;  %v1165_v55 = vsel %vm803_vm0, %v5110_v51, -inf }
 0x1cd   : > { %1166 = vmax.xlane.f32.xlu2 %v1165_v55  ;;  %v5172_v55 = vpop.xlane.xlu1 %1130 }
 0x1ce   : > { %1100 = vmax.xlane.f32.xlu1 %v1099_v56  ;;  %v1138_v57 = vsel %vm803_vm0, %v5112_v54, -inf }
 0x1cf   : > { %1139 = vmax.xlane.f32.xlu0 %v1138_v57 }
 0x1d0   : > { %v1005_v60 = vpop.f32.mrf.mxu2 }
 0x1d1   : > { %v5122_v61 = vmul.f32 0.088388346, %v1005_v60  ;;  %v1041_v62 = vpop.f32.mrf.mxu3 }
 0x1d2   : > { %v5124_v0 = vmul.f32 0.088388346, %v1041_v62 }
 0x1d3   : > { %v976_v1 = vpop.f32.mrf.mxu1  ;;  %v1150_v2 = vsel %vm803_vm0, %v5122_v61, -inf }
 0x1d4   : > { %v1168_v4 = vsel %vm803_vm0, %v5124_v0, -inf  ;;  %v5132_v44 = vmul.f32 0.088388346, %v976_v1 }
 0x1d5   : > { %1151 = vmax.xlane.f32.xlu2 %v1150_v2 }
 0x1d6   : > { %1163 = vmax.xlane.f32.xlu1 %v1162_v3  ;;  %v1141_v5 = vsel %vm803_vm0, %v5132_v44, -inf }
 0x1d7   : > { %1169 = vmax.xlane.f32.xlu0 %v1168_v4 }
 0x1d8   : > { %v1007_v63 = vpop.f32.mrf.mxu2 }
 0x1d9   : > { %v5134_v31 = vmul.f32 0.088388346, %v1007_v63  ;;  %v1043_v14 = vpop.f32.mrf.mxu3 }
 0x1da   : > { %v5148_v21 = vmul.f32 0.088388346, %v1043_v14 }
 0x1db   : > { %v979_v53 = vpop.f32.mrf.mxu1  ;;  %v1153_v6 = vsel %vm803_vm0, %v5134_v31, -inf }
 0x1dc   : > { %v5140_v7 = vmul.f32 0.088388346, %v979_v53  ;;  %v1171_v24 = vsel %vm803_vm0, %v5148_v21, -inf }
 0x1de   : > { %1142 = vmax.xlane.f32.xlu1 %v1141_v5  ;;  %v1144_v12 = vsel %vm803_vm0, %v5140_v7, -inf }
 0x1df   : > { %1154 = vmax.xlane.f32.xlu0 %v1153_v6 }
 0x1e0   : > { %v1010_v9 = vpop.f32.mrf.mxu2 }
 0x1e1   : > { %v5156_v29 = vmul.f32 0.088388346, %v1010_v9 }
 0x1e3   : > { %v981_v11 = vpop.f32.mrf.mxu1  ;;  %v1156_v33 = vsel %vm803_vm0, %v5156_v29, -inf }
 0x1e4   : > { %v5144_v18 = vmul.f32 0.088388346, %v981_v11 }
 0x1e6   : > { %1145 = vmax.xlane.f32.xlu1 %v1144_v12  ;;  %v1147_v19 = vsel %vm803_vm0, %v5144_v18, -inf }
 0x1e7   : > { %1148 = vmax.xlane.f32.xlu2 %v1147_v19 }
 0x1e8   : > { %v1012_v22 = vpop.f32.mrf.mxu2 }
 0x1e9   : > { %v5150_v23 = vmul.f32 0.088388346, %v1012_v22 }
 0x1eb   : > { %v1159_v27 = vsel %vm803_vm0, %v5150_v23, -inf }
 0x1ee   : > { %1172 = vmax.xlane.f32.xlu1 %v1171_v24 }
 0x1ef   : > { %1160 = vmax.xlane.f32.xlu2 %v1159_v27 }
 0x1f6   : > { %1157 = vmax.xlane.f32.xlu1 %v1156_v33 }
 0x217   : > { %v1116_v42 = vpop.xlane.xlu2 %1115 }
 0x218   : > { %v1186_v43 = vsub.f32 %v5058_v59, %v1116_v42 }
 0x21a   : > { %v1230_v47 = vmul.f32 1.442695, %v1186_v43 }
 0x21c   : > { %4030 = vpow2.f32 %v1230_v47 }
 0x21f   : > { %v1119_v50 = vpop.xlane.xlu2 %1118 }
 0x220   : > { %v1187_v52 = vsub.f32 %v5062_v8, %v1119_v50 }
 0x221   : > { %v1092_v56 = vpop.xlane.xlu0 %1091 }
 0x222   : > { %v5174_v57 = vpop.eup %4030  ;;  %v1232_v60 = vmul.f32 1.442695, %v1187_v52  ;;  %v1178_v62 = vsub.f32 %v5064_v10, %v1092_v56 }
 0x223   : > { %v1306_v1 = vsel %vm803_vm0, %v5174_v57, 0.0 }
 0x224   : > { %4032 = vpow2.f32 %v1232_v60  ;;  %v1214_v59 = vmul.f32 1.442695, %v1178_v62  ;;  %1307 = vadd.xlane.f32.xlu0 %v1306_v1 }
 0x226   : > { %4034 = vpow2.f32 %v1214_v59 }
 0x227   : > { %v1110_v2 = vpop.xlane.xlu2 %1109 }
 0x228   : > { %v1184_v42 = vsub.f32 %v5072_v17, %v1110_v2 }
 0x229   : > { %v1104_v3 = vpop.xlane.xlu0 %1103  ;;  %v1095_v4 = vpop.xlane.xlu1 %1094 }
 0x22a   : > { %v5179_v63 = vpop.eup %4032  ;;  %v1182_v8 = vsub.f32 %v5070_v15, %v1104_v3  ;;  %v1179_v53 = vsub.f32 %v5074_v20, %v1095_v4 }
 0x22b   : > { %v1309_v5 = vsel %vm803_vm0, %v5179_v63, 0.0 }
 0x22c   : > { %v5185_v10 = vpop.eup %4034  ;;  %v1222_v6 = vmul.f32 1.442695, %v1182_v8  ;;  %v1216_v9 = vmul.f32 1.442695, %v1179_v53  ;;  %1310 = vadd.xlane.f32.xlu1 %v1309_v5 }
 0x22d   : > { %v1282_v11 = vsel %vm803_vm0, %v5185_v10, 0.0 }
 0x22e   : > { %4036 = vpow2.f32 %v1222_v6  ;;  %1283 = vadd.xlane.f32.xlu2 %v1282_v11 }
 0x22f   : > { %4038 = vpow2.f32 %v1216_v9 }
 0x230   : > { %v1125_v12 = vpop.xlane.xlu2 %1124 }
 0x231   : > { %v1107_v14 = vpop.xlane.xlu1 %1106  ;;  %v1098_v19 = vpop.xlane.xlu0 %1097  ;;  %v1189_v2 = vsub.f32 %v5084_v28, %v1125_v12 }
 0x232   : > { %v1183_v15 = vsub.f32 %v5082_v25, %v1107_v14  ;;  %v1180_v20 = vsub.f32 %v5086_v32, %v1098_v19  ;;  %v1226_v32 = vmul.f32 1.442695, %v1184_v42 }
 0x234   : > { %v5191_v22 = vpop.eup %4036  ;;  %v1224_v24 = vmul.f32 1.442695, %v1183_v15  ;;  %v1218_v27 = vmul.f32 1.442695, %v1180_v20 }
 0x235   : > { %v5193_v33 = vpop.eup %4038  ;;  %v1294_v43 = vsel %vm803_vm0, %v5191_v22, 0.0 }
 0x236   : > { %4040 = vpow2.f32 %v1224_v24  ;;  %v1285_v47 = vsel %vm803_vm0, %v5193_v33, 0.0  ;;  %1295 = vadd.xlane.f32.xlu2 %v1294_v43 }
 0x237   : > { %4042 = vpow2.f32 %v1218_v27  ;;  %1286 = vadd.xlane.f32.xlu0 %v1285_v47 }
 0x238   : > { %v5200_v25 = vpop.xlane.xlu2 %1133  ;;  %4044 = vpow2.f32 %v1226_v32 }
 0x239   : > { %v1122_v50 = vpop.xlane.xlu1 %1121  ;;  %v1113_v52 = vpop.xlane.xlu0 %1112 }
 0x23a   : > { %v1188_v56 = vsub.f32 %v5094_v37, %v1122_v50  ;;  %v1185_v60 = vsub.f32 %v5096_v38, %v1113_v52  ;;  %v1236_v38 = vmul.f32 1.442695, %v1189_v2 }
 0x23c   : > { %v5204_v17 = vpop.eup %4040  ;;  %v1234_v62 = vmul.f32 1.442695, %v1188_v56  ;;  %v1228_v1 = vmul.f32 1.442695, %v1185_v60 }
 0x23d   : > { %v5206_v59 = vpop.eup %4042  ;;  %v1297_v3 = vsel %vm803_vm0, %v5204_v17, 0.0 }
 0x23e   : > { %4046 = vpow2.f32 %v1234_v62  ;;  %v1288_v4 = vsel %vm803_vm0, %v5206_v59, 0.0  ;;  %v5214_v6 = vpop.eup %4044 }
 0x23f   : > { %4048 = vpow2.f32 %v1228_v1  ;;  %1298 = vadd.xlane.f32.xlu0 %v1297_v3  ;;  %1289 = vadd.xlane.f32.xlu1 %v1288_v4 }
 0x240   : > { %v1167_v37 = vpop.xlane.xlu2 %1166  ;;  %4050 = vpow2.f32 %v1236_v38  ;;  %v1175_v38 = vsub.f32 %v5015_v30, %v5169_v45 }
 0x241   : > { %v1101_v8 = vpop.xlane.xlu1 %1100  ;;  %v1203_v28 = vsub.f32 %v5110_v51, %v1167_v37 }
 0x242   : > { %v1181_v53 = vsub.f32 %v5108_v49, %v1101_v8  ;;  %v1140_v5 = vpop.xlane.xlu0 %1139  ;;  %v1300_v49 = vsel %vm803_vm0, %v5214_v6, 0.0 }
 0x243   : > { %v1194_v14 = vsub.f32 %v5112_v54, %v1140_v5  ;;  %v1264_v51 = vmul.f32 1.442695, %v1203_v28 }
 0x244   : > { %v5216_v9 = vpop.eup %4046  ;;  %v1220_v11 = vmul.f32 1.442695, %v1181_v53 }
 0x245   : > { %v5219_v12 = vpop.eup %4048  ;;  %v1312_v19 = vsel %vm803_vm0, %v5216_v9, 0.0  ;;  %v1246_v20 = vmul.f32 1.442695, %v1194_v14 }
 0x246   : > { %4052 = vpow2.f32 %v1220_v11  ;;  %v1303_v15 = vsel %vm803_vm0, %v5219_v12, 0.0  ;;  %1313 = vadd.xlane.f32.xlu2 %v1312_v19  ;;  %v5229_v43 = vpop.eup %4050 }
 0x247   : > { %1301 = vadd.xlane.f32.xlu0 %v1300_v49  ;;  %1304 = vadd.xlane.f32.xlu1 %v1303_v15  ;;  %4054 = vpow2.f32 %v1264_v51  ;;  %v1315_v56 = vsel %vm803_vm0, %v5229_v43, 0.0 }
 0x248   : > { %v1152_v24 = vpop.xlane.xlu2 %1151  ;;  %4056 = vpow2.f32 %v1246_v20 }
 0x249   : > { %v1164_v27 = vpop.xlane.xlu1 %1163  ;;  %v1198_v32 = vsub.f32 %v5122_v61, %v1152_v24  ;;  %v1174_v61 = vsub.f32 %v4999_v13, %v5160_v34  ;;  %v1208_v34 = vmul.f32 1.442695, %v1175_v38 }
 0x24a   : > { %v1202_v42 = vsub.f32 %v5120_v58, %v1164_v27  ;;  %v1170_v54 = vpop.xlane.xlu0 %1169 }
 0x24b   : > { %v1254_v58 = vmul.f32 1.442695, %v1198_v32  ;;  %v1204_v14 = vsub.f32 %v5124_v0, %v1170_v54  ;;  %v5274_v0 = vmul.f32 0.088388346, %v5106_v48 }
 0x24c   : > { %v5231_v47 = vpop.eup %4052  ;;  %v1262_v50 = vmul.f32 1.442695, %v1202_v42 }
 0x24d   : > { %v1291_v52 = vsel %vm803_vm0, %v5231_v47, 0.0  ;;  %v5238_v62 = vpop.eup %4054  ;;  %v1266_v20 = vmul.f32 1.442695, %v1204_v14 }
 0x24e   : > { %4058 = vpow2.f32 %v1262_v50  ;;  %1292 = vadd.xlane.f32.xlu2 %v1291_v52  ;;  %v5241_v3 = vpop.eup %4056 }
 0x24f   : > { %1316 = vadd.xlane.f32.xlu0 %v1315_v56  ;;  %4060 = vpow2.f32 %v1254_v58  ;;  %v1330_v13 = vsel %vm803_vm0, %v5241_v3, 0.0 }
 0x251   : > { %v1143_v60 = vpop.xlane.xlu1 %1142 }
 0x252   : > { %v1155_v1 = vpop.xlane.xlu0 %1154  ;;  %v1195_v2 = vsub.f32 %v5132_v44, %v1143_v60  ;;  %v1357_v44 = vsel %vm803_vm0, %v5238_v62, 0.0 }
 0x253   : > { %v1199_v4 = vsub.f32 %v5134_v31, %v1155_v1  ;;  %v1206_v31 = vmul.f32 1.442695, %v1174_v61  ;;  %v1135_v1 = vsel %vm803_vm0, %v5274_v0, -inf  ;;  %v1190_v61 = vsub.f32 %v5001_v16, %v5162_v35 }
 0x254   : > { %v5246_v37 = vpop.eup %4058  ;;  %v1248_v8 = vmul.f32 1.442695, %v1195_v2 }
 0x255   : > { %v1256_v53 = vmul.f32 1.442695, %v1199_v4  ;;  %v1354_v5 = vsel %vm803_vm0, %v5246_v37, 0.0  ;;  %v5256_v45 = vpop.eup %4060 }
 0x256   : > { %4062 = vpow2.f32 %v1248_v8  ;;  %1355 = vadd.xlane.f32.xlu1 %v1354_v5  ;;  %1358 = vadd.xlane.f32.xlu2 %v1357_v44  ;;  %v1342_v15 = vsel %vm803_vm0, %v5256_v45, 0.0  ;;  %v1238_v44 = vmul.f32 1.442695, %v1190_v61 }
 0x257   : > { %4064 = vpow2.f32 %v1256_v53  ;;  %1331 = vadd.xlane.f32.xlu0 %v1330_v13  ;;  %v1177_v53 = vsub.f32 %v5028_v46, %v5164_v36  ;;  %v1176_v46 = vsub.f32 %v5011_v26, %v5166_v41  ;;  %v1192_v36 = vsub.f32 %v5098_v39, %v5200_v25 }
 0x258   : > { %4066 = vpow2.f32 %v1206_v31  ;;  %v1191_v39 = vsub.f32 %v5021_v40, %v5172_v55 }
 0x259   : > { %v1146_v30 = vpop.xlane.xlu1 %1145  ;;  %4068 = vpow2.f32 %v1208_v34  ;;  %v1212_v35 = vmul.f32 1.442695, %v1177_v53  ;;  %v1210_v14 = vmul.f32 1.442695, %v1176_v46  ;;  %v1242_v26 = vmul.f32 1.442695, %v1192_v36 }
 0x25a   : > { %v1149_v28 = vpop.xlane.xlu2 %1148  ;;  %4070 = vpow2.f32 %v1266_v20  ;;  %v1196_v52 = vsub.f32 %v5140_v7, %v1146_v30 }
 0x25b   : > { %v1197_v50 = vsub.f32 %v5144_v18, %v1149_v28 }
 0x25c   : > { %v5258_v11 = vpop.eup %4062 }
 0x25d   : > { %v5261_v19 = vpop.eup %4064  ;;  %v1333_v49 = vsel %vm803_vm0, %v5258_v11, 0.0  ;;  %v1252_v48 = vmul.f32 1.442695, %v1197_v50 }
 0x25e   : > { %v1345_v51 = vsel %vm803_vm0, %v5261_v19, 0.0  ;;  %1334 = vadd.xlane.f32.xlu1 %v1333_v49  ;;  %1343 = vadd.xlane.f32.xlu2 %v1342_v15  ;;  %v5269_v24 = vpop.eup %4066 }
 0x25f   : > { %1346 = vadd.xlane.f32.xlu0 %v1345_v51  ;;  %v5271_v42 = vpop.eup %4068  ;;  %v1270_v58 = vsel %vm803_vm0, %v5269_v24, 0.0 }
 0x260   : > { %v1273_v60 = vsel %vm803_vm0, %v5271_v42, 0.0  ;;  %v5285_v18 = vpop.eup %4070 }
 0x261   : > { %v1173_v27 = vpop.xlane.xlu1 %1172  ;;  %v1360_v5 = vsel %vm803_vm0, %v5285_v18, 0.0 }
 0x262   : > { %v1161_v54 = vpop.xlane.xlu2 %1160  ;;  %v1205_v4 = vsub.f32 %v5148_v21, %v1173_v27  ;;  %v1240_v27 = vmul.f32 1.442695, %v1191_v39 }
 0x263   : > { %v1201_v32 = vsub.f32 %v5150_v23, %v1161_v54  ;;  %v1250_v23 = vmul.f32 1.442695, %v1196_v52 }
 0x264   : > { %v1268_v16 = vmul.f32 1.442695, %v1205_v4 }
 0x265   : > { %v1260_v56 = vmul.f32 1.442695, %v1201_v32 }
 0x266   : > { %1271 = vadd.xlane.f32.xlu1 %v1270_v58  ;;  %1274 = vadd.xlane.f32.xlu2 %v1273_v60 }
 0x267   : > { %4072 = vpow2.f32 %v1260_v56  ;;  %1136 = vmax.xlane.f32.xlu0 %v1135_v1 }
 0x268   : > { %4074 = vpow2.f32 %v1252_v48 }
 0x269   : > { %v1158_v2 = vpop.xlane.xlu1 %1157  ;;  %4076 = vpow2.f32 %v1250_v23 }
 0x26a   : > { %v1200_v7 = vsub.f32 %v5156_v29, %v1158_v2 }
 0x26c   : > { %v1258_v38 = vmul.f32 1.442695, %v1200_v7 }
 0x26d   : > { %v5291_v8 = vpop.eup %4072 }
 0x26e   : > { %4078 = vpow2.f32 %v1258_v38  ;;  %1361 = vadd.xlane.f32.xlu2 %v1360_v5  ;;  %v1351_v29 = vsel %vm803_vm0, %v5291_v8, 0.0  ;;  %v5299_v21 = vpop.eup %4074 }
 0x26f   : > { %1352 = vadd.xlane.f32.xlu1 %v1351_v29  ;;  %v5301_v13 = vpop.eup %4076  ;;  %4080 = vpow2.f32 %v1238_v44  ;;  %v1339_v30 = vsel %vm803_vm0, %v5299_v21, 0.0 }
 0x270   : > { %4082 = vpow2.f32 %v1268_v16  ;;  %v1336_v28 = vsel %vm803_vm0, %v5301_v13, 0.0 }
 0x271   : > { %4084 = vpow2.f32 %v1212_v35 }
 0x272   : > { %4086 = vpow2.f32 %v1210_v14 }
 0x273   : > { %4088 = vpow2.f32 %v1242_v26 }
 0x274   : > { %v5303_v31 = vpop.eup %4078  ;;  %4090 = vpow2.f32 %v1240_v27 }
 0x275   : > { %v1348_v34 = vsel %vm803_vm0, %v5303_v31, 0.0  ;;  %v5315_v49 = vpop.eup %4080 }
 0x276   : > { %1349 = vadd.xlane.f32.xlu0 %v1348_v34  ;;  %1340 = vadd.xlane.f32.xlu2 %v1339_v30  ;;  %v5317_v41 = vpop.eup %4082  ;;  %v1318_v51 = vsel %vm803_vm0, %v5315_v49, 0.0 }
 0x277   : > { %1337 = vadd.xlane.f32.xlu1 %v1336_v28  ;;  %v5319_v15 = vpop.eup %4084  ;;  %v1363_v25 = vsel %vm803_vm0, %v5317_v41, 0.0 }
 0x278   : > { %v1279_v20 = vsel %vm803_vm0, %v5319_v15, 0.0  ;;  %v5329_v54 = vpop.eup %4086 }
 0x279   : > { %v5331_v32 = vpop.eup %4088  ;;  %v1276_v40 = vsel %vm803_vm0, %v5329_v54, 0.0 }
 0x27a   : > { %v1324_v55 = vsel %vm803_vm0, %v5331_v32, 0.0  ;;  %v5337_v50 = vpop.eup %4090 }
 0x27b   : > { %v1321_v52 = vsel %vm803_vm0, %v5337_v50, 0.0 }
 0x27e   : > { %1364 = vadd.xlane.f32.xlu0 %v1363_v25  ;;  %1319 = vadd.xlane.f32.xlu2 %v1318_v51 }
 0x27f   : > { %1280 = vadd.xlane.f32.xlu1 %v1279_v20 }
 0x286   : > { %1277 = vadd.xlane.f32.xlu0 %v1276_v40 }
 0x287   : > { %1325 = vadd.xlane.f32.xlu1 %v1324_v55 }
 0x28e   : > { %1322 = vadd.xlane.f32.xlu0 %v1321_v52 }
 0x297   : > { %v1308_v56 = vpop.xlane.xlu0 %1307 }
 0x298   : > { %4092 = vrcp.f32 %v1308_v56 }
 0x29e   : > { %v4093_v60 = vpop.eup %4092 }
 0x29f   : > { %v1311_v58 = vpop.xlane.xlu1 %1310  ;;  %v1410_v48 = vmul.f32 %v4093_v60, %v5174_v57 }
 0x2a0   : > { %4094 = vrcp.f32 %v1311_v58 }
 0x2a1   : > { %v1284_v1 = vpop.xlane.xlu2 %1283  ;;  %v1442_v2 = vpack.c.bf16 %v1410_v48, %v1410_v48 }
 0x2a2   : > { %4096 = vrcp.f32 %v1284_v1 }
 0x2a3   : > { %v1577_v5 = vunpack.c.l.b16 %v1442_v2 }
 0x2a6   : > { %v4095_v23 = vpop.eup %4094 }
 0x2a7   : > { %v1411_v7 = vmul.f32 %v4095_v23, %v5179_v63 }
 0x2a8   : > { %v4097_v53 = vpop.eup %4096 }
 0x2a9   : > { %v1443_v61 = vpack.c.bf16 %v1411_v7, %v1411_v7  ;;  %v1296_v38 = vpop.xlane.xlu2 %1295  ;;  %v1402_v16 = vmul.f32 %v4097_v53, %v5185_v10 }
 0x2aa   : > { %v1287_v4 = vpop.xlane.xlu0 %1286 }
 0x2ab   : > { %v1578_v29 = vunpack.c.l.b16 %v1443_v61  ;;  %4098 = vrcp.f32 %v1287_v4  ;;  %v1434_v57 = vpack.c.bf16 %v1402_v16, %v1402_v16 }
 0x2ac   : > { %4100 = vrcp.f32 %v1296_v38 }
 0x2ad   : > { %v1581_v44 = vpack.c.b16 %v1578_v29, %v1577_v5  ;;  %v1503_v28 = vunpack.c.l.b16 %v1434_v57 }
 0x2af   : > { %3433 = vmatmul.msk.bf16.vlgmr.msrb.gmra.mxu3 %vm803_vm0, %v1581_v44 }
 0x2b1   : > { %v4099_v35 = vpop.eup %4098 }
 0x2b2   : > { %v1403_v46 = vmul.f32 %v4099_v35, %v5193_v33  ;;  %v1299_v36 = vpop.xlane.xlu0 %1298  ;;  %v1290_v34 = vpop.xlane.xlu1 %1289 }
 0x2b3   : > { %v4101_v63 = vpop.eup %4100  ;;  %4102 = vrcp.f32 %v1299_v36 }
 0x2b4   : > { %v1435_v30 = vpack.c.bf16 %v1403_v46, %v1403_v46  ;;  %v1406_v26 = vmul.f32 %v4101_v63, %v5191_v22  ;;  %4104 = vrcp.f32 %v1290_v34 }
 0x2b6   : > { %v1504_v14 = vunpack.c.l.b16 %v1435_v30  ;;  %v1438_v20 = vpack.c.bf16 %v1406_v26, %v1406_v26 }
 0x2b8   : > { %v1507_v39 = vpack.c.b16 %v1504_v14, %v1503_v28  ;;  %v1540_v55 = vunpack.c.l.b16 %v1438_v20 }
 0x2b9   : > { %v4103_v25 = vpop.eup %4102  ;;  %v1314_v51 = vpop.xlane.xlu2 %1313 }
 0x2ba   : > { %v1407_v10 = vmul.f32 %v4103_v25, %v5204_v17  ;;  %v1302_v27 = vpop.xlane.xlu0 %1301  ;;  %v1305_v40 = vpop.xlane.xlu1 %1304  ;;  %3429 = vmatmul.msk.bf16.vlgmr.msrb.gmra.mxu1 %vm803_vm0, %v1507_v39 }
 0x2bb   : > { %4106 = vrcp.f32 %v1302_v27  ;;  %v4105_v56 = vpop.eup %4104 }
 0x2bc   : > { %v1439_v33 = vpack.c.bf16 %v1407_v10, %v1407_v10  ;;  %4108 = vrcp.f32 %v1305_v40  ;;  %v1404_v7 = vmul.f32 %v4105_v56, %v5206_v59 }
 0x2bd   : > { %4110 = vrcp.f32 %v1314_v51 }
 0x2be   : > { %v1541_v52 = vunpack.c.l.b16 %v1439_v33  ;;  %v1436_v35 = vpack.c.bf16 %v1404_v7, %v1404_v7 }
 0x2c0   : > { %v1544_v58 = vpack.c.b16 %v1541_v52, %v1540_v55  ;;  %v1505_v34 = vunpack.c.l.b16 %v1436_v35 }
 0x2c1   : > { %v4107_v22 = vpop.eup %4106  ;;  %v1293_v60 = vpop.xlane.xlu2 %1292 }
 0x2c2   : > { %v4109_v1 = vpop.eup %4108  ;;  %v1317_v48 = vpop.xlane.xlu0 %1316  ;;  %3431 = vmatmul.msk.bf16.vlgmr.msrb.gmra.mxu2 %vm803_vm0, %v1544_v58  ;;  %4112 = vrcp.f32 %v1293_v60  ;;  %v1408_v23 = vmul.f32 %v4107_v22, %v5214_v6 }
 0x2c3   : > { %v4111_v17 = vpop.eup %4110  ;;  %4114 = vrcp.f32 %v1317_v48  ;;  %v1409_v2 = vmul.f32 %v4109_v1, %v5219_v12 }
 0x2c4   : > { %v1412_v61 = vmul.f32 %v4111_v17, %v5216_v9  ;;  %v1440_v38 = vpack.c.bf16 %v1408_v23, %v1408_v23 }
 0x2c5   : > { %v1441_v53 = vpack.c.bf16 %v1409_v2, %v1409_v2 }
 0x2c6   : > { %v1444_v6 = vpack.c.bf16 %v1412_v61, %v1412_v61  ;;  %v1542_v59 = vunpack.c.l.b16 %v1440_v38 }
 0x2c7   : > { %v1543_v36 = vunpack.c.l.b16 %v1441_v53 }
 0x2c8   : > { %v4113_v4 = vpop.eup %4112  ;;  %v1579_v30 = vunpack.c.l.b16 %v1444_v6 }
 0x2c9   : > { %v4115_v5 = vpop.eup %4114  ;;  %v1356_v29 = vpop.xlane.xlu1 %1355  ;;  %v1405_v16 = vmul.f32 %v4113_v4, %v5231_v47  ;;  %v1545_v39 = vpack.c.b16 %v1543_v36, %v1542_v59 }
 0x2ca   : > { %v1359_v44 = vpop.xlane.xlu2 %1358  ;;  %v1332_v57 = vpop.xlane.xlu0 %1331  ;;  %4116 = vrcp.f32 %v1356_v29  ;;  %v1413_v46 = vmul.f32 %v4115_v5, %v5229_v43 }
 0x2cb   : > { %4118 = vrcp.f32 %v1332_v57  ;;  %v1437_v12 = vpack.c.bf16 %v1405_v16, %v1405_v16 }
 0x2cc   : > { %4120 = vrcp.f32 %v1359_v44  ;;  %v1445_v9 = vpack.c.bf16 %v1413_v46, %v1413_v46 }
 0x2cd   : > { %v1506_v63 = vunpack.c.l.b16 %v1437_v12 }
 0x2ce   : > { %v1580_v28 = vunpack.c.l.b16 %v1445_v9 }
 0x2cf   : > { %v1508_v14 = vpack.c.b16 %v1506_v63, %v1505_v34 }
 0x2d0   : > { %v4117_v26 = vpop.eup %4116  ;;  %v1582_v47 = vpack.c.b16 %v1580_v28, %v1579_v30 }
 0x2d1   : > { %v4119_v25 = vpop.eup %4118  ;;  %v1335_v51 = vpop.xlane.xlu1 %1334  ;;  %3430 = vmatmul.msk.bf16.gmra.mxu1 %vm803_vm0, %v1508_v14  ;;  %v1426_v27 = vmul.f32 %v4117_v26, %v5246_v37 }
 0x2d2   : > { %v1344_v43 = vpop.xlane.xlu2 %1343  ;;  %v4121_v20 = vpop.eup %4120  ;;  %4122 = vrcp.f32 %v1335_v51  ;;  %3432 = vmatmul.msk.bf16.gmra.mxu2 %vm803_vm0, %v1545_v39  ;;  %3434 = vmatmul.msk.bf16.gmra.mxu3 %vm803_vm0, %v1582_v47  ;;  %v1418_v33 = vmul.f32 %v4119_v25, %v5241_v3 }
 0x2d3   : > { %v1347_v10 = vpop.xlane.xlu0 %1346  ;;  %v1427_v40 = vmul.f32 %v4121_v20, %v5238_v62  ;;  %v1458_v52 = vpack.c.bf16 %v1426_v27, %v1426_v27 }
 0x2d4   : > { %4124 = vrcp.f32 %v1347_v10  ;;  %v1450_v22 = vpack.c.bf16 %v1418_v33, %v1418_v33 }
 0x2d5   : > { %4126 = vrcp.f32 %v1344_v43  ;;  %v1459_v56 = vpack.c.bf16 %v1427_v40, %v1427_v40  ;;  %v1725_v3 = vunpack.c.l.b16 %v1458_v52 }
 0x2d6   : > { %v1651_v38 = vunpack.c.l.b16 %v1450_v22 }
 0x2d7   : > { %v1726_v61 = vunpack.c.l.b16 %v1459_v56 }
 0x2d8   : > { %v4123_v55 = vpop.eup %4122 }
 0x2d9   : > { %v1419_v60 = vmul.f32 %v4123_v55, %v5258_v11  ;;  %v1272_v1 = vpop.xlane.xlu1 %1271  ;;  %v1729_v35 = vpack.c.b16 %v1726_v61, %v1725_v3 }
 0x2da   : > { %v4125_v58 = vpop.eup %4124  ;;  %v1275_v48 = vpop.xlane.xlu2 %1274  ;;  %4128 = vrcp.f32 %v1272_v1 }
 0x2db   : > { %v4127_v17 = vpop.eup %4126  ;;  %v1423_v23 = vmul.f32 %v4125_v58, %v5261_v19  ;;  %v1137_v2 = vpop.xlane.xlu0 %1136  ;;  %v1451_v37 = vpack.c.bf16 %v1419_v60, %v1419_v60  ;;  %4130 = vrcp.f32 %v1275_v48 }
 0x2dc   : > { %v1422_v62 = vmul.f32 %v4127_v17, %v5256_v45  ;;  %v1193_v7 = vsub.f32 %v5274_v0, %v1137_v2 }
 0x2dd   : > { %v1455_v4 = vpack.c.bf16 %v1423_v23, %v1423_v23  ;;  %v1652_v53 = vunpack.c.l.b16 %v1451_v37 }
 0x2de   : > { %v1454_v5 = vpack.c.bf16 %v1422_v62, %v1422_v62  ;;  %v1244_v11 = vmul.f32 1.442695, %v1193_v7 }
 0x2df   : > { %v1689_v29 = vunpack.c.l.b16 %v1455_v4  ;;  %v1655_v44 = vpack.c.b16 %v1652_v53, %v1651_v38 }
 0x2e0   : > { %v1688_v16 = vunpack.c.l.b16 %v1454_v5  ;;  %4132 = vpow2.f32 %v1244_v11  ;;  %v4129_v19 = vpop.eup %4128 }
 0x2e1   : > { %v4131_v57 = vpop.eup %4130  ;;  %v1398_v45 = vmul.f32 %v4129_v19, %v5269_v24  ;;  %3437 = vmatmul.msk.bf16.vlgmr.msra.gmra.mxu1 %vm803_vm0, %v1655_v44 }
 0x2e2   : > { %v1692_v46 = vpack.c.b16 %v1689_v29, %v1688_v16  ;;  %v1362_v0 = vpop.xlane.xlu2 %1361  ;;  %v1399_v6 = vmul.f32 %v4131_v57, %v5271_v42  ;;  %v1353_v12 = vpop.xlane.xlu1 %1352  ;;  %3441 = vmatmul.msk.bf16.vlgmr.msra.gmra.mxu3 %vm803_vm0, %v1729_v35 }
 0x2e3   : > { %v1430_v59 = vpack.c.bf16 %v1398_v45, %v1398_v45  ;;  %4134 = vrcp.f32 %v1353_v12 }
 0x2e4   : > { %3439 = vmatmul.msk.bf16.vlgmr.msra.gmra.mxu2 %vm803_vm0, %v1692_v46  ;;  %v1431_v36 = vpack.c.bf16 %v1399_v6, %v1399_v6  ;;  %4136 = vrcp.f32 %v1362_v0 }
 0x2e5   : > { %v1466_v34 = vunpack.c.l.b16 %v1430_v59 }
 0x2e6   : > { %v5371_v9 = vpop.eup %4132  ;;  %v1467_v63 = vunpack.c.l.b16 %v1431_v36 }
 0x2e7   : > { %v1327_v24 = vsel %vm803_vm0, %v5371_v9, 0.0 }
 0x2e8   : > { %1328 = vadd.xlane.f32.xlu2 %v1327_v24  ;;  %v1470_v30 = vpack.c.b16 %v1467_v63, %v1466_v34 }
 0x2e9   : > { %v1350_v28 = vpop.xlane.xlu0 %1349  ;;  %v4135_v14 = vpop.eup %4134 }
 0x2ea   : > { %v1341_v42 = vpop.xlane.xlu2 %1340  ;;  %4138 = vrcp.f32 %v1350_v28  ;;  %v1338_v26 = vpop.xlane.xlu1 %1337  ;;  %3427 = vmatmul.msk.bf16.vlgmr.msrb.gmra.mxu0 %vm803_vm0, %v1470_v30  ;;  %v1425_v39 = vmul.f32 %v4135_v14, %v5291_v8 }
 0x2eb   : > { %4140 = vrcp.f32 %v1338_v26  ;;  %v4137_v47 = vpop.eup %4136 }
 0x2ec   : > { %4142 = vrcp.f32 %v1341_v42  ;;  %v1457_v10 = vpack.c.bf16 %v1425_v39, %v1425_v39  ;;  %v1428_v60 = vmul.f32 %v4137_v47, %v5285_v18 }
 0x2ee   : > { %v1691_v8 = vunpack.c.l.b16 %v1457_v10  ;;  %v1460_v37 = vpack.c.bf16 %v1428_v60, %v1428_v60 }
 0x2f0   : > { %v4139_v25 = vpop.eup %4138  ;;  %v1727_v7 = vunpack.c.l.b16 %v1460_v37 }
 0x2f1   : > { %v4141_v51 = vpop.eup %4140  ;;  %v1365_v43 = vpop.xlane.xlu0 %1364  ;;  %v1424_v20 = vmul.f32 %v4139_v25, %v5303_v31 }
 0x2f2   : > { %v4143_v27 = vpop.eup %4142  ;;  %4144 = vrcp.f32 %v1365_v43  ;;  %v1281_v40 = vpop.xlane.xlu1 %1280  ;;  %v1420_v33 = vmul.f32 %v4141_v51, %v5301_v13 }
 0x2f3   : > { %v1421_v55 = vmul.f32 %v4143_v27, %v5299_v21  ;;  %v1456_v52 = vpack.c.bf16 %v1424_v20, %v1424_v20  ;;  %4146 = vrcp.f32 %v1281_v40  ;;  %v1320_v38 = vpop.xlane.xlu2 %1319 }
 0x2f4   : > { %v1452_v56 = vpack.c.bf16 %v1420_v33, %v1420_v33 }
 0x2f5   : > { %v1453_v58 = vpack.c.bf16 %v1421_v55, %v1421_v55  ;;  %v1690_v22 = vunpack.c.l.b16 %v1456_v52 }
 0x2f6   : > { %v1653_v1 = vunpack.c.l.b16 %v1452_v56 }
 0x2f7   : > { %v1654_v48 = vunpack.c.l.b16 %v1453_v58  ;;  %v1693_v17 = vpack.c.b16 %v1691_v8, %v1690_v22 }
 0x2f8   : > { %v4145_v31 = vpop.eup %4144 }
 0x2f9   : > { %v1278_v23 = vpop.xlane.xlu0 %1277  ;;  %v1656_v2 = vpack.c.b16 %v1654_v48, %v1653_v1  ;;  %3440 = vmatmul.msk.bf16.gmra.mxu2 %vm803_vm0, %v1693_v17  ;;  %v1429_v13 = vmul.f32 %v4145_v31, %v5317_v41  ;;  %v4147_v21 = vpop.eup %4146 }
 0x2fa   : > { %4148 = vrcp.f32 %v1278_v23  ;;  %v1401_v18 = vmul.f32 %v4147_v21, %v5319_v15  ;;  %v1326_v42 = vpop.xlane.xlu1 %1325  ;;  %v3749_v21 = vld [vmem:[%s4857_s15 + $0x38] sm:$0xff] }
 0x2fb   : > { %3438 = vmatmul.msk.bf16.gmra.mxu1 %vm803_vm0, %v1656_v2  ;;  %v1461_v62 = vpack.c.bf16 %v1429_v13, %v1429_v13  ;;  %1952 = vmatpush.bf16.msrb.mxu0 %v3749_v21 }
 0x2fc   : > { %v1433_v11 = vpack.c.bf16 %v1401_v18, %v1401_v18 }
 0x2fd   : > { %v1728_v3 = vunpack.c.l.b16 %v1461_v62 }
 0x2fe   : > { %v1469_v44 = vunpack.c.l.b16 %v1433_v11  ;;  %v3746_v11 = vld [vmem:[%s4857_s15 + $0x20] sm:$0xff] }
 0x2ff   : > { %v1730_v61 = vpack.c.b16 %v1728_v3, %v1727_v7  ;;  %v3748_v7 = vld [vmem:[%s4857_s15 + $0x30] sm:$0xff] }
 0x300   : > { %v4149_v4 = vpop.eup %4148  ;;  %1953 = vmatpush.bf16.msrb.mxu0 %v3748_v7 }
 0x301   : > { %v1323_v53 = vpop.xlane.xlu0 %1322  ;;  %3442 = vmatmul.msk.bf16.gmra.mxu3 %vm803_vm0, %v1730_v61  ;;  %v1400_v5 = vmul.f32 %v4149_v4, %v5329_v54  ;;  %v3747_v4 = vld [vmem:[%s4857_s15 + $0x28] sm:$0xff] }
 0x302   : > { %4150 = vrcp.f32 %v1323_v53 }
 0x303   : > { %v1432_v41 = vpack.c.bf16 %v1400_v5, %v1400_v5  ;;  %4152 = vrcp.f32 %v1320_v38 }
 0x304   : > { %4154 = vrcp.f32 %v1326_v42  ;;  %1954 = vmatpush.bf16.msrb.mxu0 %v3747_v4 }
 0x305   : > { %v1468_v29 = vunpack.c.l.b16 %v1432_v41  ;;  %v3745_v41 = vld [vmem:[%s4857_s15 + $0x18] sm:$0xff] }
 0x307   : > { %v1471_v16 = vpack.c.b16 %v1469_v44, %v1468_v29  ;;  %v3744_v29 = vld [vmem:[%s4857_s15 + $0x10] sm:$0xff]  ;;  %v3743_v44 = vld [vmem:[%s4857_s15 + $0x8] sm:$0xff] }
 0x308   : > { %v4151_v19 = vpop.eup %4150  ;;  %1955 = vmatpush.bf16.msrb.mxu0 %v3746_v11 }
 0x309   : > { %3428 = vmatmul.msk.bf16.gmra.mxu0 %vm803_vm0, %v1471_v16  ;;  %v4153_v35 = vpop.eup %4152  ;;  %v1415_v15 = vmul.f32 %v4151_v19, %v5337_v50  ;;  %v3742_v16 = vld [vmem:[%s4857_s15] sm:$0xff] }
 0x30a   : > { %v1414_v57 = vmul.f32 %v4153_v35, %v5315_v49  ;;  %v4155_v51 = vpop.eup %4154 }
 0x30b   : > { %v1447_v46 = vpack.c.bf16 %v1415_v15, %v1415_v15  ;;  %v1416_v40 = vmul.f32 %v4155_v51, %v5331_v32 }
 0x30c   : > { %v1446_v45 = vpack.c.bf16 %v1414_v57, %v1414_v57  ;;  %1956 = vmatpush.bf16.msrb.mxu0 %v3745_v41 }
 0x30d   : > { %v1615_v0 = vunpack.c.l.b16 %v1447_v46  ;;  %v1448_v56 = vpack.c.bf16 %v1416_v40, %v1416_v40 }
 0x30e   : > { %v1614_v6 = vunpack.c.l.b16 %v1446_v45 }
 0x30f   : > { %v1616_v1 = vunpack.c.l.b16 %v1448_v56 }
 0x310   : > { %v1618_v54 = vpack.c.b16 %v1615_v0, %v1614_v6  ;;  %1957 = vmatpush.bf16.msrb.mxu0 %v3744_v29 }
 0x314   : > { %1958 = vmatpush.bf16.msrb.mxu0 %v3743_v44 }
 0x318   : > { %1959 = vmatpush.bf16.msrb.mxu0 %v3742_v16 }
 0x319   : > { %3435 = vmatmul.msk.bf16.vlgmr.msra.gmra.mxu0 %vm803_vm0, %v1618_v54 }
 0x332   : > { %v1600_v12 = vpop.f32.mrf.mxu3 }
 0x337   : > { %v1526_v59 = vpop.f32.mrf.mxu1 }
 0x33a   : > { %v1602_v36 = vpop.f32.mrf.mxu3 }
 0x33b   : > { %v3974_v34 = vpack.i.bf16 %v1602_v36, %v1600_v12 }
 0x33d   : > { %3975 = vrot.lane.b32.xlu2 %v3974_v34, %s4554_s21 }
 0x33f   : > { %v1528_v63 = vpop.f32.mrf.mxu1 }
 0x340   : > { %v3964_v24 = vpack.i.bf16 %v1528_v63, %v1526_v59 }
 0x342   : > { %3965 = vrot.lane.b32.xlu0 %v3964_v24, %s4553_s5 }
 0x345   : > { %v1563_v50 = vpop.f32.mrf.mxu2 }
 0x34d   : > { %v1565_v30 = vpop.f32.mrf.mxu2 }
 0x34e   : > { %v3969_v49 = vpack.i.bf16 %v1565_v30, %v1563_v50  ;;  %v1531_v28 = vpop.f32.mrf.mxu1 }
 0x350   : > { %3970 = vrot.lane.b32.xlu1 %v3969_v49, %s4552_s2 }
 0x355   : > { %v1568_v14 = vpop.f32.mrf.mxu2  ;;  %v1605_v26 = vpop.f32.mrf.mxu3 }
 0x356   : > { %v1533_v39 = vpop.f32.mrf.mxu1 }
 0x357   : > { %v3979_v47 = vpack.i.bf16 %v1533_v39, %v1531_v28 }
 0x359   : > { %3980 = vrot.lane.b32.xlu0 %v3979_v47, %s4553_s5 }
 0x35b   : > { %v1329_v25 = vpop.xlane.xlu2 %1328 }
 0x35c   : > { %4156 = vrcp.f32 %v1329_v25 }
 0x35d   : > { %v1570_v43 = vpop.f32.mrf.mxu2  ;;  %v1607_v20 = vpop.f32.mrf.mxu3 }
 0x35e   : > { %v3984_v10 = vpack.i.bf16 %v1570_v43, %v1568_v14  ;;  %v1674_v27 = vpop.f32.mrf.mxu1  ;;  %v3989_v33 = vpack.i.bf16 %v1607_v20, %v1605_v26 }
 0x360   : > { %3985 = vrot.lane.b32.xlu1 %v3984_v10, %s4552_s2 }
 0x361   : > { %3990 = vrot.lane.b32.xlu0 %v3989_v33, %s4554_s21 }
 0x362   : > { %v4157_v55 = vpop.eup %4156 }
 0x363   : > { %v1417_v52 = vmul.f32 %v4157_v55, %v5371_v9 }
 0x365   : > { %v1449_v58 = vpack.c.bf16 %v1417_v52, %v1417_v52  ;;  %v1748_v22 = vpop.f32.mrf.mxu3 }
 0x366   : > { %v1676_v60 = vpop.f32.mrf.mxu1 }
 0x367   : > { %v1711_v8 = vpop.f32.mrf.mxu2  ;;  %v1617_v48 = vunpack.c.l.b16 %v1449_v58  ;;  %v3994_v17 = vpack.i.bf16 %v1676_v60, %v1674_v27  ;;  %v1489_v19 = vpop.f32.mrf.mxu0 }
 0x369   : > { %v1619_v31 = vpack.c.b16 %v1617_v48, %v1616_v1  ;;  %3995 = vrot.lane.b32.xlu2 %v3994_v17, %s4553_s5 }
 0x36b   : > { %3436 = vmatmul.msk.bf16.gmra.mxu0 %vm803_vm0, %v1619_v31 }
 0x36d   : > { %v1750_v32 = vpop.f32.mrf.mxu3 }
 0x36e   : > { %v4004_v2 = vpack.i.bf16 %v1750_v32, %v1748_v22 }
 0x36f   : > { %v1713_v23 = vpop.f32.mrf.mxu2  ;;  %v1491_v15 = vpop.f32.mrf.mxu0 }
 0x370   : > { %v3999_v9 = vpack.i.bf16 %v1713_v23, %v1711_v8  ;;  %4005 = vrot.lane.b32.xlu0 %v4004_v2, %s4554_s21 }
 0x372   : > { %4000 = vrot.lane.b32.xlu1 %v3999_v9, %s4552_s2 }
 0x378   : > { %v1679_v13 = vpop.f32.mrf.mxu1 }
 0x37c   : > { %v1716_v37 = vpop.f32.mrf.mxu2 }
 0x380   : > { %v1681_v62 = vpop.f32.mrf.mxu1 }
 0x381   : > { %v4009_v3 = vpack.i.bf16 %v1681_v62, %v1679_v13 }
 0x383   : > { %4010 = vrot.lane.b32.xlu2 %v4009_v3, %s4553_s5 }
 0x384   : > { %v1718_v18 = vpop.f32.mrf.mxu2  ;;  %v1753_v61 = vpop.f32.mrf.mxu3 }
 0x385   : > { %v4014_v38 = vpack.i.bf16 %v1718_v18, %v1716_v37 }
 0x386   : > { %v1494_v50 = vpop.f32.mrf.mxu0 }
 0x387   : > { %4015 = vrot.lane.b32.xlu1 %v4014_v38, %s4552_s2  ;;  %s3140_s2 = sshll.u32 %s4903_s22, 4  ;;  %s3141_s2 = int_to_ptr.vmem [resolvable:$true] %s3140_s2 }
 0x38c   : > { %v1755_v53 = vpop.f32.mrf.mxu3 }
 0x38d   : > { %v4019_v5 = vpack.i.bf16 %v1755_v53, %v1753_v61 }
 0x38e   : > { %v1496_v14 = vpop.f32.mrf.mxu0 }
 0x38f   : > { %4020 = vrot.lane.b32.xlu0 %v4019_v5, %s4554_s21  ;;  %s3127_s21 = scalar_lea.sflag [#allocation4], %s4840_s3 }
 0x396   : > { %v1637_v22 = vpop.f32.mrf.mxu0 }
 0x397   : > { %v3976_v45 = vpop.permute.xlu2 %3975 }
 0x398   : > { %v3978_v12 = vunpack.i.h.bf16 %v3976_v45  ;;  %v3977_v59 = vunpack.i.l.bf16 %v3976_v45 }
 0x39e   : > { %v1639_v23 = vpop.f32.mrf.mxu0 }
 0x3b4   : > { %v3966_v35 = vpop.permute.xlu0 %3965 }
 0x3b5   : > { %v3968_v57 = vunpack.i.h.bf16 %v3966_v35  ;;  %v3967_v46 = vunpack.i.l.bf16 %v3966_v35 }
 0x3b7   : > { %v1806_v36 = vsel %vm803_vm0, %v1489_v19, %v3967_v46  ;;  %v1807_v34 = vsel %vm803_vm0, %v1491_v15, %v3968_v57 }
 0x3c2   : > { %v3971_v0 = vpop.permute.xlu1 %3970 }
 0x3c3   : > { %v3973_v6 = vunpack.i.h.bf16 %v3971_v0  ;;  %v3972_v54 = vunpack.i.l.bf16 %v3971_v0  ;;  %v3996_v8 = vpop.permute.xlu2 %3995 }
 0x3c4   : > { %v3998_v60 = vunpack.i.h.bf16 %v3996_v8  ;;  %v3997_v1 = vunpack.i.l.bf16 %v3996_v8  ;;  %v4555_v8 = vmov 128.0  }
 0x3c5   : > { %v1811_v63 = vsel %vm1810_vm1, %v1806_v36, %v3972_v54  ;;  %v1812_v24 = vsel %vm1810_vm1, %v1807_v34, %v3973_v6  ;;  %v4024_v54 = vld [vmem:[%s5970_s0] ss:$0 sm:$0xff]  ;;  %v4192_v36 = vld [vmem:[%s4903_s22] sm:$0xff]  ;;  %4158 = vrcp.f32 %v4555_v8  ;;  %v3772_v8 = vld [vmem:[%s4871_s24 + $0xac] sm:$0xf0] }
 0x3c6   : > { %v1816_v30 = vsel %vm1815_vm2, %v1811_v63, %v3977_v59  ;;  %v1817_v49 = vsel %vm1815_vm2, %v1812_v24, %v3978_v12  ;;  %v1869_v13 = vsel %vm803_vm0, %v1639_v23, %v3998_v60  ;;  %v1868_v37 = vsel %vm803_vm0, %v1637_v22, %v3997_v1 }
 0x3c7   : > { %v1880_v28 = vpack.c.bf16 %v1817_v49, %v1816_v30 }
 0x3c9   : > { %1960 = vmatmul.bf16.vlgmr.msrb.gmra.mxu0 %v1880_v28 }
 0x3cb   : > { %v3981_v42 = vpop.permute.xlu0 %3980  ;;  %v4159_v60 = vpop.eup %4158 }
 0x3cc   : > { %v3983_v26 = vunpack.i.h.bf16 %v3981_v42  ;;  %v3982_v39 = vunpack.i.l.bf16 %v3981_v42  ;;  %v4194_v42 = vld [vmem:[%s4903_s22 + $0x10] sm:$0xff]  ;;  %v2006_v1 = vmul.f32 128.0, %v4159_v60  ;;  %vm2010_vm3 = vweird.f32 %v4159_v60 }
 0x3ce   : > { %v1808_v20 = vsel %vm803_vm0, %v1494_v50, %v3982_v39  ;;  %v1809_v10 = vsel %vm803_vm0, %v1496_v14, %v3983_v26  ;;  %v4193_v50 = vld [vmem:[%s4903_s22 + $0x8] sm:$0xff] }
 0x3d2   : > { %v3986_v47 = vpop.permute.xlu1 %3985 }
 0x3d3   : > { %v3988_v25 = vunpack.i.h.bf16 %v3986_v47  ;;  %v3987_v51 = vunpack.i.l.bf16 %v3986_v47  ;;  %v3991_v43 = vpop.permute.xlu0 %3990  ;;  %v4195_v47 = vld [vmem:[%s4903_s22 + $0x18] sm:$0xff] }
 0x3d4   : > { %v3993_v27 = vunpack.i.h.bf16 %v3991_v43  ;;  %v3992_v40 = vunpack.i.l.bf16 %v3991_v43 }
 0x3d5   : > { %v1813_v33 = vsel %vm1810_vm1, %v1808_v20, %v3987_v51  ;;  %v1814_v55 = vsel %vm1810_vm1, %v1809_v10, %v3988_v25  ;;  %v4196_v20 = vld [vmem:[%s4903_s22 + $0x20] sm:$0xff] }
 0x3d6   : > { %v1818_v52 = vsel %vm1815_vm2, %v1813_v33, %v3992_v40  ;;  %v1819_v56 = vsel %vm1815_vm2, %v1814_v55, %v3993_v27  ;;  %v4197_v33 = vld [vmem:[%s4903_s22 + $0x28] sm:$0xff] }
 0x3d7   : > { %v1881_v58 = vpack.c.bf16 %v1819_v56, %v1818_v52 }
 0x3d9   : > { %1965 = vmatmul.bf16.gmra.mxu0 %v1881_v58  ;;  %v4198_v58 = vld [vmem:[%s4903_s22 + $0x30] sm:$0xff] }
 0x3dd   : > { %v4011_v38 = vpop.permute.xlu2 %4010 }
 0x3de   : > { %v4013_v41 = vunpack.i.h.bf16 %v4011_v38  ;;  %v4012_v29 = vunpack.i.l.bf16 %v4011_v38 }
 0x3e2   : > { %v4006_v48 = vpop.permute.xlu0 %4005 }
 0x3e3   : > { %v4008_v17 = vunpack.i.h.bf16 %v4006_v48  ;;  %v4007_v31 = vunpack.i.l.bf16 %v4006_v48  ;;  %v2007_v48 = vsub.f32 1.0, %v2006_v1 }
 0x3e4   : > { %v4001_v32 = vpop.permute.xlu1 %4000 }
 0x3e5   : > { %v4003_v2 = vunpack.i.h.bf16 %v4001_v32  ;;  %v4002_v9 = vunpack.i.l.bf16 %v4001_v32 }
 0x3e7   : > { %v1872_v21 = vsel %vm1810_vm1, %v1868_v37, %v4002_v9  ;;  %v1873_v62 = vsel %vm1810_vm1, %v1869_v13, %v4003_v2 }
 0x3e8   : > { %v1876_v7 = vsel %vm1815_vm2, %v1872_v21, %v4007_v31  ;;  %v1877_v3 = vsel %vm1815_vm2, %v1873_v62, %v4008_v17  ;;  %v1642_v61 = vpop.f32.mrf.mxu0  ;;  %v2008_v17 = vmul.f32 %v4159_v60, %v2007_v48  ;;  %v3559_v48 = vld [vmem:[%s4871_s24 + $0xb0] sm:$0xf0] }
 0x3e9   : > { %v1882_v18 = vpack.c.bf16 %v1877_v3, %v1876_v7  ;;  %v1870_v16 = vsel %vm803_vm0, %v1642_v61, %v4012_v29  ;;  %v4199_v61 = vld [vmem:[%s4903_s22 + $0x38] sm:$0xff] }
 0x3ea   : > { %v2009_v31 = vadd.f32 %v4159_v60, %v2008_v17  ;;  %v3565_v17 = vld [vmem:[%s4871_s24 + $0xa8] sm:$0xf] }
 0x3eb   : > { %1970 = vmatmul.bf16.gmra.mxu0 %v1882_v18 }
 0x3ec   : > { %v5447_v32 = vsel %vm2010_vm3, %v4159_v60, %v2009_v31  ;;  %v3770_v60 = vld [vmem:[%s4871_s24 + $0xa4] sm:$0xf]  ;;  %v3773_v31 = vld [vmem:[%s4871_s24 + $0xb4] sm:$0xf0] }
 0x3f0   : > { %v1644_v53 = vpop.f32.mrf.mxu0 }
 0x3f1   : > { %v1871_v19 = vsel %vm803_vm0, %v1644_v53, %v4013_v41 }
 0x3f9   : > { %v4016_v4 = vpop.permute.xlu1 %4015 }
 0x3fa   : > { %v4018_v5 = vunpack.i.h.bf16 %v4016_v4  ;;  %v4017_v11 = vunpack.i.l.bf16 %v4016_v4 }
 0x3fc   : > { %v1874_v57 = vsel %vm1810_vm1, %v1870_v16, %v4017_v11  ;;  %v1875_v46 = vsel %vm1810_vm1, %v1871_v19, %v4018_v5 }
 0x401   : > { %v4021_v44 = vpop.permute.xlu0 %4020 }
 0x402   : > { %v4023_v35 = vunpack.i.h.bf16 %v4021_v44  ;;  %v4022_v15 = vunpack.i.l.bf16 %v4021_v44 }
 0x404   : > { %v1878_v45 = vsel %vm1815_vm2, %v1874_v57, %v4022_v15  ;;  %v1879_v0 = vsel %vm1815_vm2, %v1875_v46, %v4023_v35 }
 0x405   : > { %v1883_v6 = vpack.c.bf16 %v1879_v0, %v1878_v45 }
 0x407   : > { %1975 = vmatmul.bf16.gmra.mxu0 %v1883_v6 }
 0x446   : > { %v1961_v12 = vpop.f32.mrf.mxu0 }
 0x447   : > { %v1962_v59 = vadd.f32 %v4024_v54, %v1961_v12 }
 0x449   : > { %v1981_v34 = vadd.f32 %v4192_v36, %v1962_v59 }
 0x44b   : > { %1989 = vadd.xlane.f32.xlu2 %v1981_v34 }
 0x44e   : > { %v1963_v63 = vpop.f32.mrf.mxu0 }
 0x44f   : > { %v1964_v24 = vadd.f32 %v4024_v54, %v1963_v63  ;;  %v3780_v63 = vld [vmem:[%s4871_s24 + $0xec] sm:$0xf0] }
 0x451   : > { %v1982_v30 = vadd.f32 %v4193_v50, %v1964_v24  ;;  %v3778_v24 = vld [vmem:[%s4871_s24 + $0xe4] sm:$0xf] }
 0x453   : > { %1991 = vadd.xlane.f32.xlu1 %v1982_v30 }
 0x456   : > { %v1966_v49 = vpop.f32.mrf.mxu0 }
 0x457   : > { %v1967_v28 = vadd.f32 %v4024_v54, %v1966_v49  ;;  %v3597_v49 = vld [vmem:[%s4871_s24 + $0xe8] sm:$0xf] }
 0x459   : > { %v1983_v14 = vadd.f32 %v4194_v42, %v1967_v28  ;;  %v3781_v28 = vld [vmem:[%s4871_s24 + $0xf4] sm:$0xf0] }
 0x45b   : > { %1993 = vadd.xlane.f32.xlu0 %v1983_v14 }
 0x45e   : > { %v1968_v26 = vpop.f32.mrf.mxu0 }
 0x45f   : > { %v1969_v39 = vadd.f32 %v4024_v54, %v1968_v26  ;;  %v3779_v26 = vld [vmem:[%s4871_s24 + $0xec] sm:$0xf] }
 0x461   : > { %v1984_v25 = vadd.f32 %v4195_v47, %v1969_v39  ;;  %v3599_v39 = vld [vmem:[%s4871_s24 + $0xf8] sm:$0xf0] }
 0x462   : > { %v3602_v47 = vor.u32 %v3779_v26, %v3599_v39  ;;  %v3511_v26 = vld [vmem:[%s4871_s24 + $0x50] sm:$0xf0]  ;;  %v3517_v39 = vld [vmem:[%s4871_s24 + $0x48] sm:$0xf] }
 0x463   : > { %1995 = vadd.xlane.f32.xlu2 %v1984_v25 }
 0x464   : > { %2473 = vmatpush.bf16.msra.mxu0 %v3602_v47  ;;  %v3761_v47 = vld [vmem:[%s4871_s24 + $0x54] sm:$0xf0] }
 0x468   : > { %v1971_v51 = vpop.f32.mrf.mxu0 }
 0x469   : > { %v1972_v43 = vadd.f32 %v4024_v54, %v1971_v51  ;;  %v3776_v51 = vld [vmem:[%s4871_s24 + $0xcc] sm:$0xf0] }
 0x46b   : > { %v1985_v10 = vadd.f32 %v4196_v20, %v1972_v43  ;;  %v3774_v43 = vld [vmem:[%s4871_s24 + $0xc4] sm:$0xf] }
 0x46d   : > { %1997 = vadd.xlane.f32.xlu1 %v1985_v10 }
 0x470   : > { %v1973_v27 = vpop.f32.mrf.mxu0 }
 0x471   : > { %v1974_v40 = vadd.f32 %v4024_v54, %v1973_v27  ;;  %v3581_v27 = vld [vmem:[%s4871_s24 + $0xc8] sm:$0xf] }
 0x473   : > { %v1986_v55 = vadd.f32 %v4197_v33, %v1974_v40  ;;  %v3777_v40 = vld [vmem:[%s4871_s24 + $0xd4] sm:$0xf0] }
 0x475   : > { %1999 = vadd.xlane.f32.xlu0 %v1986_v55 }
 0x484   : > { %v1976_v52 = vpop.f32.mrf.mxu0 }
 0x485   : > { %v1977_v56 = vadd.f32 %v4024_v54, %v1976_v52  ;;  %v3775_v52 = vld [vmem:[%s4871_s24 + $0xcc] sm:$0xf] }
 0x487   : > { %v1987_v22 = vadd.f32 %v4198_v58, %v1977_v56  ;;  %v3583_v56 = vld [vmem:[%s4871_s24 + $0xd8] sm:$0xf0] }
 0x488   : > { %v3586_v58 = vor.u32 %v3775_v52, %v3583_v56  ;;  %v3495_v52 = vld [vmem:[%s4871_s24 + $0x30] sm:$0xf0]  ;;  %v3501_v56 = vld [vmem:[%s4871_s24 + $0x28] sm:$0xf] }
 0x489   : > { %2001 = vadd.xlane.f32.xlu0 %v1987_v22 }
 0x48a   : > { %2474 = vmatpush.bf16.msra.mxu0 %v3586_v58  ;;  %v3757_v58 = vld [vmem:[%s4871_s24 + $0x34] sm:$0xf0] }
 0x48c   : > { %v1978_v37 = vpop.f32.mrf.mxu0 }
 0x48d   : > { %v1979_v62 = vadd.f32 %v4024_v54, %v1978_v37  ;;  %v3567_v37 = vld [vmem:[%s4871_s24 + $0xb8] sm:$0xf0] }
 0x48f   : > { %v5460_v4 = vadd.f32 %v4199_v61, %v1979_v62  ;;  %v3541_v62 = vld [vmem:[%s4871_s24 + $0x80] sm:$0xf] }
 0x4be   : > { %v1990_v23 = vpop.xlane.xlu2 %1989 }
 0x4bf   : > { %v2012_v2 = vmul.f32 %v5447_v32, %v1990_v23  ;;  %v3562_v23 = vor.u32 %v3770_v60, %v3559_v48  ;;  %v3502_v60 = vor.u32 %v3757_v58, %v3501_v56  ;;  %v3503_v48 = vld [vmem:[%s4871_s24 + $0x38] sm:$0xf0] }
 0x4c1   : > { %v5450_v9 = vsub.f32 %v1981_v34, %v2012_v2  ;;  %v3589_v34 = vld [vmem:[%s4871_s24 + $0xe0] sm:$0xf]  ;;  %v3566_v2 = vor.u32 %v3773_v31, %v3565_v17 }
 0x4c2   : > { %v3590_v50 = vor.u32 %v3780_v63, %v3589_v34 }
 0x4c3   : > { %v2028_v13 = vmul.f32 %v5450_v9, %v5450_v9 }
 0x4c4   : > { %2386 = vmatpush.bf16.msrb.mxu1 %v3590_v50  ;;  %v3535_v50 = vld [vmem:[%s4871_s24 + $0x78] sm:$0xf0] }
 0x4c5   : > { %2036 = vadd.xlane.f32.xlu2 %v2028_v13  ;;  %v3771_v13 = vld [vmem:[%s4871_s24 + $0xac] sm:$0xf] }
 0x4c6   : > { %v1992_v21 = vpop.xlane.xlu1 %1991 }
 0x4c7   : > { %v2013_v7 = vmul.f32 %v5447_v32, %v1992_v21  ;;  %v3570_v21 = vor.u32 %v3771_v13, %v3567_v37  ;;  %v3750_v13 = vld [vmem:[%s4871_s24 + $0x4] sm:$0xf] }
 0x4c9   : > { %v5455_v3 = vsub.f32 %v1982_v30, %v2013_v7  ;;  %v3591_v30 = vld [vmem:[%s4871_s24 + $0xf0] sm:$0xf0]  ;;  %v3768_v7 = vld [vmem:[%s4871_s24 + $0x8c] sm:$0xf0]  ;;  %2475 = vmatpush.bf16.msra.mxu0 %v3570_v21 }
 0x4ca   : > { %v3594_v42 = vor.u32 %v3778_v24, %v3591_v30  ;;  %v3542_v61 = vor.u32 %v3768_v7, %v3541_v62  ;;  %v3763_v24 = vld [vmem:[%s4871_s24 + $0x6c] sm:$0xf]  ;;  %v3479_v62 = vld [vmem:[%s4871_s24 + $0x10] sm:$0xf0]  ;;  %v3485_v7 = vld [vmem:[%s4871_s24 + $0x8] sm:$0xf] }
 0x4cb   : > { %v2029_v18 = vmul.f32 %v5455_v3, %v5455_v3  ;;  %v3538_v30 = vor.u32 %v3763_v24, %v3535_v50 }
 0x4cc   : > { %2415 = vmatpush.bf16.msrb.mxu2 %v3594_v42  ;;  %v3758_v42 = vld [vmem:[%s4871_s24 + $0x44] sm:$0xf] }
 0x4cd   : > { %2038 = vadd.xlane.f32.xlu1 %v2029_v18  ;;  %2003 = vadd.xlane.f32.xlu2 %v5460_v4  ;;  %v3766_v18 = vld [vmem:[%s4871_s24 + $0x84] sm:$0xf] }
 0x4ce   : > { %v1994_v38 = vpop.xlane.xlu0 %1993 }
 0x4cf   : > { %v2014_v53 = vmul.f32 %v5447_v32, %v1994_v38  ;;  %v3543_v38 = vld [vmem:[%s4871_s24 + $0x90] sm:$0xf0] }
 0x4d1   : > { %v5464_v5 = vsub.f32 %v1983_v14, %v2014_v53  ;;  %v3598_v14 = vor.u32 %v3781_v28, %v3597_v49  ;;  %v3549_v53 = vld [vmem:[%s4871_s24 + $0x88] sm:$0xf]  ;;  %v3509_v49 = vld [vmem:[%s4871_s24 + $0x40] sm:$0xf]  ;;  %v3760_v28 = vld [vmem:[%s4871_s24 + $0x4c] sm:$0xf0] }
 0x4d3   : > { %v2030_v11 = vmul.f32 %v5464_v5, %v5464_v5  ;;  %2444 = vmatpush.bf16.msrb.mxu3 %v3598_v14  ;;  %v3510_v14 = vor.u32 %v3760_v28, %v3509_v49 }
 0x4d5   : > { %2040 = vadd.xlane.f32.xlu1 %v2030_v11  ;;  %v3769_v11 = vld [vmem:[%s4871_s24 + $0x94] sm:$0xf0] }
 0x4d6   : > { %v1996_v41 = vpop.xlane.xlu2 %1995 }
 0x4d7   : > { %v2015_v29 = vmul.f32 %v5447_v32, %v1996_v41  ;;  %v3546_v41 = vor.u32 %v3766_v18, %v3543_v38  ;;  %v3482_v18 = vor.u32 %v3750_v13, %v3479_v62  ;;  %v3751_v38 = vld [vmem:[%s4871_s24 + $0xc] sm:$0xf] }
 0x4d9   : > { %v5469_v44 = vsub.f32 %v1984_v25, %v2015_v29  ;;  %v3573_v25 = vld [vmem:[%s4871_s24 + $0xc0] sm:$0xf]  ;;  %v3550_v29 = vor.u32 %v3769_v11, %v3549_v53  ;;  %v3487_v53 = vld [vmem:[%s4871_s24 + $0x18] sm:$0xf0] }
 0x4da   : > { %v3574_v20 = vor.u32 %v3776_v51, %v3573_v25  ;;  %v3514_v25 = vor.u32 %v3758_v42, %v3511_v26  ;;  %v3518_v51 = vor.u32 %v3761_v47, %v3517_v39 }
 0x4db   : > { %v2031_v16 = vmul.f32 %v5469_v44, %v5469_v44 }
 0x4dc   : > { %2387 = vmatpush.bf16.msrb.mxu1 %v3574_v20  ;;  %v3519_v20 = vld [vmem:[%s4871_s24 + $0x58] sm:$0xf0] }
 0x4dd   : > { %2042 = vadd.xlane.f32.xlu0 %v2031_v16  ;;  %v3767_v16 = vld [vmem:[%s4871_s24 + $0x8c] sm:$0xf] }
 0x4e0   : > { %v1998_v19 = vpop.xlane.xlu1 %1997 }
 0x4e1   : > { %v2016_v35 = vmul.f32 %v5447_v32, %v1998_v19  ;;  %v3551_v19 = vld [vmem:[%s4871_s24 + $0x98] sm:$0xf0] }
 0x4e3   : > { %v5474_v15 = vsub.f32 %v1985_v10, %v2016_v35  ;;  %v3575_v10 = vld [vmem:[%s4871_s24 + $0xd0] sm:$0xf0]  ;;  %v3554_v35 = vor.u32 %v3767_v16, %v3551_v19 }
 0x4e4   : > { %v3578_v33 = vor.u32 %v3774_v43, %v3575_v10  ;;  %v3759_v43 = vld [vmem:[%s4871_s24 + $0x4c] sm:$0xf] }
 0x4e5   : > { %v2032_v57 = vmul.f32 %v5474_v15, %v5474_v15  ;;  %2476 = vmatpush.bf16.msra.mxu0 %v3554_v35  ;;  %v3522_v10 = vor.u32 %v3759_v43, %v3519_v20  ;;  %v5568_v20 = vld [vmem:[%s693_s11] ss:$0 sm:$0xff] }
 0x4e6   : > { %2416 = vmatpush.bf16.msrb.mxu2 %v3578_v33  ;;  %v3754_v33 = vld [vmem:[%s4871_s24 + $0x24] sm:$0xf] }
 0x4e7   : > { %2044 = vadd.xlane.f32.xlu2 %v2032_v57  ;;  %v3525_v57 = vld [vmem:[%s4871_s24 + $0x60] sm:$0xf] }
 0x4e8   : > { %v2000_v46 = vpop.xlane.xlu0 %1999 }
 0x4e9   : > { %v2017_v45 = vmul.f32 %v5447_v32, %v2000_v46  ;;  %v3764_v46 = vld [vmem:[%s4871_s24 + $0x6c] sm:$0xf0]  ;;  %2477 = vmatpush.bf16.msra.mxu0 %v3538_v30 }
 0x4ea   : > { %2417 = vmatpush.bf16.msrb.mxu2 %v3562_v23  ;;  %v3477_v23 = vld [vmem:[%s4871_s24] sm:$0xf] }
 0x4eb   : > { %v5479_v0 = vsub.f32 %v1986_v55, %v2017_v45  ;;  %v3582_v55 = vor.u32 %v3777_v40, %v3581_v27  ;;  %v3762_v45 = vld [vmem:[%s4871_s24 + $0x64] sm:$0xf]  ;;  %v3493_v27 = vld [vmem:[%s4871_s24 + $0x20] sm:$0xf]  ;;  %v3756_v40 = vld [vmem:[%s4871_s24 + $0x2c] sm:$0xf0] }
 0x4ed   : > { %v2033_v6 = vmul.f32 %v5479_v0, %v5479_v0  ;;  %2445 = vmatpush.bf16.msrb.mxu3 %v3582_v55  ;;  %2478 = vmatpush.bf16.msra.mxu0 %v3522_v10  ;;  %v3494_v55 = vor.u32 %v3756_v40, %v3493_v27 }
 0x4ee   : > { %2418 = vmatpush.bf16.msrb.mxu2 %v3546_v41  ;;  %v3490_v41 = vor.u32 %v3751_v38, %v3487_v53 }
 0x4ef   : > { %2046 = vadd.xlane.f32.xlu1 %v2033_v6  ;;  %v3526_v6 = vor.u32 %v3764_v46, %v3525_v57 }
 0x4f1   : > { %2446 = vmatpush.bf16.msrb.mxu3 %v3566_v2  ;;  %v3752_v2 = vld [vmem:[%s4871_s24 + $0xc] sm:$0xf0] }
 0x4f2   : > { %v3478_v21 = vor.u32 %v3752_v2, %v3477_v23 }
 0x4f5   : > { %2447 = vmatpush.bf16.msrb.mxu3 %v3550_v29 }
 0x4fc   : > { %v2002_v54 = vpop.xlane.xlu0 %2001 }
 0x4fd   : > { %v2018_v12 = vmul.f32 %v5447_v32, %v2002_v54  ;;  %v3527_v54 = vld [vmem:[%s4871_s24 + $0x70] sm:$0xf0] }
 0x4fe   : > { %v3530_v34 = vor.u32 %v3762_v45, %v3527_v54 }
 0x4ff   : > { %v5484_v59 = vsub.f32 %v1987_v22, %v2018_v12  ;;  %v3557_v22 = vld [vmem:[%s4871_s24 + $0xa0] sm:$0xf]  ;;  %v3533_v12 = vld [vmem:[%s4871_s24 + $0x68] sm:$0xf] }
 0x500   : > { %v3558_v1 = vor.u32 %v3772_v8, %v3557_v22  ;;  %2419 = vmatpush.bf16.msrb.mxu2 %v3530_v34  ;;  %v3498_v8 = vor.u32 %v3754_v33, %v3495_v52 }
 0x501   : > { %v2034_v36 = vmul.f32 %v5484_v59, %v5484_v59 }
 0x502   : > { %2388 = vmatpush.bf16.msrb.mxu1 %v3558_v1  ;;  %v3755_v1 = vld [vmem:[%s4871_s24 + $0x2c] sm:$0xf] }
 0x503   : > { %2048 = vadd.xlane.f32.xlu0 %v2034_v36  ;;  %v3765_v36 = vld [vmem:[%s4871_s24 + $0x74] sm:$0xf0]  ;;  %v3506_v31 = vor.u32 %v3755_v1, %v3503_v48 }
 0x504   : > { %v3534_v63 = vor.u32 %v3765_v36, %v3533_v12  ;;  %2420 = vmatpush.bf16.msrb.mxu2 %v3514_v25 }
 0x505   : > { %2479 = vmatpush.bf16.msra.mxu0 %v3506_v31 }
 0x506   : > { %2389 = vmatpush.bf16.msrb.mxu1 %v3542_v61  ;;  %2448 = vmatpush.bf16.msrb.mxu3 %v3534_v63  ;;  %v3753_v61 = vld [vmem:[%s4871_s24 + $0x14] sm:$0xf0] }
 0x507   : > { %v3486_v11 = vor.u32 %v3753_v61, %v3485_v7 }
 0x508   : > { %2421 = vmatpush.bf16.msrb.mxu2 %v3498_v8 }
 0x509   : > { %2480 = vmatpush.bf16.msra.mxu0 %v3490_v41 }
 0x50a   : > { %2390 = vmatpush.bf16.msrb.mxu1 %v3526_v6  ;;  %2449 = vmatpush.bf16.msrb.mxu3 %v3518_v51 }
 0x50c   : > { %2422 = vmatpush.bf16.msrb.mxu2 %v3482_v18 }
 0x50e   : > { %2391 = vmatpush.bf16.msrb.mxu1 %v3510_v14  ;;  %2450 = vmatpush.bf16.msrb.mxu3 %v3502_v60 }
 0x512   : > { %2392 = vmatpush.bf16.msrb.mxu1 %v3494_v55  ;;  %2451 = vmatpush.bf16.msrb.mxu3 %v3486_v11 }
 0x516   : > { %2393 = vmatpush.bf16.msrb.mxu1 %v3478_v21 }
 0x538   : > { %v2037_v22 = vpop.xlane.xlu2 %2036 }
 0x539   : > { %v2052_v17 = vmul.f32 %v2037_v22, %v5447_v32 }
 0x53b   : > { %v2060_v37 = vadd.f32 1e-05, %v2052_v17 }
 0x53d   : > { %4160 = vrsqrt.f32 %v2060_v37  ;;  %vm2074_vm5 = vweird.f32 %v2060_v37 }
 0x540   : > { %v2039_v29 = vpop.xlane.xlu1 %2038  ;;  %v2004_v16 = vpop.xlane.xlu2 %2003 }
 0x541   : > { %v2053_v19 = vmul.f32 %v2039_v29, %v5447_v32  ;;  %v2019_v35 = vmul.f32 %v5447_v32, %v2004_v16 }
 0x543   : > { %v4161_v57 = vpop.eup %4160  ;;  %v2061_v46 = vadd.f32 1e-05, %v2053_v19  ;;  %v5556_v45 = vsub.f32 %v5460_v4, %v2019_v35 }
 0x544   : > { %v2069_v6 = vmul.f32 %v4161_v57, %v2060_v37  ;;  %vm2075_vm4 = vweird.f32 %v4161_v57 }
 0x545   : > { %4162 = vrsqrt.f32 %v2061_v46  ;;  %v2035_v54 = vmul.f32 %v5556_v45, %v5556_v45  ;;  %vm2076_vm6 = vmor %vm2074_vm5, %vm2075_vm4  ;;  %vm2084_vm8 = vweird.f32 %v2061_v46 }
 0x546   : > { %v2070_v12 = vmul.f32 %v4161_v57, %v2069_v6 }
 0x547   : > { %2050 = vadd.xlane.f32.xlu2 %v2035_v54 }
 0x548   : > { %v2071_v36 = vmul.f32 0.5, %v2070_v12  ;;  %v2041_v34 = vpop.xlane.xlu1 %2040 }
 0x549   : > { %v2054_v63 = vmul.f32 %v2041_v34, %v5447_v32 }
 0x54a   : > { %v2072_v24 = vsub.f32 1.5, %v2071_v36 }
 0x54b   : > { %v4163_v50 = vpop.eup %4162  ;;  %v2062_v30 = vadd.f32 1e-05, %v2054_v63 }
 0x54c   : > { %v2073_v49 = vmul.f32 %v4161_v57, %v2072_v24  ;;  %v2079_v28 = vmul.f32 %v4163_v50, %v2061_v46  ;;  %vm2085_vm7 = vweird.f32 %v4163_v50 }
 0x54d   : > { %4164 = vrsqrt.f32 %v2062_v30  ;;  %vm2086_vm9 = vmor %vm2084_vm8, %vm2085_vm7  ;;  %vm2094_vm11 = vweird.f32 %v2062_v30 }
 0x54e   : > { %v2080_v4 = vmul.f32 %v4163_v50, %v2079_v28  ;;  %v2077_v42 = vsel %vm2076_vm6, %v4161_v57, %v2073_v49 }
 0x54f   : > { %v2148_v51 = vmul.f32 %v2077_v42, %v5450_v9  ;;  %v5574_v9 = vld [vmem:[%s5972_s9] ss:$0 sm:$0xff] }
 0x550   : > { %v2081_v14 = vmul.f32 0.5, %v2080_v4  ;;  %v2043_v26 = vpop.xlane.xlu0 %2042 }
 0x551   : > { %v2055_v39 = vmul.f32 %v2043_v26, %v5447_v32  ;;  %v2160_v52 = vmul.f32 %v5568_v20, %v2148_v51 }
 0x552   : > { %v2082_v47 = vsub.f32 1.5, %v2081_v14 }
 0x553   : > { %v4165_v25 = vpop.eup %4164  ;;  %v2063_v43 = vadd.f32 1e-05, %v2055_v39  ;;  %v5579_v48 = vadd.f32 %v5574_v9, %v2160_v52  ;;  %v3787_v52 = vld [vmem:[%s4899_s25 + $0x28] sm:$0xff] }
 0x554   : > { %v2083_v10 = vmul.f32 %v4163_v50, %v2082_v47  ;;  %v2089_v27 = vmul.f32 %v4165_v25, %v2062_v30  ;;  %vm2095_vm10 = vweird.f32 %v4165_v25 }
 0x555   : > { %4166 = vrsqrt.f32 %v2063_v43  ;;  %vm2096_vm12 = vmor %vm2094_vm11, %vm2095_vm10  ;;  %vm2104_vm14 = vweird.f32 %v2063_v43 }
 0x556   : > { %v2087_v40 = vsel %vm2086_vm9, %v4163_v50, %v2083_v10  ;;  %v2090_v33 = vmul.f32 %v4165_v25, %v2089_v27  ;;  %v3813_v10 = vld [vmem:[%s4899_s25 + $0xf8] sm:$0xff]  ;;  %v3788_v27 = vld [vmem:[%s4899_s25 + $0x30] sm:$0xff] }
 0x557   : > { %v2149_v55 = vmul.f32 %v2087_v40, %v5455_v3  ;;  %2897 = vmatpush.bf16.msrb.mxu0 %v3813_v10  ;;  %v3812_v40 = vld [vmem:[%s4899_s25 + $0xf0] sm:$0xff] }
 0x558   : > { %v2091_v56 = vmul.f32 0.5, %v2090_v33  ;;  %v3797_v33 = vld [vmem:[%s4899_s25 + $0x78] sm:$0xff] }
 0x559   : > { %v2161_v22 = vmul.f32 %v5568_v20, %v2149_v55  ;;  %v3805_v55 = vld [vmem:[%s4899_s25 + $0xb8] sm:$0xff]  ;;  %2839 = vmatpush.bf16.msra.mxu2 %v3797_v33 }
 0x55a   : > { %v2045_v58 = vpop.xlane.xlu2 %2044  ;;  %v2092_v8 = vsub.f32 1.5, %v2091_v56  ;;  %v3811_v56 = vld [vmem:[%s4899_s25 + $0xe8] sm:$0xff]  ;;  %2868 = vmatpush.bf16.msra.mxu3 %v3805_v55 }
 0x55b   : > { %v2056_v60 = vmul.f32 %v2045_v58, %v5447_v32  ;;  %v4167_v1 = vpop.eup %4166  ;;  %v5582_v17 = vadd.f32 %v5574_v9, %v2161_v22  ;;  %2898 = vmatpush.bf16.msrb.mxu0 %v3812_v40  ;;  %v3796_v22 = vld [vmem:[%s4899_s25 + $0x70] sm:$0xff] }
 0x55c   : > { %v2093_v3 = vmul.f32 %v4165_v25, %v2092_v8  ;;  %v2099_v31 = vmul.f32 %v4167_v1, %v2063_v43  ;;  %vm2105_vm13 = vweird.f32 %v4167_v1  ;;  %v3789_v43 = vld [vmem:[%s4899_s25 + $0x38] sm:$0xff]  ;;  %v3804_v8 = vld [vmem:[%s4899_s25 + $0xb0] sm:$0xff] }
 0x55d   : > { %v2064_v23 = vadd.f32 1e-05, %v2056_v60  ;;  %v2180_v2 = vpack.c.bf16 %v5582_v17, %v5579_v48  ;;  %vm2106_vm15 = vmor %vm2104_vm14, %vm2105_vm13  ;;  %2810 = vmatpush.bf16.msra.mxu1 %v3789_v43  ;;  %v3786_v60 = vld [vmem:[%s4899_s25 + $0x20] sm:$0xff]  ;;  %2840 = vmatpush.bf16.msra.mxu2 %v3796_v22 }
 0x55e   : > { %v2100_v13 = vmul.f32 %v4167_v1, %v2099_v31  ;;  %v2097_v37 = vsel %vm2096_vm12, %v4165_v25, %v2093_v3  ;;  %2869 = vmatpush.bf16.msra.mxu3 %v3804_v8  ;;  %v3795_v31 = vld [vmem:[%s4899_s25 + $0x68] sm:$0xff] }
 0x55f   : > { %4168 = vrsqrt.f32 %v2064_v23  ;;  %2394 = vmatmul.bf16.vlgmr.msrb.gmra.mxu1 %v2180_v2  ;;  %2423 = vmatmul.bf16.vlgmr.msrb.gmra.mxu2 %v2180_v2  ;;  %v2150_v61 = vmul.f32 %v2097_v37, %v5464_v5  ;;  %vm2114_vm1 = vweird.f32 %v2064_v23 }
 0x560   : > { %v2101_v21 = vmul.f32 0.5, %v2100_v13  ;;  %2452 = vmatmul.bf16.vlgmr.msrb.gmra.mxu3 %v2180_v2  ;;  %2481 = vmatmul.bf16.vlgmr.msra.gmra.mxu0 %v2180_v2 }
 0x561   : > { %v2162_v35 = vmul.f32 %v5568_v20, %v2150_v61  ;;  %2811 = vmatpush.bf16.msra.mxu1 %v3788_v27  ;;  %2899 = vmatpush.bf16.msrb.mxu0 %v3811_v56  ;;  %v3802_v61 = vld [vmem:[%s4899_s25 + $0xa0] sm:$0xff]  ;;  %v2216_v27 = vld [vmem:[%s4873_s6] sm:$0xf] }
 0x562   : > { %v2047_v62 = vpop.xlane.xlu1 %2046  ;;  %v2102_v7 = vsub.f32 1.5, %v2101_v21  ;;  %2841 = vmatpush.bf16.msra.mxu2 %v3795_v31  ;;  %v3785_v21 = vld [vmem:[%s4899_s25 + $0x18] sm:$0xff]  ;;  %v5670_v33 = vperm.slane %v2216_v27, 0  ;;  %v5672_v55 = vperm.slane %v2216_v27, 3  ;;  %v5676_v22 = vperm.slane %v2216_v27, 1 }
 0x563   : > { %v2057_v18 = vmul.f32 %v2047_v62, %v5447_v32  ;;  %v5592_v54 = vadd.f32 %v5574_v9, %v2162_v35  ;;  %v3809_v62 = vld [vmem:[%s4899_s25 + $0xd8] sm:$0xff]  ;;  %v3807_v35 = vld [vmem:[%s4899_s25 + $0xc8] sm:$0xff] }
 0x564   : > { %v2103_v53 = vmul.f32 %v4167_v1, %v2102_v7 }
 0x565   : > { %v4169_v38 = vpop.eup %4168  ;;  %v2065_v11 = vadd.f32 1e-05, %v2057_v18  ;;  %2812 = vmatpush.bf16.msra.mxu1 %v3787_v52  ;;  %v3794_v18 = vld [vmem:[%s4899_s25 + $0x60] sm:$0xff] }
 0x566   : > { %v2109_v41 = vmul.f32 %v4169_v38, %v2064_v23  ;;  %v2107_v29 = vsel %vm2106_vm15, %v4167_v1, %v2103_v53  ;;  %vm2115_vm0 = vweird.f32 %v4169_v38  ;;  %v3810_v1 = vld [vmem:[%s4899_s25 + $0xe0] sm:$0xff]  ;;  %v3803_v23 = vld [vmem:[%s4899_s25 + $0xa8] sm:$0xff]  ;;  %2842 = vmatpush.bf16.msra.mxu2 %v3794_v18  ;;  %v3784_v53 = vld [vmem:[%s4899_s25 + $0x10] sm:$0xff] }
 0x567   : > { %4170 = vrsqrt.f32 %v2065_v11  ;;  %v2151_v16 = vmul.f32 %v2107_v29, %v5469_v44  ;;  %vm2116_vm2 = vmor %vm2114_vm1, %vm2115_vm0  ;;  %vm2124_vm4 = vweird.f32 %v2065_v11  ;;  %2900 = vmatpush.bf16.msrb.mxu0 %v3810_v1  ;;  %2870 = vmatpush.bf16.msra.mxu3 %v3803_v23  ;;  %v3801_v29 = vld [vmem:[%s4899_s25 + $0x98] sm:$0xff]  ;;  %v5679_v1 = vperm.slane %v2216_v27, 2 }
 0x568   : > { %v2110_v19 = vmul.f32 %v4169_v38, %v2109_v41  ;;  %v3793_v41 = vld [vmem:[%s4899_s25 + $0x58] sm:$0xff] }
 0x569   : > { %v2163_v46 = vmul.f32 %v5568_v20, %v2151_v16  ;;  %2813 = vmatpush.bf16.msra.mxu1 %v3786_v60 }
 0x56a   : > { %v2111_v57 = vmul.f32 0.5, %v2110_v19  ;;  %2843 = vmatpush.bf16.msra.mxu2 %v3793_v41  ;;  %v3783_v19 = vld [vmem:[%s4899_s25 + $0x8] sm:$0xff] }
 0x56b   : > { %v5595_v5 = vadd.f32 %v5574_v9, %v2163_v46  ;;  %2901 = vmatpush.bf16.msrb.mxu0 %v3809_v62  ;;  %2871 = vmatpush.bf16.msra.mxu3 %v3802_v61  ;;  %v3792_v46 = vld [vmem:[%s4899_s25 + $0x50] sm:$0xff] }
 0x56c   : > { %v2112_v6 = vsub.f32 1.5, %v2111_v57 }
 0x56d   : > { %v4171_v12 = vpop.eup %4170  ;;  %v2181_v44 = vpack.c.bf16 %v5595_v5, %v5592_v54  ;;  %2814 = vmatpush.bf16.msra.mxu1 %v3785_v21 }
 0x56e   : > { %v2113_v36 = vmul.f32 %v4169_v38, %v2112_v6  ;;  %v2119_v34 = vmul.f32 %v4171_v12, %v2065_v11  ;;  %vm2125_vm3 = vweird.f32 %v4171_v12  ;;  %v3808_v11 = vld [vmem:[%s4899_s25 + $0xd0] sm:$0xff]  ;;  %2844 = vmatpush.bf16.msra.mxu2 %v3792_v46 }
 0x56f   : > { %2399 = vmatmul.bf16.gmra.mxu1 %v2181_v44  ;;  %2428 = vmatmul.bf16.gmra.mxu2 %v2181_v44  ;;  %vm2126_vm5 = vmor %vm2124_vm4, %vm2125_vm3  ;;  %v3800_v6 = vld [vmem:[%s4899_s25 + $0x90] sm:$0xff] }
 0x570   : > { %v2120_v63 = vmul.f32 %v4171_v12, %v2119_v34  ;;  %2457 = vmatmul.bf16.gmra.mxu3 %v2181_v44  ;;  %2486 = vmatmul.bf16.gmra.mxu0 %v2181_v44  ;;  %v2117_v24 = vsel %vm2116_vm2, %v4169_v38, %v2113_v36  ;;  %v3782_v34 = vld [vmem:[%s4899_s25] sm:$0xff] }
 0x571   : > { %v2152_v49 = vmul.f32 %v2117_v24, %v5474_v15  ;;  %2815 = vmatpush.bf16.msra.mxu1 %v3784_v53  ;;  %2902 = vmatpush.bf16.msrb.mxu0 %v3808_v11  ;;  %v3806_v44 = vld [vmem:[%s4899_s25 + $0xc0] sm:$0xff]  ;;  %v3791_v24 = vld [vmem:[%s4899_s25 + $0x48] sm:$0xff] }
 0x572   : > { %v2121_v50 = vmul.f32 0.5, %v2120_v63  ;;  %2872 = vmatpush.bf16.msra.mxu3 %v3801_v29  ;;  %2845 = vmatpush.bf16.msra.mxu2 %v3791_v24 }
 0x573   : > { %v2164_v14 = vmul.f32 %v5568_v20, %v2152_v49 }
 0x574   : > { %v2122_v30 = vsub.f32 1.5, %v2121_v50  ;;  %v3799_v50 = vld [vmem:[%s4899_s25 + $0x88] sm:$0xff] }
 0x575   : > { %v5604_v39 = vadd.f32 %v5574_v9, %v2164_v14  ;;  %2816 = vmatpush.bf16.msra.mxu1 %v3783_v19  ;;  %2903 = vmatpush.bf16.msrb.mxu0 %v3807_v35  ;;  %v3798_v14 = vld [vmem:[%s4899_s25 + $0x80] sm:$0xff] }
 0x576   : > { %v2123_v28 = vmul.f32 %v4171_v12, %v2122_v30  ;;  %2873 = vmatpush.bf16.msra.mxu3 %v3800_v6 }
 0x578   : > { %v2127_v4 = vsel %vm2126_vm5, %v4171_v12, %v2123_v28 }
 0x579   : > { %v2153_v42 = vmul.f32 %v2127_v4, %v5479_v0  ;;  %v2049_v0 = vpop.xlane.xlu0 %2048  ;;  %2817 = vmatpush.bf16.msra.mxu1 %v3782_v34  ;;  %2904 = vmatpush.bf16.msrb.mxu0 %v3806_v44 }
 0x57a   : > { %v2058_v25 = vmul.f32 %v2049_v0, %v5447_v32  ;;  %2874 = vmatpush.bf16.msra.mxu3 %v3799_v50 }
 0x57b   : > { %v2165_v26 = vmul.f32 %v5568_v20, %v2153_v42  ;;  %v3790_v42 = vld [vmem:[%s4899_s25 + $0x40] sm:$0xff] }
 0x57c   : > { %v5612_v51 = vadd.f32 1e-05, %v2058_v25  ;;  %2846 = vmatpush.bf16.msra.mxu2 %v3790_v42 }
 0x57d   : > { %v5607_v47 = vadd.f32 %v5574_v9, %v2165_v26 }
 0x57e   : > { %4172 = vrsqrt.f32 %v5612_v51  ;;  %vm2134_vm7 = vweird.f32 %v5612_v51  ;;  %2875 = vmatpush.bf16.msra.mxu3 %v3798_v14 }
 0x57f   : > { %v2182_v15 = vpack.c.bf16 %v5607_v47, %v5604_v39 }
 0x581   : > { %2404 = vmatmul.bf16.gmra.mxu1 %v2182_v15  ;;  %2433 = vmatmul.bf16.gmra.mxu2 %v2182_v15 }
 0x582   : > { %2462 = vmatmul.bf16.gmra.mxu3 %v2182_v15  ;;  %2491 = vmatmul.bf16.gmra.mxu0 %v2182_v15 }
 0x584   : > { %v5623_v58 = vpop.eup %4172 }
 0x585   : > { %v2129_v3 = vmul.f32 %v5623_v58, %v5612_v51  ;;  %vm2135_vm6 = vweird.f32 %v5623_v58 }
 0x586   : > { %vm2136_vm8 = vmor %vm2134_vm7, %vm2135_vm6 }
 0x587   : > { %v2130_v2 = vmul.f32 %v5623_v58, %v2129_v3 }
 0x589   : > { %v2131_v38 = vmul.f32 0.5, %v2130_v2 }
 0x58b   : > { %v2132_v16 = vsub.f32 1.5, %v2131_v38 }
 0x58d   : > { %v2133_v12 = vmul.f32 %v5623_v58, %v2132_v16 }
 0x58f   : > { %v2137_v30 = vsel %vm2136_vm8, %v5623_v58, %v2133_v12 }
 0x590   : > { %v2154_v4 = vmul.f32 %v2137_v30, %v5484_v59 }
 0x592   : > { %v2166_v25 = vmul.f32 %v5568_v20, %v2154_v4 }
 0x594   : > { %v5662_v43 = vadd.f32 %v5574_v9, %v2166_v25 }
 0x5ba   : > { %v2051_v13 = vpop.xlane.xlu2 %2050 }
 0x5bb   : > { %v2059_v37 = vmul.f32 %v2051_v13, %v5447_v32 }
 0x5bd   : > { %v2067_v7 = vadd.f32 1e-05, %v2059_v37 }
 0x5bf   : > { %4174 = vrsqrt.f32 %v2067_v7  ;;  %vm2144_vm10 = vweird.f32 %v2067_v7 }
 0x5c5   : > { %v4175_v57 = vpop.eup %4174 }
 0x5c6   : > { %v2139_v36 = vmul.f32 %v4175_v57, %v2067_v7  ;;  %vm2145_vm9 = vweird.f32 %v4175_v57 }
 0x5c7   : > { %vm2146_vm11 = vmor %vm2144_vm10, %vm2145_vm9 }
 0x5c8   : > { %v2140_v63 = vmul.f32 %v4175_v57, %v2139_v36 }
 0x5ca   : > { %v2141_v49 = vmul.f32 0.5, %v2140_v63 }
 0x5cc   : > { %v2142_v28 = vsub.f32 1.5, %v2141_v49 }
 0x5ce   : > { %v2143_v26 = vmul.f32 %v4175_v57, %v2142_v28 }
 0x5d0   : > { %v2147_v15 = vsel %vm2146_vm11, %v4175_v57, %v2143_v26 }
 0x5d1   : > { %v2155_v0 = vmul.f32 %v2147_v15, %v5556_v45 }
 0x5d3   : > { %v2167_v51 = vmul.f32 %v5568_v20, %v2155_v0 }
 0x5d5   : > { %v5665_v59 = vadd.f32 %v5574_v9, %v2167_v51 }
 0x5d7   : > { %v2183_v10 = vpack.c.bf16 %v5665_v59, %v5662_v43 }
 0x5d9   : > { %2409 = vmatmul.bf16.gmra.mxu1 %v2183_v10  ;;  %2438 = vmatmul.bf16.gmra.mxu2 %v2183_v10 }
 0x5da   : > { %2467 = vmatmul.bf16.gmra.mxu3 %v2183_v10  ;;  %2496 = vmatmul.bf16.gmra.mxu0 %v2183_v10 }
 0x5dc   : > { %v2395_v40 = vpop.f32.mrf.mxu1 }
 0x5dd   : > { %v2482_v45 = vpop.f32.mrf.mxu0  ;;  %v2396_v52 = vadd.f32 %v2395_v40, %v5670_v33 }
 0x5de   : > { %v2483_v9 = vadd.f32 %v2482_v45, %v5672_v55 }
 0x5df   : > { %v2502_v31 = vmax.f32 %v2396_v52, 0.0 }
 0x5e0   : > { %v2505_v2 = vmax.f32 %v2483_v9, 0.0 }
 0x5e2   : > { %v2424_v20 = vpop.f32.mrf.mxu2 }
 0x5e3   : > { %v2453_v56 = vpop.f32.mrf.mxu3  ;;  %v2425_v37 = vadd.f32 %v2424_v20, %v5676_v22 }
 0x5e4   : > { %v2397_v58 = vpop.f32.mrf.mxu1  ;;  %v2454_v62 = vadd.f32 %v2453_v56, %v5679_v1 }
 0x5e5   : > { %v2398_v8 = vadd.f32 %v2397_v58, %v5670_v33  ;;  %v2484_v60 = vpop.f32.mrf.mxu0  ;;  %v2503_v41 = vmax.f32 %v2425_v37, 0.0 }
 0x5e6   : > { %v2485_v3 = vadd.f32 %v2484_v60, %v5672_v55  ;;  %v2504_v19 = vmax.f32 %v2454_v62, 0.0 }
 0x5e7   : > { %v2506_v23 = vmax.f32 %v2398_v8, 0.0 }
 0x5e8   : > { %v2509_v13 = vmax.f32 %v2485_v3, 0.0 }
 0x5e9   : > { %v2534_v21 = vpack.c.bf16 %v2506_v23, %v2502_v31 }
 0x5ea   : > { %v2537_v7 = vpack.c.bf16 %v2509_v13, %v2505_v2  ;;  %v2426_v18 = vpop.f32.mrf.mxu2 }
 0x5eb   : > { %v2427_v61 = vadd.f32 %v2426_v18, %v5676_v22  ;;  %v2455_v38 = vpop.f32.mrf.mxu3  ;;  %2818 = vmatmul.bf16.vlgmr.msra.gmra.mxu1 %v2534_v21 }
 0x5ec   : > { %v2456_v53 = vadd.f32 %v2455_v38, %v5679_v1  ;;  %2905 = vmatmul.bf16.vlgmr.msrb.gmra.mxu0 %v2537_v7  ;;  %v2400_v11 = vpop.f32.mrf.mxu1 }
 0x5ed   : > { %v2507_v29 = vmax.f32 %v2427_v61, 0.0  ;;  %v2487_v16 = vpop.f32.mrf.mxu0  ;;  %v2401_v12 = vadd.f32 %v2400_v11, %v5670_v33 }
 0x5ee   : > { %v2508_v35 = vmax.f32 %v2456_v53, 0.0  ;;  %v2488_v34 = vadd.f32 %v2487_v16, %v5672_v55 }
 0x5ef   : > { %v2535_v57 = vpack.c.bf16 %v2507_v29, %v2503_v41  ;;  %v2510_v30 = vmax.f32 %v2401_v12, 0.0 }
 0x5f0   : > { %v2536_v46 = vpack.c.bf16 %v2508_v35, %v2504_v19  ;;  %v2513_v28 = vmax.f32 %v2488_v34, 0.0 }
 0x5f1   : > { %2847 = vmatmul.bf16.vlgmr.msra.gmra.mxu2 %v2535_v57 }
 0x5f2   : > { %2876 = vmatmul.bf16.vlgmr.msra.gmra.mxu3 %v2536_v46  ;;  %v2429_v6 = vpop.f32.mrf.mxu2 }
 0x5f3   : > { %v2458_v36 = vpop.f32.mrf.mxu3  ;;  %v2430_v42 = vadd.f32 %v2429_v6, %v5676_v22 }
 0x5f4   : > { %v2402_v44 = vpop.f32.mrf.mxu1  ;;  %v2459_v26 = vadd.f32 %v2458_v36, %v5679_v1 }
 0x5f5   : > { %v2403_v63 = vadd.f32 %v2402_v44, %v5670_v33  ;;  %v2489_v24 = vpop.f32.mrf.mxu0  ;;  %v2511_v27 = vmax.f32 %v2430_v42, 0.0 }
 0x5f6   : > { %v2490_v50 = vadd.f32 %v2489_v24, %v5672_v55  ;;  %v2512_v20 = vmax.f32 %v2459_v26, 0.0 }
 0x5f7   : > { %v2514_v49 = vmax.f32 %v2403_v63, 0.0 }
 0x5f8   : > { %v2517_v4 = vmax.f32 %v2490_v50, 0.0 }
 0x5f9   : > { %v2538_v14 = vpack.c.bf16 %v2514_v49, %v2510_v30 }
 0x5fa   : > { %v2541_v15 = vpack.c.bf16 %v2517_v4, %v2513_v28  ;;  %v2431_v0 = vpop.f32.mrf.mxu2 }
 0x5fb   : > { %v2432_v25 = vadd.f32 %v2431_v0, %v5676_v22  ;;  %v2460_v51 = vpop.f32.mrf.mxu3  ;;  %2823 = vmatmul.bf16.gmra.mxu1 %v2538_v14 }
 0x5fc   : > { %v2461_v10 = vadd.f32 %v2460_v51, %v5679_v1  ;;  %2910 = vmatmul.bf16.gmra.mxu0 %v2541_v15 }
 0x5fd   : > { %v2515_v40 = vmax.f32 %v2432_v25, 0.0 }
 0x5fe   : > { %v2405_v45 = vpop.f32.mrf.mxu1  ;;  %v2516_v52 = vmax.f32 %v2461_v10, 0.0 }
 0x5ff   : > { %v2492_v56 = vpop.f32.mrf.mxu0  ;;  %v2539_v9 = vpack.c.bf16 %v2515_v40, %v2511_v27  ;;  %v2406_v60 = vadd.f32 %v2405_v45, %v5670_v33 }
 0x600   : > { %v2540_v58 = vpack.c.bf16 %v2516_v52, %v2512_v20  ;;  %v2493_v31 = vadd.f32 %v2492_v56, %v5672_v55 }
 0x601   : > { %2852 = vmatmul.bf16.gmra.mxu2 %v2539_v9  ;;  %v2518_v21 = vmax.f32 %v2406_v60, 0.0 }
 0x602   : > { %2881 = vmatmul.bf16.gmra.mxu3 %v2540_v58  ;;  %v2521_v7 = vmax.f32 %v2493_v31, 0.0 }
 0x604   : > { %v2434_v8 = vpop.f32.mrf.mxu2 }
 0x605   : > { %v2463_v3 = vpop.f32.mrf.mxu3  ;;  %v2435_v61 = vadd.f32 %v2434_v8, %v5676_v22 }
 0x606   : > { %v2407_v23 = vpop.f32.mrf.mxu1  ;;  %v2464_v53 = vadd.f32 %v2463_v3, %v5679_v1  ;;  %v5715_v3 = vld [vmem:[%s696_s30] ss:$0 sm:$0xff]  ;;  %s5978_s30 = smov %s5977_s23 }
 0x607   : > { %v2408_v2 = vadd.f32 %v2407_v23, %v5670_v33  ;;  %v2494_v13 = vpop.f32.mrf.mxu0  ;;  %v2519_v35 = vmax.f32 %v2435_v61, 0.0  ;;  %s4430_s9 = scalar_lea.hbm %s5978_s30, 128 }
 0x608   : > { %v2495_v37 = vadd.f32 %v2494_v13, %v5672_v55  ;;  %v2520_v46 = vmax.f32 %v2464_v53, 0.0 }
 0x609   : > { %v2522_v62 = vmax.f32 %v2408_v2, 0.0 }
 0x60a   : > { %v2525_v18 = vmax.f32 %v2495_v37, 0.0 }
 0x60b   : > { %v2542_v38 = vpack.c.bf16 %v2522_v62, %v2518_v21 }
 0x60c   : > { %v2545_v11 = vpack.c.bf16 %v2525_v18, %v2521_v7  ;;  %v2436_v41 = vpop.f32.mrf.mxu2 }
 0x60d   : > { %v2437_v29 = vadd.f32 %v2436_v41, %v5676_v22  ;;  %v2465_v16 = vpop.f32.mrf.mxu3  ;;  %2828 = vmatmul.bf16.gmra.mxu1 %v2542_v38 }
 0x60e   : > { %v2466_v19 = vadd.f32 %v2465_v16, %v5679_v1  ;;  %2915 = vmatmul.bf16.gmra.mxu0 %v2545_v11 }
 0x60f   : > { %v2523_v57 = vmax.f32 %v2437_v29, 0.0 }
 0x610   : > { %v2524_v6 = vmax.f32 %v2466_v19, 0.0 }
 0x611   : > { %v2543_v12 = vpack.c.bf16 %v2523_v57, %v2519_v35 }
 0x612   : > { %v2544_v36 = vpack.c.bf16 %v2524_v6, %v2520_v46 }
 0x613   : > { %2857 = vmatmul.bf16.gmra.mxu2 %v2543_v12 }
 0x614   : > { %2886 = vmatmul.bf16.gmra.mxu3 %v2544_v36 }
 0x656   : > { %v2410_v34 = vpop.f32.mrf.mxu1 }
 0x657   : > { %v2497_v44 = vpop.f32.mrf.mxu0  ;;  %v2411_v24 = vadd.f32 %v2410_v34, %v5670_v33 }
 0x658   : > { %v2498_v30 = vadd.f32 %v2497_v44, %v5672_v55 }
 0x659   : > { %v2526_v14 = vmax.f32 %v2411_v24, 0.0 }
 0x65a   : > { %v2529_v15 = vmax.f32 %v2498_v30, 0.0 }
 0x65c   : > { %v2439_v63 = vpop.f32.mrf.mxu2 }
 0x65d   : > { %v2468_v50 = vpop.f32.mrf.mxu3  ;;  %v2440_v25 = vadd.f32 %v2439_v63, %v5676_v22 }
 0x65e   : > { %v2412_v49 = vpop.f32.mrf.mxu1  ;;  %v2469_v10 = vadd.f32 %v2468_v50, %v5679_v1 }
 0x65f   : > { %v2413_v28 = vadd.f32 %v2412_v49, %v5670_v33  ;;  %v2499_v4 = vpop.f32.mrf.mxu0 }
 0x660   : > { %v2500_v42 = vadd.f32 %v2499_v4, %v5672_v55  ;;  %v2527_v55 = vmax.f32 %v2440_v25, 0.0  ;;  %v2528_v56 = vmax.f32 %v2469_v10, 0.0 }
 0x661   : > { %v2530_v26 = vmax.f32 %v2413_v28, 0.0 }
 0x662   : > { %v2533_v0 = vmax.f32 %v2500_v42, 0.0 }
 0x663   : > { %v2546_v51 = vpack.c.bf16 %v2530_v26, %v2526_v14 }
 0x664   : > { %v2549_v27 = vpack.c.bf16 %v2533_v0, %v2529_v15  ;;  %v2441_v40 = vpop.f32.mrf.mxu2 }
 0x665   : > { %v2442_v45 = vadd.f32 %v2441_v40, %v5676_v22  ;;  %v2470_v20 = vpop.f32.mrf.mxu3  ;;  %2833 = vmatmul.bf16.gmra.mxu1 %v2546_v51 }
 0x666   : > { %v2471_v33 = vadd.f32 %v2470_v20, %v5679_v1  ;;  %2920 = vmatmul.bf16.gmra.mxu0 %v2549_v27 }
 0x667   : > { %v2531_v52 = vmax.f32 %v2442_v45, 0.0 }
 0x668   : > { %v2532_v9 = vmax.f32 %v2471_v33, 0.0  ;;  %v2819_v58 = vpop.f32.mrf.mxu1 }
 0x669   : > { %v2547_v8 = vpack.c.bf16 %v2531_v52, %v2527_v55  ;;  %v2906_v22 = vpop.f32.mrf.mxu0  ;;  %v2820_v1 = vadd.f32 %v5715_v3, %v2819_v58 }
 0x66a   : > { %v2548_v60 = vpack.c.bf16 %v2532_v9, %v2528_v56 }
 0x66b   : > { %2862 = vmatmul.bf16.gmra.mxu2 %v2547_v8 }
 0x66c   : > { %2891 = vmatmul.bf16.gmra.mxu3 %v2548_v60 }
 0x670   : > { %v2821_v31 = vpop.f32.mrf.mxu1 }
 0x671   : > { %v2908_v21 = vpop.f32.mrf.mxu0  ;;  %v2822_v7 = vadd.f32 %v5715_v3, %v2821_v31 }
 0x674   : > { %v2848_v23 = vpop.f32.mrf.mxu2 }
 0x675   : > { %v2849_v2 = vadd.f32 %v2848_v23, %v2820_v1  ;;  %v2877_v13 = vpop.f32.mrf.mxu3 }
 0x677   : > { %v2878_v37 = vadd.f32 %v2877_v13, %v2849_v2 }
 0x678   : > { %v2824_v18 = vpop.f32.mrf.mxu1 }
 0x679   : > { %v2907_v62 = vadd.f32 %v2906_v22, %v2878_v37  ;;  %v2825_v16 = vadd.f32 %v5715_v3, %v2824_v18  ;;  %v2911_v19 = vpop.f32.mrf.mxu0 }
 0x67b   : > { %v2926_v61 = vadd.f32 %v2907_v62, %v5579_v48 }
 0x67c   : > { %v2850_v38 = vpop.f32.mrf.mxu2 }
 0x67d   : > { %v2851_v53 = vadd.f32 %v2850_v38, %v2822_v7  ;;  %v2879_v11 = vpop.f32.mrf.mxu3  ;;  %2934 = vadd.xlane.f32.xlu1 %v2926_v61 }
 0x67f   : > { %v2880_v41 = vadd.f32 %v2879_v11, %v2851_v53 }
 0x680   : > { %v2826_v46 = vpop.f32.mrf.mxu1 }
 0x681   : > { %v2909_v29 = vadd.f32 %v2908_v21, %v2880_v41  ;;  %v2827_v34 = vadd.f32 %v5715_v3, %v2826_v46  ;;  %v2913_v24 = vpop.f32.mrf.mxu0 }
 0x683   : > { %v5722_v35 = vadd.f32 %v2909_v29, %v5582_v17 }
 0x684   : > { %v2853_v57 = vpop.f32.mrf.mxu2 }
 0x685   : > { %v2854_v6 = vadd.f32 %v2853_v57, %v2825_v16  ;;  %v2882_v12 = vpop.f32.mrf.mxu3  ;;  %2936 = vadd.xlane.f32.xlu0 %v5722_v35 }
 0x687   : > { %v2883_v36 = vadd.f32 %v2882_v12, %v2854_v6 }
 0x689   : > { %v2912_v48 = vadd.f32 %v2911_v19, %v2883_v36 }
 0x68a   : > { %v2829_v49 = vpop.f32.mrf.mxu1 }
 0x68b   : > { %v2928_v44 = vadd.f32 %v2912_v48, %v5592_v54  ;;  %v2830_v42 = vadd.f32 %v5715_v3, %v2829_v49  ;;  %v2916_v0 = vpop.f32.mrf.mxu0 }
 0x68c   : > { %v2855_v63 = vpop.f32.mrf.mxu2 }
 0x68d   : > { %v2856_v50 = vadd.f32 %v2855_v63, %v2827_v34  ;;  %v2884_v30 = vpop.f32.mrf.mxu3  ;;  %2938 = vadd.xlane.f32.xlu2 %v2928_v44 }
 0x68f   : > { %v2885_v17 = vadd.f32 %v2884_v30, %v2856_v50 }
 0x691   : > { %v2914_v28 = vadd.f32 %v2913_v24, %v2885_v17 }
 0x692   : > { %v2831_v51 = vpop.f32.mrf.mxu1 }
 0x693   : > { %v2929_v4 = vadd.f32 %v2914_v28, %v5595_v5  ;;  %v2832_v10 = vadd.f32 %v5715_v3, %v2831_v51  ;;  %v2918_v5 = vpop.f32.mrf.mxu0 }
 0x695   : > { %2940 = vadd.xlane.f32.xlu1 %v2929_v4 }
 0x696   : > { %v2858_v14 = vpop.f32.mrf.mxu2 }
 0x697   : > { %v2859_v26 = vadd.f32 %v2858_v14, %v2830_v42  ;;  %v2887_v15 = vpop.f32.mrf.mxu3 }
 0x699   : > { %v2888_v25 = vadd.f32 %v2887_v15, %v2859_v26 }
 0x69b   : > { %v2917_v54 = vadd.f32 %v2916_v0, %v2888_v25 }
 0x69d   : > { %v2930_v27 = vadd.f32 %v2917_v54, %v5604_v39 }
 0x69e   : > { %v2860_v40 = vpop.f32.mrf.mxu2 }
 0x69f   : > { %v2861_v45 = vadd.f32 %v2860_v40, %v2832_v10  ;;  %2942 = vadd.xlane.f32.xlu0 %v2930_v27  ;;  %v2889_v20 = vpop.f32.mrf.mxu3 }
 0x6a1   : > { %v2890_v33 = vadd.f32 %v2889_v20, %v2861_v45 }
 0x6a3   : > { %v2919_v55 = vadd.f32 %v2918_v5, %v2890_v33 }
 0x6a5   : > { %v2931_v52 = vadd.f32 %v2919_v55, %v5607_v47 }
 0x6a7   : > { %2944 = vadd.xlane.f32.xlu2 %v2931_v52 }
 0x6e2   : > { %v2834_v56 = vpop.f32.mrf.mxu1 }
 0x6e3   : > { %v2835_v9 = vadd.f32 %v5715_v3, %v2834_v56  ;;  %v2921_v22 = vpop.f32.mrf.mxu0 }
 0x6ea   : > { %v2836_v23 = vpop.f32.mrf.mxu1 }
 0x6eb   : > { %v2837_v37 = vadd.f32 %v5715_v3, %v2836_v23  ;;  %v2923_v41 = vpop.f32.mrf.mxu0 }
 0x6ee   : > { %v2863_v58 = vpop.f32.mrf.mxu2 }
 0x6ef   : > { %v2864_v8 = vadd.f32 %v2863_v58, %v2835_v9  ;;  %v2892_v60 = vpop.f32.mrf.mxu3 }
 0x6f0   : > { %v2935_v31 = vpop.xlane.xlu1 %2934 }
 0x6f1   : > { %v2893_v1 = vadd.f32 %v2892_v60, %v2864_v8  ;;  %v2950_v39 = vmul.f32 %v2935_v31, %v5447_v32  ;;  %v5785_v60 = vld [vmem:[%s699_s16] ss:$0 sm:$0xff] }
 0x6f3   : > { %v2922_v2 = vadd.f32 %v2921_v22, %v2893_v1  ;;  %v5734_v13 = vsub.f32 %v2926_v61, %v2950_v39  ;;  %v5792_v1 = vld [vmem:[%s702_s7] ss:$0 sm:$0xff]  ;;  %s5976_s7 = sld [smem:[#allocation24_spill]] }
 0x6f5   : > { %v2966_v47 = vmul.f32 %v5734_v13, %v5734_v13  ;;  %v2932_v21 = vadd.f32 %v2922_v2, %v5662_v43 }
 0x6f6   : > { %v2865_v62 = vpop.f32.mrf.mxu2 }
 0x6f7   : > { %v2866_v7 = vadd.f32 %v2865_v62, %v2837_v37  ;;  %2974 = vadd.xlane.f32.xlu2 %v2966_v47  ;;  %2946 = vadd.xlane.f32.xlu1 %v2932_v21  ;;  %v2894_v18 = vpop.f32.mrf.mxu3 }
 0x6f8   : > { %v2937_v38 = vpop.xlane.xlu0 %2936 }
 0x6f9   : > { %v2895_v53 = vadd.f32 %v2894_v18, %v2866_v7  ;;  %v2951_v11 = vmul.f32 %v2937_v38, %v5447_v32  ;;  %s3815_s16 = sshll.u32 %s5976_s7, 6 }
 0x6fa   : > { %s3139_s29 = scalar_lea.hbm %s5977_s23, %s3815_s16 }
 0x6fb   : > { %v2924_v29 = vadd.f32 %v2923_v41, %v2895_v53  ;;  %v5742_v61 = vsub.f32 %v5722_v35, %v2951_v11  ;;  %s3142_s5 = sshll.u32 %s3139_s29, 4  ;;  %s3143_s5 = int_to_ptr.hbm [resolvable:$true] %s3142_s5 }
 0x6fc   : > { %s4424_s0 = sshra.s32 %s3143_s5, 4  ;;  %s4425_s0 = int_to_ptr.hbm [resolvable:$true] %s4424_s0 }
 0x6fd   : > { %v2933_v3 = vadd.f32 %v2924_v29, %v5665_v59  ;;  %v2967_v16 = vmul.f32 %v5742_v61, %v5742_v61  ;;  %s4426_s12 = scalar_lea.hbm %s4425_s0, 64  ;;  %p4431_p6 = scmp.lt.s32.totalorder %s4425_s0, %s5978_s30 }
 0x6fe   : > { %p4427_p11 = scmp.ne.s32.totalorder %s4425_s0, %s4426_s12  ;;  %p4432_p0 = scmp.lt.s32.totalorder %s4430_s9, %s4426_s12 }
 0x6ff   : > { %2948 = vadd.xlane.f32.xlu0 %v2933_v3  ;;  %2976 = vadd.xlane.f32.xlu1 %v2967_v16 }
 0x700   : > { %v2939_v43 = vpop.xlane.xlu2 %2938  ;;  %p4428_p12 = pnand %p4427_p11, %p4781_p3  ;;  %p4433_p7 = por %p4432_p0, %p4431_p6 }
 0x701   : > { %v2952_v19 = vmul.f32 %v2939_v43, %v5447_v32 }
 0x702   : > { %p4429_p4 = pneg %p4428_p12 }
 0x703   : > { %v5748_v57 = vsub.f32 %v2928_v44, %v2952_v19 }
 0x704   : > { %p4434_p9 = pnand %p4433_p7, %p4429_p4 }
 0x705   : > { %v2968_v46 = vmul.f32 %v5748_v57, %v5748_v57 }
 0x707   : > { %2978 = vadd.xlane.f32.xlu0 %v2968_v46 }
 0x708   : > { %v2941_v6 = vpop.xlane.xlu1 %2940 }
 0x709   : > { %v2953_v35 = vmul.f32 %v2941_v6, %v5447_v32 }
 0x70b   : > { %v5753_v12 = vsub.f32 %v2929_v4, %v2953_v35 }
 0x70d   : > { %v2969_v59 = vmul.f32 %v5753_v12, %v5753_v12 }
 0x70f   : > { %2980 = vadd.xlane.f32.xlu2 %v2969_v59 }
 0x712   : > { %v2943_v36 = vpop.xlane.xlu0 %2942 }
 0x713   : > { %v2954_v48 = vmul.f32 %v2943_v36, %v5447_v32 }
 0x715   : > { %v5758_v34 = vsub.f32 %v2930_v27, %v2954_v48 }
 0x717   : > { %v2970_v44 = vmul.f32 %v5758_v34, %v5758_v34 }
 0x719   : > { %2982 = vadd.xlane.f32.xlu1 %v2970_v44 }
 0x71a   : > { %v2945_v63 = vpop.xlane.xlu2 %2944 }
 0x71b   : > { %v2955_v24 = vmul.f32 %v2945_v63, %v5447_v32 }
 0x71d   : > { %v5763_v50 = vsub.f32 %v2931_v52, %v2955_v24 }
 0x71f   : > { %v2971_v30 = vmul.f32 %v5763_v50, %v5763_v50 }
 0x721   : > { %2984 = vadd.xlane.f32.xlu0 %v2971_v30 }
 0x76a   : > { %v2975_v49 = vpop.xlane.xlu2 %2974  ;;  %v2947_v17 = vpop.xlane.xlu1 %2946 }
 0x76b   : > { %v2990_v28 = vmul.f32 %v2975_v49, %v5447_v32  ;;  %v2956_v4 = vmul.f32 %v2947_v17, %v5447_v32 }
 0x76d   : > { %v2998_v42 = vadd.f32 1e-05, %v2990_v28  ;;  %v5769_v14 = vsub.f32 %v2932_v21, %v2956_v4 }
 0x76f   : > { %4176 = vrsqrt.f32 %v2998_v42  ;;  %v2972_v26 = vmul.f32 %v5769_v14, %v5769_v14  ;;  %vm3012_vm13 = vweird.f32 %v2998_v42 }
 0x771   : > { %2986 = vadd.xlane.f32.xlu2 %v2972_v26 }
 0x772   : > { %v2949_v15 = vpop.xlane.xlu0 %2948  ;;  %v2977_v0 = vpop.xlane.xlu1 %2976 }
 0x773   : > { %v2957_v25 = vmul.f32 %v2949_v15, %v5447_v32  ;;  %v2991_v51 = vmul.f32 %v2977_v0, %v5447_v32 }
 0x775   : > { %v4177_v54 = vpop.eup %4176  ;;  %v5775_v10 = vsub.f32 %v2933_v3, %v2957_v25  ;;  %v2999_v27 = vadd.f32 1e-05, %v2991_v51 }
 0x776   : > { %v3007_v40 = vmul.f32 %v4177_v54, %v2998_v42  ;;  %vm3013_vm12 = vweird.f32 %v4177_v54 }
 0x777   : > { %4178 = vrsqrt.f32 %v2999_v27  ;;  %v2973_v45 = vmul.f32 %v5775_v10, %v5775_v10  ;;  %vm3014_vm14 = vmor %vm3012_vm13, %vm3013_vm12  ;;  %vm3022_vm0 = vweird.f32 %v2999_v27 }
 0x778   : > { %v3008_v20 = vmul.f32 %v4177_v54, %v3007_v40 }
 0x779   : > { %2988 = vadd.xlane.f32.xlu1 %v2973_v45 }
 0x77a   : > { %v3009_v33 = vmul.f32 0.5, %v3008_v20  ;;  %v2979_v5 = vpop.xlane.xlu0 %2978 }
 0x77b   : > { %v2992_v55 = vmul.f32 %v2979_v5, %v5447_v32 }
 0x77c   : > { %v3010_v52 = vsub.f32 1.5, %v3009_v33 }
 0x77d   : > { %v4179_v56 = vpop.eup %4178  ;;  %v3000_v9 = vadd.f32 1e-05, %v2992_v55 }
 0x77e   : > { %v3011_v58 = vmul.f32 %v4177_v54, %v3010_v52  ;;  %v3017_v8 = vmul.f32 %v4179_v56, %v2999_v27  ;;  %vm3023_vm15 = vweird.f32 %v4179_v56 }
 0x77f   : > { %4180 = vrsqrt.f32 %v3000_v9  ;;  %vm3024_vm1 = vmor %vm3022_vm0, %vm3023_vm15  ;;  %vm3032_vm3 = vweird.f32 %v3000_v9 }
 0x780   : > { %v3015_v22 = vsel %vm3014_vm14, %v4177_v54, %v3011_v58  ;;  %v3018_v31 = vmul.f32 %v4179_v56, %v3017_v8 }
 0x781   : > { %v3086_v39 = vmul.f32 %v3015_v22, %v5734_v13 }
 0x782   : > { %v3019_v23 = vmul.f32 0.5, %v3018_v31  ;;  %v2981_v2 = vpop.xlane.xlu2 %2980 }
 0x783   : > { %v3098_v37 = vmul.f32 %v5785_v60, %v3086_v39  ;;  %v2993_v47 = vmul.f32 %v2981_v2, %v5447_v32 }
 0x784   : > { %v3020_v21 = vsub.f32 1.5, %v3019_v23 }
 0x785   : > { %v4181_v62 = vpop.eup %4180  ;;  %v3110_v7 = vadd.f32 %v5792_v1, %v3098_v37  ;;  %v3001_v18 = vadd.f32 1e-05, %v2993_v47 }
 0x786   : > { %v3021_v38 = vmul.f32 %v4179_v56, %v3020_v21  ;;  %v3027_v53 = vmul.f32 %v4181_v62, %v3000_v9  ;;  %vm3033_vm2 = vweird.f32 %v4181_v62 }
 0x787   : > { %3118 = vst [vmem:[%s4903_s22] sm:$0xff] %v3110_v7  ;;  %4182 = vrsqrt.f32 %v3001_v18  ;;  %vm3034_vm4 = vmor %vm3032_vm3, %vm3033_vm2  ;;  %vm3042_vm6 = vweird.f32 %v3001_v18 }
 0x788   : > { %v3025_v13 = vsel %vm3024_vm1, %v4179_v56, %v3021_v38  ;;  %v3028_v11 = vmul.f32 %v4181_v62, %v3027_v53 }
 0x789   : > { %v3087_v41 = vmul.f32 %v3025_v13, %v5742_v61 }
 0x78a   : > { %v3029_v29 = vmul.f32 0.5, %v3028_v11 }
 0x78b   : > { %v3099_v3 = vmul.f32 %v5785_v60, %v3087_v41 }
 0x78c   : > { %v2983_v16 = vpop.xlane.xlu1 %2982  ;;  %v3030_v43 = vsub.f32 1.5, %v3029_v29 }
 0x78d   : > { %v2994_v19 = vmul.f32 %v2983_v16, %v5447_v32  ;;  %v4183_v46 = vpop.eup %4182  ;;  %v3111_v6 = vadd.f32 %v5792_v1, %v3099_v3 }
 0x78e   : > { %v3031_v35 = vmul.f32 %v4181_v62, %v3030_v43  ;;  %v3037_v59 = vmul.f32 %v4183_v46, %v3001_v18  ;;  %vm3043_vm5 = vweird.f32 %v4183_v46 }
 0x78f   : > { %v3002_v36 = vadd.f32 1e-05, %v2994_v19  ;;  %3119 = vst [vmem:[%s4903_s22 + $0x8] sm:$0xff] %v3111_v6  ;;  %vm3044_vm7 = vmor %vm3042_vm6, %vm3043_vm5 }
 0x790   : > { %v3035_v48 = vsel %vm3034_vm4, %v4181_v62, %v3031_v35  ;;  %v3038_v61 = vmul.f32 %v4183_v46, %v3037_v59 }
 0x791   : > { %4184 = vrsqrt.f32 %v3002_v36  ;;  %v3088_v44 = vmul.f32 %v3035_v48, %v5748_v57  ;;  %vm3052_vm9 = vweird.f32 %v3002_v36 }
 0x792   : > { %v3039_v63 = vmul.f32 0.5, %v3038_v61 }
 0x793   : > { %v3100_v24 = vmul.f32 %v5785_v60, %v3088_v44 }
 0x794   : > { %v2985_v30 = vpop.xlane.xlu0 %2984  ;;  %v3040_v49 = vsub.f32 1.5, %v3039_v63 }
 0x795   : > { %v2995_v17 = vmul.f32 %v2985_v30, %v5447_v32  ;;  %v3112_v28 = vadd.f32 %v5792_v1, %v3100_v24 }
 0x796   : > { %v3041_v42 = vmul.f32 %v4183_v46, %v3040_v49 }
 0x797   : > { %v4185_v4 = vpop.eup %4184  ;;  %v3003_v26 = vadd.f32 1e-05, %v2995_v17  ;;  %3120 = vst [vmem:[%s4903_s22 + $0x10] sm:$0xff] %v3112_v28 }
 0x798   : > { %v3047_v15 = vmul.f32 %v4185_v4, %v3002_v36  ;;  %v3045_v0 = vsel %vm3044_vm7, %v4183_v46, %v3041_v42  ;;  %vm3053_vm8 = vweird.f32 %v4185_v4 }
 0x799   : > { %4186 = vrsqrt.f32 %v3003_v26  ;;  %v3089_v57 = vmul.f32 %v3045_v0, %v5753_v12  ;;  %vm3054_vm10 = vmor %vm3052_vm9, %vm3053_vm8  ;;  %vm3062_vm12 = vweird.f32 %v3003_v26 }
 0x79a   : > { %v3048_v25 = vmul.f32 %v4185_v4, %v3047_v15 }
 0x79b   : > { %v3101_v51 = vmul.f32 %v5785_v60, %v3089_v57 }
 0x79c   : > { %v3049_v54 = vmul.f32 0.5, %v3048_v25 }
 0x79d   : > { %v3113_v27 = vadd.f32 %v5792_v1, %v3101_v51 }
 0x79e   : > { %v3050_v40 = vsub.f32 1.5, %v3049_v54 }
 0x79f   : > { %v4187_v45 = vpop.eup %4186  ;;  %3121 = vst [vmem:[%s4903_s22 + $0x18] sm:$0xff] %v3113_v27 }
 0x7a0   : > { %v3051_v20 = vmul.f32 %v4185_v4, %v3050_v40  ;;  %v3057_v33 = vmul.f32 %v4187_v45, %v3003_v26  ;;  %vm3063_vm11 = vweird.f32 %v4187_v45 }
 0x7a1   : > { %vm3064_vm13 = vmor %vm3062_vm12, %vm3063_vm11 }
 0x7a2   : > { %v3055_v5 = vsel %vm3054_vm10, %v4185_v4, %v3051_v20  ;;  %v3058_v55 = vmul.f32 %v4187_v45, %v3057_v33 }
 0x7a3   : > { %v3090_v12 = vmul.f32 %v3055_v5, %v5758_v34 }
 0x7a4   : > { %v3059_v52 = vmul.f32 0.5, %v3058_v55 }
 0x7a5   : > { %v3102_v56 = vmul.f32 %v5785_v60, %v3090_v12 }
 0x7a6   : > { %v3060_v9 = vsub.f32 1.5, %v3059_v52 }
 0x7a7   : > { %v3114_v58 = vadd.f32 %v5792_v1, %v3102_v56 }
 0x7a8   : > { %v3061_v8 = vmul.f32 %v4187_v45, %v3060_v9 }
 0x7a9   : > { %3122 = vst [vmem:[%s4903_s22 + $0x20] sm:$0xff] %v3114_v58 }
 0x7aa   : > { %v3065_v22 = vsel %vm3064_vm13, %v4187_v45, %v3061_v8 }
 0x7ab   : > { %v3091_v31 = vmul.f32 %v3065_v22, %v5763_v50 }
 0x7ad   : > { %v3103_v39 = vmul.f32 %v5785_v60, %v3091_v31 }
 0x7af   : > { %v3115_v23 = vadd.f32 %v5792_v1, %v3103_v39 }
 0x7b1   : > { %3123 = vst [vmem:[%s4903_s22 + $0x28] sm:$0xff] %v3115_v23 }
 0x7e4   : > { %v2987_v34 = vpop.xlane.xlu2 %2986 }
 0x7e5   : > { %v2996_v2 = vmul.f32 %v2987_v34, %v5447_v32 }
 0x7e7   : > { %v3004_v37 = vadd.f32 1e-05, %v2996_v2 }
 0x7e9   : > { %4188 = vrsqrt.f32 %v3004_v37  ;;  %vm3072_vm15 = vweird.f32 %v3004_v37 }
 0x7ec   : > { %v2989_v47 = vpop.xlane.xlu1 %2988 }
 0x7ed   : > { %v2997_v21 = vmul.f32 %v2989_v47, %v5447_v32 }
 0x7ef   : > { %v4189_v62 = vpop.eup %4188  ;;  %v3005_v7 = vadd.f32 1e-05, %v2997_v21 }
 0x7f0   : > { %v3067_v18 = vmul.f32 %v4189_v62, %v3004_v37  ;;  %vm3073_vm14 = vweird.f32 %v4189_v62 }
 0x7f1   : > { %4190 = vrsqrt.f32 %v3005_v7  ;;  %vm3074_vm0 = vmor %vm3072_vm15, %vm3073_vm14  ;;  %vm3082_vm2 = vweird.f32 %v3005_v7 }
 0x7f2   : > { %v3068_v38 = vmul.f32 %v4189_v62, %v3067_v18 }
 0x7f4   : > { %v3069_v50 = vmul.f32 0.5, %v3068_v38 }
 0x7f6   : > { %v3070_v53 = vsub.f32 1.5, %v3069_v50 }
 0x7f7   : > { %v4191_v13 = vpop.eup %4190 }
 0x7f8   : > { %v3071_v11 = vmul.f32 %v4189_v62, %v3070_v53  ;;  %v3077_v41 = vmul.f32 %v4191_v13, %v3005_v7  ;;  %vm3083_vm1 = vweird.f32 %v4191_v13 }
 0x7f9   : > { %vm3084_vm3 = vmor %vm3082_vm2, %vm3083_vm1 }
 0x7fa   : > { %v3075_v29 = vsel %vm3074_vm0, %v4189_v62, %v3071_v11  ;;  %v3078_v3 = vmul.f32 %v4191_v13, %v3077_v41 }
 0x7fb   : > { %v3092_v32 = vmul.f32 %v3075_v29, %v5769_v14 }
 0x7fc   : > { %v3079_v16 = vmul.f32 0.5, %v3078_v3 }
 0x7fd   : > { %v3104_v43 = vmul.f32 %v5785_v60, %v3092_v32 }
 0x7fe   : > { %v3080_v19 = vsub.f32 1.5, %v3079_v16 }
 0x7ff   : > { %v3116_v46 = vadd.f32 %v5792_v1, %v3104_v43 }
 0x800   : > { %v3081_v6 = vmul.f32 %v4191_v13, %v3080_v19 }
 0x801   : > { %3124 = vst [vmem:[%s4903_s22 + $0x30] sm:$0xff] %v3116_v46 }
 0x802   : > { %v3085_v14 = vsel %vm3084_vm3, %v4191_v13, %v3081_v6 }
 0x803   : > { %v3093_v35 = vmul.f32 %v3085_v14, %v5775_v10 }
 0x805   : > { %v3105_v59 = vmul.f32 %v5785_v60, %v3093_v35 }
 0x807   : > { %v3117_v36 = vadd.f32 %v5792_v1, %v3105_v59 }
 0x809   : > { %3125 = vst [vmem:[%s4903_s22 + $0x38] sm:$0xff] %v3117_v36 }
 0x80a   : > { %4437 = shalt.err (!%p4434_p9)
}
 0x80b   : > { %s4556_s3 = smov 128   ;;  %s4557_s22 = smov 8  }
 0x80c   : > { %3834 = dma.vmem_to_hbm [thread:$0]  (%p4781_p3), %s3141_s2, 1024, %s3143_s5, %s3127_s21, %s4556_s3, %s4556_s3, %s4557_s22  }
 0x80d PF: > { %p3863_p13 = scmp.ge.s32.totalorder %s4544_s27, 2  ;;  %s3157_s24 = sand.u32 1, %s4516_s20  }
 0x80e   : > { %s3158_s6 = scalar_lea.sflag [#allocation4], %s3157_s24 }
 0x80f   : > { %p3859_p10 = pnand %p3863_p13, %p4797_p2 }
 0x811   : > { %p3860_p1 = pneg %p3859_p10 }
 0x813   : > { %4499 = dma.done.wait (%p3860_p1), %s3158_s6, 1024  }
 0x814   : > { %4501 = vsyncadd (%p3860_p1), %s3158_s6, 4294966272  ;;  %s36_s27 = sadd.s32 1, %s4544_s27   ;;  %s5980_s17 = sld [smem:[#allocation20_spill]] }
 0x815   : > { %p33_p5 = scmp.ge.s32.totalorder %s36_s27, 6   ;;  %s5981_s13 = sld [smem:[#allocation31_spill]] }
 0x816   : > { %s5982_s20 = sld [smem:[#allocation21_spill]]  ;;  %s5989_s18 = smov %s4512_s19 }
 0x817   : > { %s5983_s21 = sld [smem:[#allocation22_spill]] }
 0x818   : > { %s5984_s22 = sld [smem:[#allocation32_spill]]  ;;  %35 = sbr.rel (!%p33_p5) target bundleno = 28 (0x1c), region = 197 }
 0x819   : > { %s5985_s23 = sld [smem:[#allocation25_spill]] }
 0x81a   : > { %s5986_s24 = sld [smem:[#allocation26_spill]] }
 0x81b   : > { %s5987_s25 = sld [smem:[#allocation27_spill]]  ;;  %s5990_s19 = smov %s5981_s13 }
 0x81c   : > { %s5988_s26 = sld [smem:[#allocation28_spill]] }
 0x81d   :  { %3164 = vsyncpa [#allocation3], 1 }
 0x81e   :  { %3166 = vsyncpa [#allocation3 + $0x1], 1 }
 0x81f   :  { %3167 = vsyncpa [#allocation6], 1 }
 0x820   :  { %3169 = vsyncpa [#allocation6 + $0x1], 1 }
 0x821   :  { %3170 = vsyncpa [#allocation9], 1 }
 0x822   :  { %3172 = vsyncpa [#allocation9 + $0x1], 1 }
 0x823   :  { %3173 = vsyncpa [#allocation12], 1 }
 0x824   :  { %3175 = vsyncpa [#allocation12 + $0x1], 1 }
 0x825   :  { %3176 = vsyncpa [#allocation4], 1 }
 0x826   :  { %3178 = vsyncpa [#allocation4 + $0x1], 1 }

</bundles_post_ra>
